<compile_context>
chip_gen: v7x
topology: tpu7x:2x2x1
jax: 0.10.0
libtpu: 0.0.40
codegen_flags: <defaults>
</compile_context>

<pallas_src>
import jax
import jax.numpy as jnp
from jax.experimental import pallas as pl
from jax.experimental.pallas import tpu as pltpu


H, W = 32, 32
HW = H * W                 # 1024 flat spatial positions (lane axis)
KK = 3                     # conv kernel size
C_IN, C_IN_PAD = 3, 8      # input channels, padded to the f32 sublane tile
C1, C2 = 32, 32            # conv channel counts
H2_VALID, W2_VALID = 28, 28


def _convnet_toy_kernel(x_ref, w1_ref, b1_ref, w2_ref, b2_ref, wfc_ref, bfc_ref, o_ref):
    """Fused forward pass for B samples (grid iterates over the batch in blocks of B).

    x_ref   : (B, 8, 1024)        channel-major input, spatial flattened h*32+w, channels 3->8 zero pad
    w1_ref  : (32, 72)   bf16     row o, col (kh*3+kw)*8  + ci  = conv1 weight
    b1_ref  : (32, 1)    f32
    w2_ref  : (32, 288)  bf16     row o, col (kh*3+kw)*32 + ci  = conv2 weight
    b2_ref  : (32, 1)    f32
    wfc_ref : (M, 32, 1024) f32   wfc[m, c, h*32+w] = torch fc_w[m, c*784 + h*28 + w] (0 if h,w >= 28)
    bfc_ref : (1, M)     f32
    o_ref   : (1, B, M)           logits
    """
    B = x_ref.shape[0]
    M = o_ref.shape[-1]

    def tap_stack(act):
        # act: (C, 1024) f32.  piece_{kh,kw}[c, q] = act[c, q + kh*32 + kw]  (mod 1024; the wrap
        # only lands in spatial positions that are never read by valid conv outputs).
        pieces = []
        for kh in range(KK):
            for kw in range(KK):
                s = kh * W + kw
                if s == 0:
                    pieces.append(act)
                else:
                    pieces.append(pltpu.roll(act, shift=HW - s, axis=1))
        return jnp.concatenate(pieces, axis=0)

    lane_id = jax.lax.broadcasted_iota(jnp.int32, (1, M), 1)
    row_id = jax.lax.broadcasted_iota(jnp.int32, (B, M), 0)
    out_acc = jnp.zeros((B, M), jnp.float32)

    for bi in range(B):
        x = x_ref[bi]                                                  # (8, 1024) f32

        # ---------------- conv1: one bf16 MXU matmul, K = 9*8 = 72 ----------------
        stk1 = tap_stack(x).astype(jnp.bfloat16)                       # (72, 1024)
        h1 = jnp.dot(w1_ref[...], stk1, preferred_element_type=jnp.float32)
        h1 = jnp.maximum(h1 + b1_ref[...], 0.0)                        # (32, 1024) f32

        # ---------------- conv2: one bf16 MXU matmul, K = 9*32 = 288 ----------------
        stk2 = tap_stack(h1).astype(jnp.bfloat16)                      # (288, 1024)
        h2 = jnp.dot(w2_ref[...], stk2, preferred_element_type=jnp.float32)
        h2 = jnp.maximum(h2 + b2_ref[...], 0.0)                        # (32, 1024) f32

        # ---------------- Linear(28*28*32 -> M): M VPU multiply+reduce passes ----------------
        logits = bfc_ref[...]                                          # (1, M)
        for m in range(M):
            pc = jnp.sum(h2 * wfc_ref[m], axis=1, keepdims=True)       # (32, 1)  lane reduce
            sm = jnp.sum(pc, axis=0, keepdims=True)                    # (1, 1)   sublane reduce
            logits = logits + jnp.where(lane_id == m, sm, 0.0)

        out_acc = out_acc + jnp.where(row_id == bi, logits, 0.0)

    o_ref[...] = out_acc.reshape(o_ref.shape)


def convnet_toy_forward(x_nchw, params, block_batch=None):
    """x_nchw: (N, 3, 32, 32) float32 -> logits (N, num_class)."""
    N = x_nchw.shape[0]
    M = params["bfc"].shape[-1]
    if block_batch is None:
        # Keep grid length >= 2 so v7x's two TensorCores both get work.
        B = 2 if (N % 2 == 0 and N >= 4) else 1
    else:
        B = block_batch
    assert N % B == 0, "batch must be divisible by block_batch"
    G = N // B

    # Lane-dense channel-major input: (N, 3, 1024) -> pad channels to 8.
    x_cm = jnp.pad(x_nchw.astype(jnp.float32).reshape(N, C_IN, HW),
                   ((0, 0), (0, C_IN_PAD - C_IN), (0, 0)))

    out = pl.pallas_call(
        _convnet_toy_kernel,
        out_shape=jax.ShapeDtypeStruct((G, B, M), jnp.float32),
        grid=(G,),
        in_specs=[
            pl.BlockSpec((B, C_IN_PAD, HW), lambda n: (n, 0, 0)),
            pl.BlockSpec((C1, KK * KK * C_IN_PAD), lambda n: (0, 0)),
            pl.BlockSpec((C1, 1), lambda n: (0, 0)),
            pl.BlockSpec((C2, KK * KK * C1), lambda n: (0, 0)),
            pl.BlockSpec((C2, 1), lambda n: (0, 0)),
            pl.BlockSpec((M, C2, HW), lambda n: (0, 0, 0)),
            pl.BlockSpec((1, M), lambda n: (0, 0)),
        ],
        out_specs=pl.BlockSpec((1, B, M), lambda n: (n, 0, 0)),
        compiler_params=pltpu.CompilerParams(
            dimension_semantics=("parallel",),
            vmem_limit_bytes=32 * 1024 * 1024),
    )(x_cm, params["w1t"], params["b1"], params["w2t"], params["b2"],
      params["wfc"], params["bfc"])

    return out.reshape(N, M)


def init_params(key, num_class=10):
    """Synthetic parameters.  Returns (kernel_params, torch_params); torch_params uses the exact
    PyTorch layouts (OIHW conv weights, (out, in) linear weight with NCHW flatten columns)."""
    k = jax.random.split(key, 6)
    w1_oihw = jax.random.normal(k[0], (C1, C_IN, KK, KK), jnp.float32) * 0.1
    b1 = jax.random.normal(k[1], (C1,), jnp.float32) * 0.01
    w2_oihw = jax.random.normal(k[2], (C2, C1, KK, KK), jnp.float32) * 0.05
    b2 = jax.random.normal(k[3], (C2,), jnp.float32) * 0.01
    fc_w = jax.random.normal(k[4], (num_class, H2_VALID * W2_VALID * C2), jnp.float32) * 0.01
    fc_b = jax.random.normal(k[5], (num_class,), jnp.float32) * 0.01

    torch_params = {"w1_oihw": w1_oihw, "b1": b1, "w2_oihw": w2_oihw, "b2": b2,
                    "fc_w": fc_w, "fc_b": fc_b}

    # ---- one-time, init-side layout conversions (free at runtime) ----
    # conv1: OIHW, channels padded 3->8, repacked to (O, 9*8) with column (kh*3+kw)*8 + ci.
    w1_pad = jnp.pad(w1_oihw, ((0, 0), (0, C_IN_PAD - C_IN), (0, 0), (0, 0)))
    w1t = (jnp.transpose(w1_pad, (0, 2, 3, 1))
           .reshape(C1, KK * KK * C_IN_PAD).astype(jnp.bfloat16))
    # conv2: (O, 9*32) with column (kh*3+kw)*32 + ci.
    w2t = (jnp.transpose(w2_oihw, (0, 2, 3, 1))
           .reshape(C2, KK * KK * C1).astype(jnp.bfloat16))
    # FC: fold the PyTorch NCHW flatten (col = c*784 + h*28 + w) and the 28->32 spatial padding
    # into a (M, 32, 1024) weight; padded spatial positions get zeros.
    wfc = jnp.pad(fc_w.reshape(num_class, C2, H2_VALID, W2_VALID),
                  ((0, 0), (0, 0), (0, H - H2_VALID), (0, W - W2_VALID))
                  ).reshape(num_class, C2, HW)

    kernel_params = {
        "w1t": w1t, "b1": b1.reshape(C1, 1),
        "w2t": w2t, "b2": b2.reshape(C2, 1),
        "wfc": wfc, "bfc": fc_b.reshape(1, num_class),
    }
    return kernel_params, torch_params


def _reference_forward(x_nchw, torch_params):
    """Pure-JAX f32 mirror of the PyTorch module (correctness check only)."""
    p = jax.lax.Precision.HIGHEST
    h = jax.lax.conv_general_dilated(
        x_nchw, torch_params["w1_oihw"], (1, 1), "VALID",
        dimension_numbers=("NCHW", "OIHW", "NCHW"), precision=p)
    h = jnp.maximum(h + torch_params["b1"][None, :, None, None], 0.0)
    h = jax.lax.conv_general_dilated(
        h, torch_params["w2_oihw"], (1, 1), "VALID",
        dimension_numbers=("NCHW", "OIHW", "NCHW"), precision=p)
    h = jnp.maximum(h + torch_params["b2"][None, :, None, None], 0.0)
    flat = h.reshape(h.shape[0], -1)                       # NCHW flatten, like nn.Flatten()
    return jnp.dot(flat, torch_params["fc_w"].T, precision=p) + torch_params["fc_b"]


if __name__ == "__main__":
    key = jax.random.PRNGKey(0)
    pkey, xkey = jax.random.split(key)
    params, torch_params = init_params(pkey, num_class=10)
    # Input spatial size is pinned to 32x32 by the Linear(28*28*32, 10) layer.
    x = jax.random.normal(xkey, (2, 3, 32, 32), jnp.float32)

    out = jax.jit(convnet_toy_forward)(x, params)
    out = jax.block_until_ready(out)
    assert out.shape == (2, 10) and out.dtype == jnp.float32

    ref = _reference_forward(x, torch_params)
    max_err = float(jnp.max(jnp.abs(out - ref)))
    # bf16 MXU operands (per perf review) => loose-ish tolerance.
    assert max_err < 5e-2, f"mismatch vs reference: max abs err = {max_err}"

    print("KERNEL_OK")
</pallas_src>

<mosaic_0001>
module attributes {stable_mosaic.version = 11 : i64} {
  func.func @_convnet_toy_kernel(%arg0: i32, %arg1: memref<1x8x1024xf32, #tpu.memory_space<vmem>>, %arg2: memref<32x72xbf16, #tpu.memory_space<vmem>>, %arg3: memref<32x1xf32, #tpu.memory_space<vmem>>, %arg4: memref<32x288xbf16, #tpu.memory_space<vmem>>, %arg5: memref<32x1xf32, #tpu.memory_space<vmem>>, %arg6: memref<10x32x1024xf32, #tpu.memory_space<vmem>>, %arg7: memref<1x10xf32, #tpu.memory_space<vmem>>, %arg8: memref<1x1x10xf32, #tpu.memory_space<vmem>>) attributes {dimension_semantics = [#tpu.dimension_semantics<parallel>], iteration_bounds = array<i64: 2>, scalar_prefetch = 0 : i64, scratch_operands = 0 : i64, tpu.core_type = #tpu.core_type<tc>, window_params = [{transform_indices = @transform_0, window_bounds = array<i64: 1, 8, 1024>}, {pipeline_mode = #tpu.pipeline_mode<synchronous>, transform_indices = @transform_1, window_bounds = array<i64: 32, 72>}, {pipeline_mode = #tpu.pipeline_mode<synchronous>, transform_indices = @transform_2, window_bounds = array<i64: 32, 1>}, {pipeline_mode = #tpu.pipeline_mode<synchronous>, transform_indices = @transform_3, window_bounds = array<i64: 32, 288>}, {pipeline_mode = #tpu.pipeline_mode<synchronous>, transform_indices = @transform_4, window_bounds = array<i64: 32, 1>}, {pipeline_mode = #tpu.pipeline_mode<synchronous>, transform_indices = @transform_5, window_bounds = array<i64: 10, 32, 1024>}, {pipeline_mode = #tpu.pipeline_mode<synchronous>, transform_indices = @transform_6, window_bounds = array<i64: 1, 10>}, {transform_indices = @transform_7, window_bounds = array<i64: 1, 1, 10>}]} {
    %0 = tpu.iota {dimensions = array<i32: 1>} : vector<1x10xi32>
    %1 = tpu.iota {dimensions = array<i32: 0>} : vector<1x10xi32>
    %cst = arith.constant 0.000000e+00 : f32
    %2 = vector.broadcast %cst : f32 to vector<1x10xf32>
    %c0 = arith.constant 0 : index
    %c0_0 = arith.constant 0 : index
    %c0_1 = arith.constant 0 : index
    %3 = vector.load %arg1[%c0, %c0_0, %c0_1] : memref<1x8x1024xf32, #tpu.memory_space<vmem>>, vector<1x8x1024xf32>
    %4 = vector.shape_cast %3 : vector<1x8x1024xf32> to vector<8x1024xf32>
    %c1023_i32 = arith.constant 1023 : i32
    %5 = tpu.dynamic_rotate %4 by %c1023_i32 dim 1 : vector<8x1024xf32>, i32 -> vector<8x1024xf32>
    %c1022_i32 = arith.constant 1022 : i32
    %6 = tpu.dynamic_rotate %4 by %c1022_i32 dim 1 : vector<8x1024xf32>, i32 -> vector<8x1024xf32>
    %c992_i32 = arith.constant 992 : i32
    %7 = tpu.dynamic_rotate %4 by %c992_i32 dim 1 : vector<8x1024xf32>, i32 -> vector<8x1024xf32>
    %c991_i32 = arith.constant 991 : i32
    %8 = tpu.dynamic_rotate %4 by %c991_i32 dim 1 : vector<8x1024xf32>, i32 -> vector<8x1024xf32>
    %c990_i32 = arith.constant 990 : i32
    %9 = tpu.dynamic_rotate %4 by %c990_i32 dim 1 : vector<8x1024xf32>, i32 -> vector<8x1024xf32>
    %c960_i32 = arith.constant 960 : i32
    %10 = tpu.dynamic_rotate %4 by %c960_i32 dim 1 : vector<8x1024xf32>, i32 -> vector<8x1024xf32>
    %c959_i32 = arith.constant 959 : i32
    %11 = tpu.dynamic_rotate %4 by %c959_i32 dim 1 : vector<8x1024xf32>, i32 -> vector<8x1024xf32>
    %c958_i32 = arith.constant 958 : i32
    %12 = tpu.dynamic_rotate %4 by %c958_i32 dim 1 : vector<8x1024xf32>, i32 -> vector<8x1024xf32>
    %13 = tpu.concatenate %4, %5, %6, %7, %8, %9, %10, %11, %12 in 0 : vector<8x1024xf32>, vector<8x1024xf32>, vector<8x1024xf32>, vector<8x1024xf32>, vector<8x1024xf32>, vector<8x1024xf32>, vector<8x1024xf32>, vector<8x1024xf32>, vector<8x1024xf32> -> vector<72x1024xf32>
    %14 = arith.truncf %13 : vector<72x1024xf32> to vector<72x1024xbf16>
    %c0_2 = arith.constant 0 : index
    %c0_3 = arith.constant 0 : index
    %15 = vector.load %arg2[%c0_2, %c0_3] : memref<32x72xbf16, #tpu.memory_space<vmem>>, vector<32x72xbf16>
    %cst_4 = arith.constant dense<0.000000e+00> : vector<32x1024xf32>
    %16 = tpu.matmul %15, %14, %cst_4 {dimension_numbers = #tpu.dot_dimension_numbers<[1], [0], [0], [1], [0, 0, 1, 1], [], []>} : vector<32x72xbf16>, vector<72x1024xbf16>, vector<32x1024xf32> -> vector<32x1024xf32>
    %c0_5 = arith.constant 0 : index
    %c0_6 = arith.constant 0 : index
    %17 = vector.load %arg3[%c0_5, %c0_6] : memref<32x1xf32, #tpu.memory_space<vmem>>, vector<32x1xf32>
    %18 = vector.broadcast %17 : vector<32x1xf32> to vector<32x1024xf32>
    %19 = arith.addf %16, %18 : vector<32x1024xf32>
    %cst_7 = arith.constant 0.000000e+00 : f32
    %20 = vector.broadcast %cst_7 : f32 to vector<32x1024xf32>
    %21 = arith.maximumf %19, %20 : vector<32x1024xf32>
    %c1023_i32_8 = arith.constant 1023 : i32
    %22 = tpu.dynamic_rotate %21 by %c1023_i32_8 dim 1 : vector<32x1024xf32>, i32 -> vector<32x1024xf32>
    %c1022_i32_9 = arith.constant 1022 : i32
    %23 = tpu.dynamic_rotate %21 by %c1022_i32_9 dim 1 : vector<32x1024xf32>, i32 -> vector<32x1024xf32>
    %c992_i32_10 = arith.constant 992 : i32
    %24 = tpu.dynamic_rotate %21 by %c992_i32_10 dim 1 : vector<32x1024xf32>, i32 -> vector<32x1024xf32>
    %c991_i32_11 = arith.constant 991 : i32
    %25 = tpu.dynamic_rotate %21 by %c991_i32_11 dim 1 : vector<32x1024xf32>, i32 -> vector<32x1024xf32>
    %c990_i32_12 = arith.constant 990 : i32
    %26 = tpu.dynamic_rotate %21 by %c990_i32_12 dim 1 : vector<32x1024xf32>, i32 -> vector<32x1024xf32>
    %c960_i32_13 = arith.constant 960 : i32
    %27 = tpu.dynamic_rotate %21 by %c960_i32_13 dim 1 : vector<32x1024xf32>, i32 -> vector<32x1024xf32>
    %c959_i32_14 = arith.constant 959 : i32
    %28 = tpu.dynamic_rotate %21 by %c959_i32_14 dim 1 : vector<32x1024xf32>, i32 -> vector<32x1024xf32>
    %c958_i32_15 = arith.constant 958 : i32
    %29 = tpu.dynamic_rotate %21 by %c958_i32_15 dim 1 : vector<32x1024xf32>, i32 -> vector<32x1024xf32>
    %30 = tpu.concatenate %21, %22, %23, %24, %25, %26, %27, %28, %29 in 0 : vector<32x1024xf32>, vector<32x1024xf32>, vector<32x1024xf32>, vector<32x1024xf32>, vector<32x1024xf32>, vector<32x1024xf32>, vector<32x1024xf32>, vector<32x1024xf32>, vector<32x1024xf32> -> vector<288x1024xf32>
    %31 = arith.truncf %30 : vector<288x1024xf32> to vector<288x1024xbf16>
    %c0_16 = arith.constant 0 : index
    %c0_17 = arith.constant 0 : index
    %32 = vector.load %arg4[%c0_16, %c0_17] : memref<32x288xbf16, #tpu.memory_space<vmem>>, vector<32x288xbf16>
    %cst_18 = arith.constant dense<0.000000e+00> : vector<32x1024xf32>
    %33 = tpu.matmul %32, %31, %cst_18 {dimension_numbers = #tpu.dot_dimension_numbers<[1], [0], [0], [1], [0, 0, 1, 1], [], []>} : vector<32x288xbf16>, vector<288x1024xbf16>, vector<32x1024xf32> -> vector<32x1024xf32>
    %c0_19 = arith.constant 0 : index
    %c0_20 = arith.constant 0 : index
    %34 = vector.load %arg5[%c0_19, %c0_20] : memref<32x1xf32, #tpu.memory_space<vmem>>, vector<32x1xf32>
    %35 = vector.broadcast %34 : vector<32x1xf32> to vector<32x1024xf32>
    %36 = arith.addf %33, %35 : vector<32x1024xf32>
    %cst_21 = arith.constant 0.000000e+00 : f32
    %37 = vector.broadcast %cst_21 : f32 to vector<32x1024xf32>
    %38 = arith.maximumf %36, %37 : vector<32x1024xf32>
    %c0_22 = arith.constant 0 : index
    %c0_23 = arith.constant 0 : index
    %39 = vector.load %arg7[%c0_22, %c0_23] : memref<1x10xf32, #tpu.memory_space<vmem>>, vector<1x10xf32>
    %c0_24 = arith.constant 0 : index
    %c0_25 = arith.constant 0 : index
    %c0_26 = arith.constant 0 : index
    %40 = vector.load %arg6[%c0_24, %c0_25, %c0_26] : memref<10x32x1024xf32, #tpu.memory_space<vmem>>, vector<1x32x1024xf32>
    %41 = vector.shape_cast %40 : vector<1x32x1024xf32> to vector<32x1024xf32>
    %42 = arith.mulf %38, %41 : vector<32x1024xf32>
    %cst_27 = arith.constant dense<0.000000e+00> : vector<32xf32>
    %43 = vector.multi_reduction <add>, %42, %cst_27 [1] : vector<32x1024xf32> to vector<32xf32>
    %44 = vector.shape_cast %43 : vector<32xf32> to vector<32x1xf32>
    %cst_28 = arith.constant dense<0.000000e+00> : vector<1xf32>
    %45 = vector.multi_reduction <add>, %44, %cst_28 [0] : vector<32x1xf32> to vector<1xf32>
    %46 = vector.shape_cast %45 : vector<1xf32> to vector<1x1xf32>
    %c0_i32 = arith.constant 0 : i32
    %47 = vector.broadcast %c0_i32 : i32 to vector<1x10xi32>
    %48 = arith.cmpi eq, %0, %47 : vector<1x10xi32>
    %cst_29 = arith.constant 0.000000e+00 : f32
    %49 = vector.shape_cast %46 : vector<1x1xf32> to vector<1x1xf32>
    %50 = vector.broadcast %49 : vector<1x1xf32> to vector<1x10xf32>
    %51 = vector.broadcast %cst_29 : f32 to vector<1x10xf32>
    %52 = arith.select %48, %50, %51 : vector<1x10xi1>, vector<1x10xf32>
    %53 = arith.addf %39, %52 : vector<1x10xf32>
    %c1 = arith.constant 1 : index
    %c0_30 = arith.constant 0 : index
    %c0_31 = arith.constant 0 : index
    %54 = vector.load %arg6[%c1, %c0_30, %c0_31] : memref<10x32x1024xf32, #tpu.memory_space<vmem>>, vector<1x32x1024xf32>
    %55 = vector.shape_cast %54 : vector<1x32x1024xf32> to vector<32x1024xf32>
    %56 = arith.mulf %38, %55 : vector<32x1024xf32>
    %cst_32 = arith.constant dense<0.000000e+00> : vector<32xf32>
    %57 = vector.multi_reduction <add>, %56, %cst_32 [1] : vector<32x1024xf32> to vector<32xf32>
    %58 = vector.shape_cast %57 : vector<32xf32> to vector<32x1xf32>
    %cst_33 = arith.constant dense<0.000000e+00> : vector<1xf32>
    %59 = vector.multi_reduction <add>, %58, %cst_33 [0] : vector<32x1xf32> to vector<1xf32>
    %60 = vector.shape_cast %59 : vector<1xf32> to vector<1x1xf32>
    %c1_i32 = arith.constant 1 : i32
    %61 = vector.broadcast %c1_i32 : i32 to vector<1x10xi32>
    %62 = arith.cmpi eq, %0, %61 : vector<1x10xi32>
    %cst_34 = arith.constant 0.000000e+00 : f32
    %63 = vector.shape_cast %60 : vector<1x1xf32> to vector<1x1xf32>
    %64 = vector.broadcast %63 : vector<1x1xf32> to vector<1x10xf32>
    %65 = vector.broadcast %cst_34 : f32 to vector<1x10xf32>
    %66 = arith.select %62, %64, %65 : vector<1x10xi1>, vector<1x10xf32>
    %67 = arith.addf %53, %66 : vector<1x10xf32>
    %c2 = arith.constant 2 : index
    %c0_35 = arith.constant 0 : index
    %c0_36 = arith.constant 0 : index
    %68 = vector.load %arg6[%c2, %c0_35, %c0_36] : memref<10x32x1024xf32, #tpu.memory_space<vmem>>, vector<1x32x1024xf32>
    %69 = vector.shape_cast %68 : vector<1x32x1024xf32> to vector<32x1024xf32>
    %70 = arith.mulf %38, %69 : vector<32x1024xf32>
    %cst_37 = arith.constant dense<0.000000e+00> : vector<32xf32>
    %71 = vector.multi_reduction <add>, %70, %cst_37 [1] : vector<32x1024xf32> to vector<32xf32>
    %72 = vector.shape_cast %71 : vector<32xf32> to vector<32x1xf32>
    %cst_38 = arith.constant dense<0.000000e+00> : vector<1xf32>
    %73 = vector.multi_reduction <add>, %72, %cst_38 [0] : vector<32x1xf32> to vector<1xf32>
    %74 = vector.shape_cast %73 : vector<1xf32> to vector<1x1xf32>
    %c2_i32 = arith.constant 2 : i32
    %75 = vector.broadcast %c2_i32 : i32 to vector<1x10xi32>
    %76 = arith.cmpi eq, %0, %75 : vector<1x10xi32>
    %cst_39 = arith.constant 0.000000e+00 : f32
    %77 = vector.shape_cast %74 : vector<1x1xf32> to vector<1x1xf32>
    %78 = vector.broadcast %77 : vector<1x1xf32> to vector<1x10xf32>
    %79 = vector.broadcast %cst_39 : f32 to vector<1x10xf32>
    %80 = arith.select %76, %78, %79 : vector<1x10xi1>, vector<1x10xf32>
    %81 = arith.addf %67, %80 : vector<1x10xf32>
    %c3 = arith.constant 3 : index
    %c0_40 = arith.constant 0 : index
    %c0_41 = arith.constant 0 : index
    %82 = vector.load %arg6[%c3, %c0_40, %c0_41] : memref<10x32x1024xf32, #tpu.memory_space<vmem>>, vector<1x32x1024xf32>
    %83 = vector.shape_cast %82 : vector<1x32x1024xf32> to vector<32x1024xf32>
    %84 = arith.mulf %38, %83 : vector<32x1024xf32>
    %cst_42 = arith.constant dense<0.000000e+00> : vector<32xf32>
    %85 = vector.multi_reduction <add>, %84, %cst_42 [1] : vector<32x1024xf32> to vector<32xf32>
    %86 = vector.shape_cast %85 : vector<32xf32> to vector<32x1xf32>
    %cst_43 = arith.constant dense<0.000000e+00> : vector<1xf32>
    %87 = vector.multi_reduction <add>, %86, %cst_43 [0] : vector<32x1xf32> to vector<1xf32>
    %88 = vector.shape_cast %87 : vector<1xf32> to vector<1x1xf32>
    %c3_i32 = arith.constant 3 : i32
    %89 = vector.broadcast %c3_i32 : i32 to vector<1x10xi32>
    %90 = arith.cmpi eq, %0, %89 : vector<1x10xi32>
    %cst_44 = arith.constant 0.000000e+00 : f32
    %91 = vector.shape_cast %88 : vector<1x1xf32> to vector<1x1xf32>
    %92 = vector.broadcast %91 : vector<1x1xf32> to vector<1x10xf32>
    %93 = vector.broadcast %cst_44 : f32 to vector<1x10xf32>
    %94 = arith.select %90, %92, %93 : vector<1x10xi1>, vector<1x10xf32>
    %95 = arith.addf %81, %94 : vector<1x10xf32>
    %c4 = arith.constant 4 : index
    %c0_45 = arith.constant 0 : index
    %c0_46 = arith.constant 0 : index
    %96 = vector.load %arg6[%c4, %c0_45, %c0_46] : memref<10x32x1024xf32, #tpu.memory_space<vmem>>, vector<1x32x1024xf32>
    %97 = vector.shape_cast %96 : vector<1x32x1024xf32> to vector<32x1024xf32>
    %98 = arith.mulf %38, %97 : vector<32x1024xf32>
    %cst_47 = arith.constant dense<0.000000e+00> : vector<32xf32>
    %99 = vector.multi_reduction <add>, %98, %cst_47 [1] : vector<32x1024xf32> to vector<32xf32>
    %100 = vector.shape_cast %99 : vector<32xf32> to vector<32x1xf32>
    %cst_48 = arith.constant dense<0.000000e+00> : vector<1xf32>
    %101 = vector.multi_reduction <add>, %100, %cst_48 [0] : vector<32x1xf32> to vector<1xf32>
    %102 = vector.shape_cast %101 : vector<1xf32> to vector<1x1xf32>
    %c4_i32 = arith.constant 4 : i32
    %103 = vector.broadcast %c4_i32 : i32 to vector<1x10xi32>
    %104 = arith.cmpi eq, %0, %103 : vector<1x10xi32>
    %cst_49 = arith.constant 0.000000e+00 : f32
    %105 = vector.shape_cast %102 : vector<1x1xf32> to vector<1x1xf32>
    %106 = vector.broadcast %105 : vector<1x1xf32> to vector<1x10xf32>
    %107 = vector.broadcast %cst_49 : f32 to vector<1x10xf32>
    %108 = arith.select %104, %106, %107 : vector<1x10xi1>, vector<1x10xf32>
    %109 = arith.addf %95, %108 : vector<1x10xf32>
    %c5 = arith.constant 5 : index
    %c0_50 = arith.constant 0 : index
    %c0_51 = arith.constant 0 : index
    %110 = vector.load %arg6[%c5, %c0_50, %c0_51] : memref<10x32x1024xf32, #tpu.memory_space<vmem>>, vector<1x32x1024xf32>
    %111 = vector.shape_cast %110 : vector<1x32x1024xf32> to vector<32x1024xf32>
    %112 = arith.mulf %38, %111 : vector<32x1024xf32>
    %cst_52 = arith.constant dense<0.000000e+00> : vector<32xf32>
    %113 = vector.multi_reduction <add>, %112, %cst_52 [1] : vector<32x1024xf32> to vector<32xf32>
    %114 = vector.shape_cast %113 : vector<32xf32> to vector<32x1xf32>
    %cst_53 = arith.constant dense<0.000000e+00> : vector<1xf32>
    %115 = vector.multi_reduction <add>, %114, %cst_53 [0] : vector<32x1xf32> to vector<1xf32>
    %116 = vector.shape_cast %115 : vector<1xf32> to vector<1x1xf32>
    %c5_i32 = arith.constant 5 : i32
    %117 = vector.broadcast %c5_i32 : i32 to vector<1x10xi32>
    %118 = arith.cmpi eq, %0, %117 : vector<1x10xi32>
    %cst_54 = arith.constant 0.000000e+00 : f32
    %119 = vector.shape_cast %116 : vector<1x1xf32> to vector<1x1xf32>
    %120 = vector.broadcast %119 : vector<1x1xf32> to vector<1x10xf32>
    %121 = vector.broadcast %cst_54 : f32 to vector<1x10xf32>
    %122 = arith.select %118, %120, %121 : vector<1x10xi1>, vector<1x10xf32>
    %123 = arith.addf %109, %122 : vector<1x10xf32>
    %c6 = arith.constant 6 : index
    %c0_55 = arith.constant 0 : index
    %c0_56 = arith.constant 0 : index
    %124 = vector.load %arg6[%c6, %c0_55, %c0_56] : memref<10x32x1024xf32, #tpu.memory_space<vmem>>, vector<1x32x1024xf32>
    %125 = vector.shape_cast %124 : vector<1x32x1024xf32> to vector<32x1024xf32>
    %126 = arith.mulf %38, %125 : vector<32x1024xf32>
    %cst_57 = arith.constant dense<0.000000e+00> : vector<32xf32>
    %127 = vector.multi_reduction <add>, %126, %cst_57 [1] : vector<32x1024xf32> to vector<32xf32>
    %128 = vector.shape_cast %127 : vector<32xf32> to vector<32x1xf32>
    %cst_58 = arith.constant dense<0.000000e+00> : vector<1xf32>
    %129 = vector.multi_reduction <add>, %128, %cst_58 [0] : vector<32x1xf32> to vector<1xf32>
    %130 = vector.shape_cast %129 : vector<1xf32> to vector<1x1xf32>
    %c6_i32 = arith.constant 6 : i32
    %131 = vector.broadcast %c6_i32 : i32 to vector<1x10xi32>
    %132 = arith.cmpi eq, %0, %131 : vector<1x10xi32>
    %cst_59 = arith.constant 0.000000e+00 : f32
    %133 = vector.shape_cast %130 : vector<1x1xf32> to vector<1x1xf32>
    %134 = vector.broadcast %133 : vector<1x1xf32> to vector<1x10xf32>
    %135 = vector.broadcast %cst_59 : f32 to vector<1x10xf32>
    %136 = arith.select %132, %134, %135 : vector<1x10xi1>, vector<1x10xf32>
    %137 = arith.addf %123, %136 : vector<1x10xf32>
    %c7 = arith.constant 7 : index
    %c0_60 = arith.constant 0 : index
    %c0_61 = arith.constant 0 : index
    %138 = vector.load %arg6[%c7, %c0_60, %c0_61] : memref<10x32x1024xf32, #tpu.memory_space<vmem>>, vector<1x32x1024xf32>
    %139 = vector.shape_cast %138 : vector<1x32x1024xf32> to vector<32x1024xf32>
    %140 = arith.mulf %38, %139 : vector<32x1024xf32>
    %cst_62 = arith.constant dense<0.000000e+00> : vector<32xf32>
    %141 = vector.multi_reduction <add>, %140, %cst_62 [1] : vector<32x1024xf32> to vector<32xf32>
    %142 = vector.shape_cast %141 : vector<32xf32> to vector<32x1xf32>
    %cst_63 = arith.constant dense<0.000000e+00> : vector<1xf32>
    %143 = vector.multi_reduction <add>, %142, %cst_63 [0] : vector<32x1xf32> to vector<1xf32>
    %144 = vector.shape_cast %143 : vector<1xf32> to vector<1x1xf32>
    %c7_i32 = arith.constant 7 : i32
    %145 = vector.broadcast %c7_i32 : i32 to vector<1x10xi32>
    %146 = arith.cmpi eq, %0, %145 : vector<1x10xi32>
    %cst_64 = arith.constant 0.000000e+00 : f32
    %147 = vector.shape_cast %144 : vector<1x1xf32> to vector<1x1xf32>
    %148 = vector.broadcast %147 : vector<1x1xf32> to vector<1x10xf32>
    %149 = vector.broadcast %cst_64 : f32 to vector<1x10xf32>
    %150 = arith.select %146, %148, %149 : vector<1x10xi1>, vector<1x10xf32>
    %151 = arith.addf %137, %150 : vector<1x10xf32>
    %c8 = arith.constant 8 : index
    %c0_65 = arith.constant 0 : index
    %c0_66 = arith.constant 0 : index
    %152 = vector.load %arg6[%c8, %c0_65, %c0_66] : memref<10x32x1024xf32, #tpu.memory_space<vmem>>, vector<1x32x1024xf32>
    %153 = vector.shape_cast %152 : vector<1x32x1024xf32> to vector<32x1024xf32>
    %154 = arith.mulf %38, %153 : vector<32x1024xf32>
    %cst_67 = arith.constant dense<0.000000e+00> : vector<32xf32>
    %155 = vector.multi_reduction <add>, %154, %cst_67 [1] : vector<32x1024xf32> to vector<32xf32>
    %156 = vector.shape_cast %155 : vector<32xf32> to vector<32x1xf32>
    %cst_68 = arith.constant dense<0.000000e+00> : vector<1xf32>
    %157 = vector.multi_reduction <add>, %156, %cst_68 [0] : vector<32x1xf32> to vector<1xf32>
    %158 = vector.shape_cast %157 : vector<1xf32> to vector<1x1xf32>
    %c8_i32 = arith.constant 8 : i32
    %159 = vector.broadcast %c8_i32 : i32 to vector<1x10xi32>
    %160 = arith.cmpi eq, %0, %159 : vector<1x10xi32>
    %cst_69 = arith.constant 0.000000e+00 : f32
    %161 = vector.shape_cast %158 : vector<1x1xf32> to vector<1x1xf32>
    %162 = vector.broadcast %161 : vector<1x1xf32> to vector<1x10xf32>
    %163 = vector.broadcast %cst_69 : f32 to vector<1x10xf32>
    %164 = arith.select %160, %162, %163 : vector<1x10xi1>, vector<1x10xf32>
    %165 = arith.addf %151, %164 : vector<1x10xf32>
    %c9 = arith.constant 9 : index
    %c0_70 = arith.constant 0 : index
    %c0_71 = arith.constant 0 : index
    %166 = vector.load %arg6[%c9, %c0_70, %c0_71] : memref<10x32x1024xf32, #tpu.memory_space<vmem>>, vector<1x32x1024xf32>
    %167 = vector.shape_cast %166 : vector<1x32x1024xf32> to vector<32x1024xf32>
    %168 = arith.mulf %38, %167 : vector<32x1024xf32>
    %cst_72 = arith.constant dense<0.000000e+00> : vector<32xf32>
    %169 = vector.multi_reduction <add>, %168, %cst_72 [1] : vector<32x1024xf32> to vector<32xf32>
    %170 = vector.shape_cast %169 : vector<32xf32> to vector<32x1xf32>
    %cst_73 = arith.constant dense<0.000000e+00> : vector<1xf32>
    %171 = vector.multi_reduction <add>, %170, %cst_73 [0] : vector<32x1xf32> to vector<1xf32>
    %172 = vector.shape_cast %171 : vector<1xf32> to vector<1x1xf32>
    %c9_i32 = arith.constant 9 : i32
    %173 = vector.broadcast %c9_i32 : i32 to vector<1x10xi32>
    %174 = arith.cmpi eq, %0, %173 : vector<1x10xi32>
    %cst_74 = arith.constant 0.000000e+00 : f32
    %175 = vector.shape_cast %172 : vector<1x1xf32> to vector<1x1xf32>
    %176 = vector.broadcast %175 : vector<1x1xf32> to vector<1x10xf32>
    %177 = vector.broadcast %cst_74 : f32 to vector<1x10xf32>
    %178 = arith.select %174, %176, %177 : vector<1x10xi1>, vector<1x10xf32>
    %179 = arith.addf %165, %178 : vector<1x10xf32>
    %c0_i32_75 = arith.constant 0 : i32
    %180 = vector.broadcast %c0_i32_75 : i32 to vector<1x10xi32>
    %181 = arith.cmpi eq, %1, %180 : vector<1x10xi32>
    %cst_76 = arith.constant 0.000000e+00 : f32
    %182 = vector.broadcast %cst_76 : f32 to vector<1x10xf32>
    %183 = arith.select %181, %179, %182 : vector<1x10xi1>, vector<1x10xf32>
    %184 = arith.addf %2, %183 : vector<1x10xf32>
    %185 = vector.shape_cast %184 : vector<1x10xf32> to vector<1x1x10xf32>
    %c0_77 = arith.constant 0 : index
    %c0_78 = arith.constant 0 : index
    %c0_79 = arith.constant 0 : index
    %186 = vector.load %arg8[%c0_77, %c0_78, %c0_79] : memref<1x1x10xf32, #tpu.memory_space<vmem>>, vector<1x1x10xf32>
    tpu.vector_store %arg8[%c0_77, %c0_78, %c0_79], %185 {strides = array<i32>} : memref<1x1x10xf32, #tpu.memory_space<vmem>>, vector<1x1x10xf32>,
    return
  }
  func.func @transform_0(%arg0: i32) -> (i32, i32, i32) {
    %c0_i32 = arith.constant 0 : i32
    %c0_i32_0 = arith.constant 0 : i32
    %c0_i32_1 = arith.constant 0 : i32
    return %arg0, %c0_i32, %c0_i32_0 : i32, i32, i32
  }
  func.func @transform_1(%arg0: i32) -> (i32, i32) {
    %c0_i32 = arith.constant 0 : i32
    %c0_i32_0 = arith.constant 0 : i32
    %c0_i32_1 = arith.constant 0 : i32
    return %c0_i32, %c0_i32_0 : i32, i32
  }
  func.func @transform_2(%arg0: i32) -> (i32, i32) {
    %c0_i32 = arith.constant 0 : i32
    %c0_i32_0 = arith.constant 0 : i32
    %c0_i32_1 = arith.constant 0 : i32
    return %c0_i32, %c0_i32_0 : i32, i32
  }
  func.func @transform_3(%arg0: i32) -> (i32, i32) {
    %c0_i32 = arith.constant 0 : i32
    %c0_i32_0 = arith.constant 0 : i32
    %c0_i32_1 = arith.constant 0 : i32
    return %c0_i32, %c0_i32_0 : i32, i32
  }
  func.func @transform_4(%arg0: i32) -> (i32, i32) {
    %c0_i32 = arith.constant 0 : i32
    %c0_i32_0 = arith.constant 0 : i32
    %c0_i32_1 = arith.constant 0 : i32
    return %c0_i32, %c0_i32_0 : i32, i32
  }
  func.func @transform_5(%arg0: i32) -> (i32, i32, i32) {
    %c0_i32 = arith.constant 0 : i32
    %c0_i32_0 = arith.constant 0 : i32
    %c0_i32_1 = arith.constant 0 : i32
    %c0_i32_2 = arith.constant 0 : i32
    return %c0_i32, %c0_i32_0, %c0_i32_1 : i32, i32, i32
  }
  func.func @transform_6(%arg0: i32) -> (i32, i32) {
    %c0_i32 = arith.constant 0 : i32
    %c0_i32_0 = arith.constant 0 : i32
    %c0_i32_1 = arith.constant 0 : i32
    return %c0_i32, %c0_i32_0 : i32, i32
  }
  func.func @transform_7(%arg0: i32) -> (i32, i32, i32) {
    %c0_i32 = arith.constant 0 : i32
    %c0_i32_0 = arith.constant 0 : i32
    %c0_i32_1 = arith.constant 0 : i32
    return %arg0, %c0_i32, %c0_i32_0 : i32, i32, i32
  }
}

</mosaic_0001>

<bundles_post_ra>
// kernel: convnet_toy_forward.1
= control target key start
LH: loop header
LB: loop body
LE: loop exit
PB: predicated region body
PF: predicated region fallthrough
CT: control target
= control target key end

     0   :  { %s8129_s0 = inlined_call_operand.vmem [shape: f32[2,8,1024], index: 0, kind: input, shape index: {}]   ;;  %s8130_s1 = inlined_call_operand.hbm [shape: bf16[32,72], index: 1, kind: input, shape index: {}]   ;;  %s8131_s2 = inlined_call_operand.vmem [shape: f32[32,1], index: 2, kind: input, shape index: {}]   ;;  %s8132_s3 = inlined_call_operand.hbm [shape: bf16[32,288], index: 3, kind: input, shape index: {}]   ;;  %s8133_s4 = inlined_call_operand.vmem [shape: f32[32,1], index: 4, kind: input, shape index: {}]   ;;  %s8134_s5 = inlined_call_operand.hbm [shape: f32[10,32,1024], index: 5, kind: input, shape index: {}]   ;;  %s8135_s6 = inlined_call_operand.hbm [shape: f32[1,10], index: 6, kind: input, shape index: {}]   ;;  %s8136_s7 = inlined_call_operand.hbm [shape: f32[2,1,10], index: 7, kind: output, shape index: {}]  }
   0x1   :  { %8232 = sst [smem:[#allocation45_spill]] %s8132_s3 }
   0x2   :  { %12 = vsyncpa [#allocation3], 0 }
   0x3   :  { %13 = vsyncpa [#allocation6], 0 }
   0x4   :  { %14 = vsyncpa [#allocation9], 0 }
   0x5   :  { %15 = vsyncpa [#allocation4], 0 }
   0x6   :  { %17 = vsyncpa [#allocation4 + $0x1], 0  ;;  %s4848_s24 = smov 0   ;;  %s4850_s25 = smov 0  }
   0x7   :  { %s4852_s26 = smov 0   ;;  %s4854_s27 = smov 0  }
   0x8 LB: > { %8233 = sst [smem:[#allocation15_spill]] %s4783_s26  ;;  %s4869_s28 = sadd.s32 4294967295, %s4787_s27   ;;  %s4787_s27 = sphi %s4854_s27, %s8493_s27   ;;  %s4783_s26 = sphi %s4852_s26, %s8495_s26   ;;  %s4779_s25 = sphi %s4850_s25, %s8497_s25   ;;  %s4775_s24 = sphi %s4848_s24, %s8496_s24  }
   0x9   : > { %s3581_s29 = sadd.s32 4294967294, %s4787_s27   ;;  %s4873_s30 = sadd.s32 1, %s4787_s27  }
   0xa   : > { %8234 = sst [smem:[#allocation16_spill]] %s4873_s30  ;;  %s182_s8 = sadd.s32 1, %s4783_s26 }
   0xb   : > { %s179_s9 = ssub.s32 %s4787_s27, %s4873_s30  ;;  %p192_p0 = scmp.ne.s32.totalorder %s4783_s26, %s4779_s25 }
   0xc   : > { %p180_p1 = scmp.eq.s32.totalorder %s179_s9, 0  ;;  %p193_p2 = scmp.eq.s32.totalorder %s4869_s28, 1 }
   0xd   : > { %p198_p3 = scmp.ne.s32.totalorder %s4779_s25, %s4775_s24  ;;  %p199_p4 = scmp.eq.s32.totalorder %s3581_s29, 1 }
   0xe   : > { %s4884_s10 = scalar_select %p180_p1, %s4783_s26, %s182_s8  }
   0xf   : > { %p4886_p5 = por %p193_p2, %p192_p0  ;;  %p4890_p6 = por %p199_p4, %p198_p3 }
  0x10   : > { %8235 = sst [smem:[#allocation17_spill]] %s4884_s10  ;;  %p3582_p7 = scmp.ge.s32.totalorder %s4787_s27, 1 }
  0x11   : > { %s8236_s11 = scalar_select %p4886_p5, 1, 0 }
  0x12   : > { %s8237_s12 = scalar_select %p4890_p6, 1, 0 }
  0x13   : > { %p206_p8 = scmp.lt.s32.totalorder %s4787_s27, 3  ;;  %p8137_p9 = scmp.eq.s32.totalorder %s4869_s28, 0 }
  0x14   : > { %8238 = sst [smem:[#allocation18_spill]] %s8237_s12  ;;  %s4789_s14 = smov [#allocation5]  }
  0x15   : > { %p4897_p10 = pnand %p3582_p7, %p206_p8  ;;  %s234_s15 = sshll.u32 %s4789_s14, 4  ;;  %s235_s15 = int_to_ptr.vmem [resolvable:$true] %s234_s15 }
  0x16   : > { %s4790_s17 = smov [#allocation2]   ;;  %s8241_s3 = sld [smem:[#allocation45_spill]] }
  0x17   : > { %s8239_s13 = scalar_select %p4897_p10, 1, 0 }
  0x18   : > { %p3709_p11 = pneg %p4897_p10  ;;  %s218_s18 = sshll.u32 %s4790_s17, 4  ;;  %s4909_s18 = int_to_ptr.vmem [resolvable:$true] %s218_s18 }
  0x1a   : > { %p4905_p12 = pnand %p8137_p9, %p3709_p11 }
  0x1c   : > { %s4601_s21 = scalar_lea.hbm %s8241_s3, 768  ;;  %p4919_p0 = pneg %p4905_p12 }
  0x1d   : > { %p4602_p13 = scmp.ne.s32.totalorder %s8241_s3, %s4601_s21  ;;  %p4608_p3 = scmp.lt.u32.totalorder %s4601_s21, %s8241_s3 }
  0x1f   : > { %p4604_p1 = pnand %p4919_p0, %p4602_p13 }
  0x21   : > { %p4605_p2 = pneg %p4604_p1 }
  0x23   : > { %p4610_p4 = pnand %p4608_p3, %p4605_p2 }
  0x25   : > { %4613 = shalt.err (!%p4610_p4)
}
  0x26   : > { %s4614_s14 = scalar_lea.vmem %s235_s15, 768  ;;  %p4622_p9 = scmp.lt.s32.totalorder %s235_s15, %s235_s15 }
  0x27   : > { %p4615_p7 = scmp.ne.s32.totalorder %s235_s15, %s4614_s14  ;;  %p4623_p6 = scmp.lt.s32.totalorder %s4614_s14, %s4614_s14 }
  0x29   : > { %p4617_p8 = pnand %p4615_p7, %p4919_p0  ;;  %p4624_p5 = por %p4623_p6, %p4622_p9 }
  0x2b   : > { %p4618_p11 = pneg %p4617_p8 }
  0x2d   : > { %p4625_p10 = pnand %p4624_p5, %p4618_p11 }
  0x2f   : > { %4628 = shalt.err (!%p4625_p10)
}
  0x30   : > { %s4791_s17 = smov 192   ;;  %s4792_s19 = smov 12  }
  0x31   : > { %3715 = dma.hbm_to_vmem [thread:$0]  (!%p4905_p12), %s8241_s3, 768, %s235_s15, [#allocation6], %s4791_s17, %s4791_s17, %s4792_s19  }
  0x32   : > { %s4629_s8 = scalar_lea.hbm %s8130_s1, 256 }
  0x33   : > { %p4630_p13 = scmp.ne.s32.totalorder %s8130_s1, %s4629_s8  ;;  %p4636_p9 = scmp.lt.u32.totalorder %s4629_s8, %s8130_s1 }
  0x35   : > { %p4632_p5 = pnand %p4630_p13, %p4919_p0 }
  0x37   : > { %p4633_p6 = pneg %p4632_p5 }
  0x39   : > { %p4638_p10 = pnand %p4636_p9, %p4633_p6 }
  0x3b   : > { %4641 = shalt.err (!%p4638_p10)
}
  0x3c   : > { %s4642_s15 = scalar_lea.vmem %s4909_s18, 256  ;;  %p4650_p4 = scmp.lt.s32.totalorder %s4909_s18, %s4909_s18 }
  0x3d   : > { %p4643_p1 = scmp.ne.s32.totalorder %s4909_s18, %s4642_s15  ;;  %p4651_p7 = scmp.lt.s32.totalorder %s4642_s15, %s4642_s15 }
  0x3f   : > { %p4645_p2 = pnand %p4643_p1, %p4919_p0  ;;  %p4652_p8 = por %p4651_p7, %p4650_p4 }
  0x41   : > { %p4646_p3 = pneg %p4645_p2 }
  0x43   : > { %p4653_p11 = pnand %p4652_p8, %p4646_p3 }
  0x45   : > { %4656 = shalt.err (!%p4653_p11)
}
  0x46   : > { %s4793_s10 = smov 64   ;;  %s4794_s26 = smov 4  }
  0x47   : > { %3712 = dma.hbm_to_vmem [thread:$0]  (!%p4905_p12), %s8130_s1, 256, %s4909_s18, [#allocation3], %s4793_s10, %s4793_s10, %s4794_s26  }
  0x48   : > { %s4795_s20 = smov [#allocation7]   ;;  %s4796_s22 = smov [#allocation8]  }
  0x49   : > { %s250_s21 = sshll.u32 %s4795_s20, 4  ;;  %s264_s23 = sshll.u32 %s4796_s22, 4  ;;  %s251_s21 = int_to_ptr.vmem [resolvable:$true] %s250_s21  ;;  %s265_s23 = int_to_ptr.vmem [resolvable:$true] %s264_s23 }
  0x4a   : > { %s4657_s14 = scalar_lea.hbm %s8134_s5, 40960 }
  0x4b   : > { %p4658_p13 = scmp.ne.s32.totalorder %s8134_s5, %s4657_s14  ;;  %p4664_p9 = scmp.lt.u32.totalorder %s4657_s14, %s8134_s5 }
  0x4d   : > { %p4660_p5 = pnand %p4658_p13, %p4919_p0 }
  0x4f   : > { %p4661_p6 = pneg %p4660_p5 }
  0x51   : > { %p4666_p10 = pnand %p4664_p9, %p4661_p6 }
  0x53   : > { %4669 = shalt.err (!%p4666_p10)
}
  0x54   : > { %s4670_s18 = scalar_lea.vmem %s251_s21, 40960  ;;  %p4678_p4 = scmp.lt.s32.totalorder %s251_s21, %s251_s21 }
  0x55   : > { %p4671_p1 = scmp.ne.s32.totalorder %s251_s21, %s4670_s18  ;;  %p4679_p7 = scmp.lt.s32.totalorder %s4670_s18, %s4670_s18 }
  0x57   : > { %p4673_p2 = pnand %p4671_p1, %p4919_p0  ;;  %p4680_p8 = por %p4679_p7, %p4678_p4 }
  0x59   : > { %p4674_p3 = pneg %p4673_p2 }
  0x5b   : > { %p4681_p11 = pnand %p4680_p8, %p4674_p3 }
  0x5d   : > { %4684 = shalt.err (!%p4681_p11)
}
  0x5e   : > { %s4797_s3 = smov 1024   ;;  %s4685_s19 = scalar_lea.hbm %s8135_s6, 16 }
  0x5f   : > { %3718 = dma.hbm_to_vmem [thread:$0]  (!%p4905_p12), %s8134_s5, 40960, %s251_s21, [#allocation6], %s4797_s3, %s4797_s3, %s4793_s10  }
  0x60   : > { %p4686_p13 = scmp.ne.s32.totalorder %s8135_s6, %s4685_s19  ;;  %p4692_p9 = scmp.lt.u32.totalorder %s4685_s19, %s8135_s6 }
  0x62   : > { %p4688_p5 = pnand %p4686_p13, %p4919_p0 }
  0x64   : > { %p4689_p6 = pneg %p4688_p5 }
  0x66   : > { %p4694_p10 = pnand %p4692_p9, %p4689_p6 }
  0x68   : > { %4697 = shalt.err (!%p4694_p10)
}
  0x69   : > { %s4698_s14 = scalar_lea.vmem %s265_s23, 16  ;;  %s4705_s10 = scalar_lea.vmem %s265_s23, 32 }
  0x6a   : > { %p4699_p1 = scmp.ne.s32.totalorder %s265_s23, %s4698_s14  ;;  %p4706_p4 = scmp.lt.s32.totalorder %s265_s23, %s265_s23 }
  0x6b   : > { %p4707_p7 = scmp.lt.s32.totalorder %s4705_s10, %s4698_s14 }
  0x6c   : > { %p4701_p2 = pnand %p4699_p1, %p4919_p0 }
  0x6d   : > { %p4708_p8 = por %p4707_p7, %p4706_p4 }
  0x6e   : > { %p4702_p3 = pneg %p4701_p2 }
  0x70   : > { %p4709_p11 = pnand %p4708_p8, %p4702_p3 }
  0x72   : > { %4712 = shalt.err (!%p4709_p11)
}
  0x73   : > { %3721 = dma.hbm_to_vmem [thread:$0]  (!%p4905_p12), %s8135_s6, 16, %s265_s23, [#allocation9]  }
  0x74   : > { %p8243_p13 = scmp.ne.s32.totalorder %s8239_s13, 0 }
  0x76   : > { %285 = sbr.rel (%p8243_p13) target bundleno = 1431 (0x597), region = 48 }
  0x7d   : > { %p8244_p5 = scmp.eq.s32.totalorder %s4869_s28, 0 }
  0x7f   : > { %4758 = dma.done.wait (%p8244_p5), [#allocation3], 256   ;;  %p8245_p0 = pmov %p8244_p5 }
  0x81   : > { %4760 = vsyncadd (%p8245_p0), [#allocation3], 4294967040  ;;  %p8246_p6 = pmov %p8245_p0 }
  0x82   : > { %p8247_p9 = pmov %p8245_p0 }
  0x83   : > { %4762 = dma.done.wait (%p8246_p6), [#allocation6], 41728  }
  0x84   : > { %4764 = vsyncadd (%p8247_p9), [#allocation6], 4294925568  ;;  %p8248_p10 = pmov %p8245_p0 }
  0x85   : > { %p8249_p12 = pmov %p8245_p0 }
  0x86   : > { %4766 = dma.done.wait (%p8248_p10), [#allocation9], 16  }
  0x87   : > { %4768 = vsyncadd (%p8249_p12), [#allocation9], 4294967280  ;;  %p328_p1 = scmp.lt.s32.totalorder %s4869_s28, 1  ;;  %s4798_s3 = smov 126   ;;  %v8147_v14 = vmov 0   ;;  %v591_v15 = vld [vmem:[%s8131_s2 + $0x8] sm:$0xff]  ;;  %v8144_v19 = vlaneseq }
  0x88   : > { %s4799_s26 = smov 127   ;;  %s4800_s17 = smov 96   ;;  %688 = vmatprep.mubr.bf16.mxu0 %v8147_v14  ;;  %741 = vmatprep.mubr.bf16.mxu1 %v8147_v14  ;;  %v590_v16 = vld [vmem:[%s8131_s2] sm:$0xff]  ;;  %v592_v17 = vld [vmem:[%s8131_s2 + $0x10] sm:$0xff]  ;;  %v593_v18 = vld [vmem:[%s8131_s2 + $0x18] sm:$0xff]  ;;  %vm631_vm8 = vcmask 1043456  }
  0x89   : > { %s329_s13 = scalar_select %p328_p1, %s4869_s28, 1  ;;  %3946 = vset.pattern.permute.xlu1 %v8147_v14  ;;  %3945 = vset.pattern.permute.xlu0 %v8147_v14  ;;  %v5100_v20 = vand.u32 127, %v8144_v19  ;;  %vm624_vm9 = vcmask 588800   ;;  %vm1874_vm10 = vcmask 261120  }
  0x8a   : > { %s4801_s30 = smov 94   ;;  %s4802_s12 = smov 95  }
  0x8b   : > { %s3626_s16 = sshll.u32 %s329_s13, 6  ;;  %s4803_s19 = smov 63   ;;  %8250 = vst [vmem:[#allocation19_spill] sm:$0xff] %v5100_v20  ;;  %vm362_vm0 = vcmp.lt.s32.totalorder %v5100_v20, 127  ;;  %vm387_vm1 = vcmp.lt.s32.totalorder %v5100_v20, 126  ;;  %vm412_vm2 = vcmp.lt.s32.totalorder %v5100_v20, 96 }
  0x8c   : > { %s5013_s18 = scalar_lea.vmem %s8129_s0, %s3626_s16  ;;  %s4804_s20 = smov 64   ;;  %vm437_vm3 = vcmp.lt.s32.totalorder %v5100_v20, 95  ;;  %vm462_vm4 = vcmp.lt.s32.totalorder %v5100_v20, 94  ;;  %vm487_vm5 = vcmp.lt.s32.totalorder %v5100_v20, 64  ;;  %vm512_vm6 = vcmp.lt.s32.totalorder %v5100_v20, 63 }
  0x8d   : > { %v5016_v0 = vld [vmem:[%s5013_s18 + $0x8] sm:$0xff]  ;;  %v5019_v1 = vld [vmem:[%s5013_s18 + $0x10] sm:$0xff]  ;;  %v5022_v2 = vld [vmem:[%s5013_s18] sm:$0xff]  ;;  %s4805_s22 = smov 62   ;;  %vm537_vm7 = vcmp.lt.s32.totalorder %v5100_v20, 62  ;;  %p8490_p3 = scmp.ne.s32.totalorder %s8236_s11, 0 }
  0x8e   : > { %v3795_v3 = vpack.i.bf16 %v5019_v1, %v5016_v0  ;;  %v5027_v4 = vld [vmem:[%s5013_s18 + $0x18] sm:$0xff]  ;;  %v5044_v6 = vld [vmem:[%s5013_s18 + $0x20] sm:$0xff]  ;;  %v5047_v7 = vld [vmem:[%s5013_s18 + $0x28] sm:$0xff]  ;;  %v3860_v8 = vpack.i.bf16 %v5016_v0, %v5022_v2  ;;  %s4807_s15 = smov [#allocation10]  }
  0x8f   : > { %v3790_v5 = vpack.i.bf16 %v5027_v4, %v5022_v2  ;;  %v3855_v9 = vpack.i.bf16 %v5047_v7, %v5044_v6  ;;  %v5056_v10 = vld [vmem:[%s5013_s18 + $0x30] sm:$0xff]  ;;  %v5059_v11 = vld [vmem:[%s5013_s18 + $0x38] sm:$0xff]  ;;  %v3865_v13 = vpack.i.bf16 %v5027_v4, %v5019_v1  ;;  %s4717_s13 = sshll.u32 %s4807_s15, 4  ;;  %s4718_s13 = int_to_ptr.vmem [resolvable:$false] %s4717_s13 }
  0x90   : > { %3796 = vrot.lane.b32.xlu1 %v3795_v3, %s4798_s3  ;;  %3786 = vrot.lane.b32.xlu0 %v3795_v3, %s4799_s26  ;;  %v3870_v12 = vpack.i.bf16 %v5059_v11, %v5056_v10  ;;  %s4719_s16 = scalar_lea.vmem %s4718_s13, 32 }
  0x94   : > { %3801 = vrot.lane.b32.xlu1 %v3795_v3, %s4800_s17  ;;  %3791 = vrot.lane.b32.xlu0 %v3790_v5, %s4799_s26 }
  0x98   : > { %3811 = vrot.lane.b32.xlu1 %v3790_v5, %s4800_s17  ;;  %3806 = vrot.lane.b32.xlu0 %v3790_v5, %s4798_s3 }
  0x9c   : > { %3821 = vrot.lane.b32.xlu1 %v3795_v3, %s4801_s30  ;;  %3816 = vrot.lane.b32.xlu0 %v3795_v3, %s4802_s12 }
  0xa0   : > { %3831 = vrot.lane.b32.xlu1 %v3790_v5, %s4801_s30  ;;  %3826 = vrot.lane.b32.xlu0 %v3790_v5, %s4802_s12 }
  0xa4   : > { %3841 = vrot.lane.b32.xlu1 %v3795_v3, %s4803_s19  ;;  %3836 = vrot.lane.b32.xlu0 %v3795_v3, %s4804_s20 }
  0xa8   : > { %3851 = vrot.lane.b32.xlu1 %v3790_v5, %s4803_s19  ;;  %3846 = vrot.lane.b32.xlu0 %v3790_v5, %s4804_s20 }
  0xac   : > { %3861 = vrot.lane.b32.xlu1 %v3860_v8, %s4805_s22  ;;  %3856 = vrot.lane.b32.xlu0 %v3855_v9, %s4799_s26 }
  0xb0   : > { %3871 = vrot.lane.b32.xlu1 %v3870_v12, %s4799_s26  ;;  %3866 = vrot.lane.b32.xlu0 %v3865_v13, %s4805_s22 }
  0xb4   : > { %3881 = vrot.lane.b32.xlu1 %v3855_v9, %s4800_s17  ;;  %3876 = vrot.lane.b32.xlu0 %v3855_v9, %s4798_s3 }
  0xb8   : > { %3891 = vrot.lane.b32.xlu1 %v3870_v12, %s4800_s17  ;;  %3886 = vrot.lane.b32.xlu0 %v3870_v12, %s4798_s3 }
  0xbc   : > { %3901 = vrot.lane.b32.xlu1 %v3855_v9, %s4801_s30  ;;  %3896 = vrot.lane.b32.xlu0 %v3855_v9, %s4802_s12 }
  0xc0   : > { %3911 = vrot.lane.b32.xlu1 %v3870_v12, %s4801_s30  ;;  %3906 = vrot.lane.b32.xlu0 %v3870_v12, %s4802_s12 }
  0xc4   : > { %3921 = vrot.lane.b32.xlu1 %v3855_v9, %s4803_s19  ;;  %3916 = vrot.lane.b32.xlu0 %v3855_v9, %s4804_s20 }
  0xc8   : > { %3931 = vrot.lane.b32.xlu1 %v3870_v12, %s4803_s19  ;;  %3926 = vrot.lane.b32.xlu0 %v3870_v12, %s4804_s20 }
  0xcc   : > { %3941 = vrot.lane.b32.xlu1 %v3870_v12, %s4805_s22  ;;  %3936 = vrot.lane.b32.xlu0 %v3855_v9, %s4805_s22 }
  0xd0   : > { %601 = vperm.xlu1 %3946, %v591_v15   ;;  %596 = vperm.xlu0 %3945, %v590_v16  }
  0xd4   : > { %606 = vperm.xlu1 %3946, %v592_v17   ;;  %611 = vperm.xlu0 %3945, %v593_v18  }
 0x102   : > { %v5102_v21 = vpop.permute.xlu1 %3796  ;;  %v5104_v22 = vpop.permute.xlu0 %3786 }
 0x103   : > { %v3799_v23 = vunpack.i.h.bf16 %v5102_v21  ;;  %v3798_v24 = vunpack.i.l.bf16 %v5102_v21  ;;  %v3789_v25 = vunpack.i.h.bf16 %v5104_v22  ;;  %v3788_v26 = vunpack.i.l.bf16 %v5104_v22 }
 0x105   : > { %v368_v27 = vsel %vm362_vm0, %v3788_v26, %v3789_v25  ;;  %v393_v34 = vsel %vm387_vm1, %v3798_v24, %v3799_v23 }
 0x106   : > { %v5116_v28 = vpop.permute.xlu1 %3801  ;;  %v5118_v29 = vpop.permute.xlu0 %3791  ;;  %v547_v30 = vpack.c.bf16 %v368_v27, %v5016_v0 }
 0x107   : > { %v3804_v31 = vunpack.i.h.bf16 %v5116_v28  ;;  %v3803_v32 = vunpack.i.l.bf16 %v5116_v28  ;;  %v3793_v33 = vunpack.i.l.bf16 %v5118_v29  ;;  %v3794_v16 = vunpack.i.h.bf16 %v5118_v29 }
 0x108   : > { %656 = vmatprep.subr.bf16.mxu0 %v547_v30 }
 0x109   : > { %v369_v35 = vsel %vm362_vm0, %v3793_v33, %v3788_v26  ;;  %v418_v36 = vsel %vm412_vm2, %v3803_v32, %v3804_v31 }
 0x10a   : > { %v5137_v37 = vpop.permute.xlu1 %3811  ;;  %v5139_v38 = vpop.permute.xlu0 %3806  ;;  %v546_v39 = vpack.c.bf16 %v369_v35, %v5022_v2  ;;  %v555_v40 = vpack.c.bf16 %v418_v36, %v393_v34 }
 0x10b   : > { %v3813_v41 = vunpack.i.l.bf16 %v5137_v37  ;;  %v3808_v42 = vunpack.i.l.bf16 %v5139_v38 }
 0x10c   : > { %657 = vmatpush1.bf16.msra.mxu0 %v546_v39  ;;  %v367_v39 = vsel %vm362_vm0, %v3789_v25, %v3794_v16 }
 0x10d   : > { %658 = vmatprep.subr.bf16.mxu0 %v555_v40  ;;  %v394_v43 = vsel %vm387_vm1, %v3808_v42, %v3798_v24  ;;  %v419_v44 = vsel %vm412_vm2, %v3813_v41, %v3803_v32  ;;  %v548_v25 = vpack.c.bf16 %v367_v39, %v5019_v1 }
 0x10e   : > { %v5152_v45 = vpop.permute.xlu1 %3821  ;;  %v5154_v46 = vpop.permute.xlu0 %3816  ;;  %v554_v47 = vpack.c.bf16 %v419_v44, %v394_v43  ;;  %v3814_v44 = vunpack.i.h.bf16 %v5137_v37 }
 0x10f   : > { %v3824_v48 = vunpack.i.h.bf16 %v5152_v45  ;;  %v3823_v49 = vunpack.i.l.bf16 %v5152_v45  ;;  %v3819_v50 = vunpack.i.h.bf16 %v5154_v46  ;;  %v3818_v51 = vunpack.i.l.bf16 %v5154_v46 }
 0x110   : > { %659 = vmatpush1.bf16.msra.mxu0 %v554_v47 }
 0x111   : > { %v443_v52 = vsel %vm437_vm3, %v3818_v51, %v3819_v50  ;;  %v468_v53 = vsel %vm462_vm4, %v3823_v49, %v3824_v48 }
 0x112   : > { %v5170_v54 = vpop.permute.xlu1 %3831  ;;  %v5172_v55 = vpop.permute.xlu0 %3826  ;;  %v563_v56 = vpack.c.bf16 %v468_v53, %v443_v52  ;;  %v3809_v52 = vunpack.i.h.bf16 %v5139_v38 }
 0x113   : > { %v3833_v57 = vunpack.i.l.bf16 %v5170_v54  ;;  %v3828_v58 = vunpack.i.l.bf16 %v5172_v55 }
 0x114   : > { %660 = vmatprep.subr.bf16.mxu0 %v563_v56 }
 0x115   : > { %v444_v59 = vsel %vm437_vm3, %v3828_v58, %v3818_v51  ;;  %v469_v60 = vsel %vm462_vm4, %v3833_v57, %v3823_v49 }
 0x116   : > { %v5184_v61 = vpop.permute.xlu1 %3841  ;;  %v5186_v62 = vpop.permute.xlu0 %3836  ;;  %v562_v63 = vpack.c.bf16 %v469_v60, %v444_v59 }
 0x117   : > { %v3844_v0 = vunpack.i.h.bf16 %v5184_v61  ;;  %v3843_v2 = vunpack.i.l.bf16 %v5184_v61  ;;  %v3839_v3 = vunpack.i.h.bf16 %v5186_v62  ;;  %v3838_v5 = vunpack.i.l.bf16 %v5186_v62 }
 0x118   : > { %661 = vmatpush1.bf16.msra.mxu0 %v562_v63 }
 0x119   : > { %v493_v8 = vsel %vm487_vm5, %v3838_v5, %v3839_v3  ;;  %v518_v9 = vsel %vm512_vm6, %v3843_v2, %v3844_v0 }
 0x11a   : > { %v5202_v12 = vpop.permute.xlu1 %3851  ;;  %v5204_v13 = vpop.permute.xlu0 %3846  ;;  %v571_v15 = vpack.c.bf16 %v518_v9, %v493_v8 }
 0x11b   : > { %v3853_v17 = vunpack.i.l.bf16 %v5202_v12  ;;  %v3848_v18 = vunpack.i.l.bf16 %v5204_v13 }
 0x11c   : > { %662 = vmatprep.subr.bf16.mxu0 %v571_v15  ;;  %v392_v15 = vsel %vm387_vm1, %v3799_v23, %v3809_v52 }
 0x11d   : > { %v494_v24 = vsel %vm487_vm5, %v3848_v18, %v3838_v5  ;;  %v519_v26 = vsel %vm512_vm6, %v3853_v17, %v3843_v2 }
 0x11e   : > { %v5217_v27 = vpop.permute.xlu1 %3861  ;;  %v3857_v30 = vpop.permute.xlu0 %3856  ;;  %v570_v32 = vpack.c.bf16 %v519_v26, %v494_v24 }
 0x11f   : > { %v3864_v34 = vunpack.i.h.bf16 %v5217_v27  ;;  %v3863_v35 = vunpack.i.l.bf16 %v5217_v27  ;;  %v3858_v36 = vunpack.i.l.bf16 %v3857_v30  ;;  %v3859_v53 = vunpack.i.h.bf16 %v3857_v30  ;;  %v5263_v30 = vld [vmem:[#allocation2] sm:$0xff]  }
 0x120   : > { %663 = vmatpush1.bf16.msra.mxu0 %v570_v32 }
 0x121   : > { %v366_v40 = vsel %vm362_vm0, %v3794_v16, %v3858_v36  ;;  %v544_v43 = vsel %vm537_vm7, %v3863_v35, %v3864_v34  ;;  %v417_v16 = vsel %vm412_vm2, %v3804_v31, %v3814_v44  ;;  %v365_v24 = vsel %vm362_vm0, %v3858_v36, %v3859_v53 }
 0x122   : > { %v5233_v47 = vpop.permute.xlu1 %3871  ;;  %v5235_v49 = vpop.permute.xlu0 %3866  ;;  %v549_v22 = vpack.c.bf16 %v366_v40, %v5027_v4  ;;  %v578_v51 = vpack.c.bf16 %v544_v43, %v544_v43  ;;  %v556_v39 = vpack.c.bf16 %v417_v16, %v392_v15  ;;  %v5301_v15 = vld [vmem:[#allocation2 + $0x8] sm:$0xff]  }
 0x123   : > { %v3873_v56 = vunpack.i.l.bf16 %v5233_v47  ;;  %v3868_v59 = vunpack.i.l.bf16 %v5235_v49 }
 0x124   : > { %709 = vmatprep.subr.bf16.mxu1 %v549_v22  ;;  %v633_v5 = vsel %vm631_vm8, %v578_v51, 0  ;;  %v550_v22 = vpack.c.bf16 %v365_v24, %v5044_v6 }
 0x125   : > { %710 = vmatpush1.bf16.msra.mxu1 %v548_v25  ;;  %v543_v60 = vsel %vm537_vm7, %v3864_v34, %v3868_v59  ;;  %v364_v1 = vsel %vm362_vm0, %v3859_v53, %v3873_v56 }
 0x126   : > { %v3882_v4 = vpop.permute.xlu1 %3881  ;;  %v3877_v63 = vpop.permute.xlu0 %3876  ;;  %v579_v2 = vpack.c.bf16 %v543_v60, %v543_v60  ;;  %v551_v26 = vpack.c.bf16 %v364_v1, %v5047_v7  ;;  %v3829_v7 = vunpack.i.h.bf16 %v5172_v55 }
 0x127   : > { %v3883_v8 = vunpack.i.l.bf16 %v3882_v4  ;;  %v3878_v9 = vunpack.i.l.bf16 %v3877_v63  ;;  %v3884_v28 = vunpack.i.h.bf16 %v3882_v4  ;;  %v3879_v32 = vunpack.i.h.bf16 %v3877_v63 }
 0x128   : > { %3597 = vmatprep.subr.msk.bf16.mxu0 %vm631_vm8, %v579_v2  ;;  %v442_v63 = vsel %vm437_vm3, %v3819_v50, %v3829_v7 }
 0x129   : > { %665 = vmatpush1.bf16.msra.mxu0 %v633_v5  ;;  %v391_v21 = vsel %vm387_vm1, %v3809_v52, %v3878_v9  ;;  %v416_v23 = vsel %vm412_vm2, %v3814_v44, %v3883_v8  ;;  %v3834_v44 = vunpack.i.h.bf16 %v5170_v54  ;;  %v415_v51 = vsel %vm412_vm2, %v3883_v8, %v3884_v28 }
 0x12a   : > { %v5269_v31 = vpop.permute.xlu1 %3891  ;;  %v5271_v34 = vpop.permute.xlu0 %3886  ;;  %762 = vmatprep.subr.bf16.mxu0 %v551_v26  ;;  %v557_v36 = vpack.c.bf16 %v416_v23, %v391_v21  ;;  %v390_v52 = vsel %vm387_vm1, %v3878_v9, %v3879_v32 }
 0x12b   : > { %v3893_v40 = vunpack.i.l.bf16 %v5269_v31  ;;  %v3888_v43 = vunpack.i.l.bf16 %v5271_v34  ;;  %v467_v9 = vsel %vm462_vm4, %v3824_v48, %v3834_v44  ;;  %v558_v16 = vpack.c.bf16 %v415_v51, %v390_v52 }
 0x12c   : > { %711 = vmatprep.subr.bf16.mxu1 %v557_v36  ;;  %3598 = vmatmul.mubr.msk.bf16.vlgmr.msra.gmra.mrb[0].mxu0 %vm624_vm9, %v5263_v30  ;;  %v564_v23 = vpack.c.bf16 %v467_v9, %v442_v63 }
 0x12d   : > { %712 = vmatpush1.bf16.msra.mxu1 %v556_v39  ;;  %763 = vmatpush1.bf16.msra.mxu0 %v550_v22  ;;  %v389_v25 = vsel %vm387_vm1, %v3879_v32, %v3888_v43  ;;  %v414_v60 = vsel %vm412_vm2, %v3884_v28, %v3893_v40  ;;  %v3854_v28 = vunpack.i.h.bf16 %v5202_v12  ;;  %v3849_v32 = vunpack.i.h.bf16 %v5204_v13 }
 0x12e   : > { %v3902_v6 = vpop.permute.xlu1 %3901  ;;  %v3897_v53 = vpop.permute.xlu0 %3896  ;;  %698 = vmatprep.mubr.bf16.mxu0 %v8147_v14  ;;  %v559_v8 = vpack.c.bf16 %v414_v60, %v389_v25 }
 0x12f   : > { %v3903_v1 = vunpack.i.l.bf16 %v3902_v6  ;;  %v3898_v4 = vunpack.i.l.bf16 %v3897_v53  ;;  %v3904_v2 = vunpack.i.h.bf16 %v3902_v6  ;;  %v3899_v5 = vunpack.i.h.bf16 %v3897_v53 }
 0x130   : > { %764 = vmatprep.subr.bf16.mxu0 %v559_v8  ;;  %v517_v63 = vsel %vm512_vm6, %v3844_v0, %v3854_v28  ;;  %v3874_v0 = vunpack.i.h.bf16 %v5233_v47 }
 0x131   : > { %v441_v24 = vsel %vm437_vm3, %v3829_v7, %v3898_v4  ;;  %v466_v46 = vsel %vm462_vm4, %v3834_v44, %v3903_v1  ;;  %765 = vmatpush1.bf16.msra.mxu0 %v558_v16  ;;  %v465_v36 = vsel %vm462_vm4, %v3903_v1, %v3904_v2  ;;  %v440_v39 = vsel %vm437_vm3, %v3898_v4, %v3899_v5 }
 0x132   : > { %v5307_v26 = vpop.permute.xlu1 %3911  ;;  %v5309_v50 = vpop.permute.xlu0 %3906  ;;  %v565_v21 = vpack.c.bf16 %v466_v46, %v441_v24  ;;  %v566_v53 = vpack.c.bf16 %v465_v36, %v440_v39  ;;  %v492_v4 = vsel %vm487_vm5, %v3839_v3, %v3849_v32  ;;  %v363_v29 = vsel %vm362_vm0, %v3873_v56, %v3874_v0 }
 0x133   : > { %v3913_v45 = vunpack.i.l.bf16 %v5307_v26  ;;  %v3908_v48 = vunpack.i.l.bf16 %v5309_v50  ;;  %v572_v24 = vpack.c.bf16 %v517_v63, %v492_v4 }
 0x134   : > { %713 = vmatprep.subr.bf16.mxu1 %v565_v21  ;;  %3599 = vmatmul.mubr.msk.bf16.gmra.mrb[4].mxu0 %vm624_vm9, %v5301_v15 }
 0x135   : > { %714 = vmatpush1.bf16.msra.mxu1 %v564_v23  ;;  %v439_v7 = vsel %vm437_vm3, %v3899_v5, %v3908_v48  ;;  %v464_v22 = vsel %vm462_vm4, %v3904_v2, %v3913_v45  ;;  %794 = vmatprep.mubr.bf16.mxu0 %v8147_v14  ;;  %v3869_v2 = vunpack.i.h.bf16 %v5235_v49  ;;  %v370_v49 = vsel %vm362_vm0, %v3874_v0, %v3793_v33 }
 0x136   : > { %v3922_v44 = vpop.permute.xlu1 %3921  ;;  %v3917_v25 = vpop.permute.xlu0 %3916  ;;  %v567_v51 = vpack.c.bf16 %v464_v22, %v439_v7  ;;  %v552_v0 = vpack.c.bf16 %v363_v29, %v5056_v10 }
 0x137   : > { %v3923_v52 = vunpack.i.l.bf16 %v3922_v44  ;;  %v3918_v6 = vunpack.i.l.bf16 %v3917_v25  ;;  %v3924_v60 = vunpack.i.h.bf16 %v3922_v44  ;;  %v3919_v1 = vunpack.i.h.bf16 %v3917_v25 }
 0x138   : > { %766 = vmatprep.subr.bf16.mxu0 %v567_v51 }
 0x139   : > { %767 = vmatpush1.bf16.msra.mxu0 %v566_v53  ;;  %v491_v5 = vsel %vm487_vm5, %v3849_v32, %v3918_v6  ;;  %v516_v8 = vsel %vm512_vm6, %v3854_v28, %v3923_v52  ;;  %v515_v46 = vsel %vm512_vm6, %v3923_v52, %v3924_v60  ;;  %v490_v21 = vsel %vm487_vm5, %v3918_v6, %v3919_v1 }
 0x13a   : > { %v5343_v9 = vpop.permute.xlu1 %3931  ;;  %v5345_v62 = vpop.permute.xlu0 %3926  ;;  %v573_v16 = vpack.c.bf16 %v516_v8, %v491_v5  ;;  %v542_v32 = vsel %vm537_vm7, %v3868_v59, %v3869_v2  ;;  %v574_v51 = vpack.c.bf16 %v515_v46, %v490_v21  ;;  %v3894_v52 = vunpack.i.h.bf16 %v5269_v31 }
 0x13b   : > { %v3933_v3 = vunpack.i.l.bf16 %v5343_v9  ;;  %v3928_v61 = vunpack.i.l.bf16 %v5345_v62  ;;  %v580_v6 = vpack.c.bf16 %v542_v32, %v542_v32  ;;  %v3889_v59 = vunpack.i.h.bf16 %v5271_v34 }
 0x13c   : > { %715 = vmatprep.subr.bf16.mxu1 %v573_v16  ;;  %v553_v8 = vpack.c.bf16 %v370_v49, %v5059_v11  ;;  %v3914_v16 = vunpack.i.h.bf16 %v5307_v26  ;;  %v420_v56 = vsel %vm412_vm2, %v3894_v52, %v3813_v41  ;;  %v413_v11 = vsel %vm412_vm2, %v3893_v40, %v3894_v52 }
 0x13d   : > { %716 = vmatpush1.bf16.msra.mxu1 %v572_v24  ;;  %v489_v23 = vsel %vm487_vm5, %v3919_v1, %v3928_v61  ;;  %v514_v28 = vsel %vm512_vm6, %v3924_v60, %v3933_v3  ;;  %v639_v33 = vsel %vm631_vm8, %v580_v6, 0  ;;  %v3909_v24 = vunpack.i.h.bf16 %v5309_v50 }
 0x13e   : > { %v5366_v36 = vpop.permute.xlu1 %3941  ;;  %v3937_v39 = vpop.permute.xlu0 %3936  ;;  %v575_v7 = vpack.c.bf16 %v514_v28, %v489_v23  ;;  %v395_v47 = vsel %vm387_vm1, %v3889_v59, %v3808_v42  ;;  %v388_v38 = vsel %vm387_vm1, %v3888_v43, %v3889_v59  ;;  %v3934_v41 = vunpack.i.h.bf16 %v5343_v9 }
 0x13f   : > { %v3943_v22 = vunpack.i.l.bf16 %v5366_v36  ;;  %v3939_v44 = vunpack.i.h.bf16 %v3937_v39  ;;  %v3938_v25 = vunpack.i.l.bf16 %v3937_v39  ;;  %v561_v37 = vpack.c.bf16 %v420_v56, %v395_v47 }
 0x140   : > { %768 = vmatprep.subr.bf16.mxu0 %v575_v7  ;;  %v3929_v10 = vunpack.i.h.bf16 %v5345_v62  ;;  %v445_v42 = vsel %vm437_vm3, %v3909_v24, %v3828_v58  ;;  %v470_v31 = vsel %vm462_vm4, %v3914_v16, %v3833_v57  ;;  %v560_v34 = vpack.c.bf16 %v413_v11, %v388_v38 }
 0x141   : > { %769 = vmatpush1.bf16.msra.mxu0 %v574_v51  ;;  %v541_v53 = vsel %vm537_vm7, %v3869_v2, %v3938_v25  ;;  %v539_v60 = vsel %vm537_vm7, %v3939_v44, %v3943_v22  ;;  %v540_v1 = vsel %vm537_vm7, %v3938_v25, %v3939_v44  ;;  %v463_v40 = vsel %vm462_vm4, %v3913_v45, %v3914_v16 }
 0x142   : > { %v581_v4 = vpack.c.bf16 %v541_v53, %v541_v53  ;;  %v583_v63 = vpack.c.bf16 %v539_v60, %v539_v60  ;;  %v582_v5 = vpack.c.bf16 %v540_v1, %v540_v1  ;;  %v438_v55 = vsel %vm437_vm3, %v3908_v48, %v3909_v24 }
 0x143   : > { %v569_v54 = vpack.c.bf16 %v470_v31, %v445_v42  ;;  %v3944_v58 = vunpack.i.h.bf16 %v5366_v36  ;;  %v495_v57 = vsel %vm487_vm5, %v3929_v10, %v3848_v18  ;;  %v520_v43 = vsel %vm512_vm6, %v3934_v41, %v3853_v17 }
 0x144   : > { %3600 = vmatprep.subr.msk.bf16.mxu1 %vm631_vm8, %v581_v4  ;;  %3603 = vmatprep.subr.msk.bf16.mxu0 %vm631_vm8, %v583_v63  ;;  %v645_v2 = vsel %vm631_vm8, %v582_v5, 0  ;;  %v568_v26 = vpack.c.bf16 %v463_v40, %v438_v55  ;;  %v513_v45 = vsel %vm512_vm6, %v3933_v3, %v3934_v41  ;;  %v488_v13 = vsel %vm487_vm5, %v3928_v61, %v3929_v10 }
 0x145   : > { %718 = vmatpush1.bf16.msra.mxu1 %v639_v33  ;;  %771 = vmatpush1.bf16.msra.mxu0 %v645_v2  ;;  %v538_v50 = vsel %vm537_vm7, %v3943_v22, %v3944_v58  ;;  %v577_v12 = vpack.c.bf16 %v520_v43, %v495_v57  ;;  %v545_v17 = vsel %vm537_vm7, %v3944_v58, %v3863_v35 }
 0x146   : > { %815 = vmatprep.subr.bf16.mxu1 %v553_v8  ;;  %v584_v18 = vpack.c.bf16 %v538_v50, %v538_v50  ;;  %v576_v48 = vpack.c.bf16 %v513_v45, %v488_v13  ;;  %v585_v9 = vpack.c.bf16 %v545_v17, %v545_v17 }
 0x148   : > { %3601 = vmatmul.mubr.msk.bf16.vlgmr.msra.gmra.mrb[0].mxu1 %vm624_vm9, %v5263_v30  ;;  %3604 = vmatmul.mubr.msk.bf16.vlgmr.msra.gmra.mrb[8].mxu0 %vm624_vm9, %v5263_v30  ;;  %v651_v62 = vsel %vm631_vm8, %v584_v18, 0 }
 0x149   : > { %816 = vmatpush1.bf16.msra.mxu1 %v552_v0  ;;  %751 = vmatprep.mubr.bf16.mxu1 %v8147_v14 }
 0x14a   : > { %817 = vmatprep.subr.bf16.mxu1 %v561_v37  ;;  %804 = vmatprep.mubr.bf16.mxu0 %v8147_v14 }
 0x14d   : > { %818 = vmatpush1.bf16.msra.mxu1 %v560_v34 }
 0x14e   : > { %819 = vmatprep.subr.bf16.mxu1 %v569_v54 }
 0x14f   : > { %v5468_v27 = vpop.permute.xlu0 %596  ;;  %v5470_v3 = vpop.permute.xlu1 %601 }
 0x150   : > { %3602 = vmatmul.mubr.msk.bf16.gmra.mrb[4].mxu1 %vm624_vm9, %v5301_v15  ;;  %3605 = vmatmul.mubr.msk.bf16.gmra.mrb[12].mxu0 %vm624_vm9, %v5301_v15 }
 0x151   : > { %820 = vmatpush1.bf16.msra.mxu1 %v568_v26  ;;  %847 = vmatprep.mubr.bf16.mxu1 %v8147_v14 }
 0x152   : > { %821 = vmatprep.subr.bf16.mxu1 %v577_v12 }
 0x153   : > { %v5476_v22 = vpop.permute.xlu1 %606  ;;  %v5480_v52 = vpop.permute.xlu0 %611 }
 0x155   : > { %822 = vmatpush1.bf16.msra.mxu1 %v576_v48 }
 0x156   : > { %3606 = vmatprep.subr.msk.bf16.mxu1 %vm631_vm8, %v585_v9 }
 0x159   : > { %824 = vmatpush1.bf16.msra.mxu1 %v651_v62 }
 0x15c   : > { %3607 = vmatmul.mubr.msk.bf16.vlgmr.msra.gmra.mrb[8].mxu1 %vm624_vm9, %v5263_v30 }
 0x15d   : > { %857 = vmatprep.mubr.bf16.mxu1 %v8147_v14 }
 0x164   : > { %3608 = vmatmul.mubr.msk.bf16.gmra.mrb[12].mxu1 %vm624_vm9, %v5301_v15 }
 0x1ff   : > { %v690_v35 = vpop.f32.mrb[0].mxu0 }
 0x200   : > { %v692_v61 = vpop.f32.mrb[1].mxu0  ;;  %v691_v46 = vadd.f32 %v690_v35, %v5468_v27 }
 0x201   : > { %v694_v21 = vpop.f32.mrb[2].mxu0  ;;  %v693_v23 = vadd.f32 %v692_v61, %v5468_v27 }
 0x202   : > { %v695_v28 = vadd.f32 %v694_v21, %v5470_v3  ;;  %v868_v32 = vmax.f32 %v691_v46, 0.0  ;;  %v696_v30 = vpop.f32.mrb[3].mxu0 }
 0x203   : > { %v869_v36 = vmax.f32 %v693_v23, 0.0  ;;  %v697_v39 = vadd.f32 %v696_v30, %v5470_v3 }
 0x204   : > { %v876_v7 = vmax.f32 %v695_v28, 0.0 }
 0x205   : > { %v877_v15 = vmax.f32 %v697_v39, 0.0 }
 0x206   : > { %v1668_v44 = vpack.c.bf16 %v876_v7, %v868_v32  ;;  %v5478_v25 = vpack.i.bf16 %v876_v7, %v868_v32 }
 0x207   : > { %v700_v51 = vpop.f32.mrb[4].mxu0  ;;  %v1669_v6 = vpack.c.bf16 %v877_v15, %v869_v36  ;;  %v5485_v53 = vpack.i.bf16 %v877_v15, %v869_v36 }
 0x208   : > { %v702_v49 = vpop.f32.mrb[5].mxu0  ;;  %v701_v59 = vadd.f32 %v700_v51, %v5476_v22  ;;  %3948 = vrot.lane.b32.xlu1 %v5478_v25, %s4799_s26 }
 0x209   : > { %v704_v60 = vpop.f32.mrb[6].mxu0  ;;  %v703_v1 = vadd.f32 %v702_v49, %v5476_v22  ;;  %1881 = vmatprep.subr.bf16.mxu0 %v1669_v6 }
 0x20a   : > { %v884_v4 = vmax.f32 %v701_v59, 0.0  ;;  %v705_v63 = vadd.f32 %v704_v60, %v5480_v52  ;;  %v706_v5 = vpop.f32.mrb[7].mxu0  ;;  %1882 = vmatpush1.bf16.msra.mxu0 %v1668_v44 }
 0x20b   : > { %v885_v29 = vmax.f32 %v703_v1, 0.0  ;;  %v707_v33 = vadd.f32 %v706_v5, %v5480_v52 }
 0x20c   : > { %v892_v2 = vmax.f32 %v705_v63, 0.0 }
 0x20d   : > { %v893_v8 = vmax.f32 %v707_v33, 0.0 }
 0x20e   : > { %v1676_v16 = vpack.c.bf16 %v892_v2, %v884_v4  ;;  %v5490_v24 = vpack.i.bf16 %v892_v2, %v884_v4 }
 0x20f   : > { %v1677_v47 = vpack.c.bf16 %v893_v8, %v885_v29  ;;  %v5492_v56 = vpack.i.bf16 %v893_v8, %v885_v29 }
 0x211   : > { %1883 = vmatprep.subr.bf16.mxu0 %v1677_v47 }
 0x212   : > { %1884 = vmatpush1.bf16.msra.mxu0 %v1676_v16 }
 0x21b   : > { %v743_v0 = vpop.f32.mrb[0].mxu1  ;;  %v796_v11 = vpop.f32.mrb[8].mxu0 }
 0x21c   : > { %v744_v38 = vadd.f32 %v743_v0, %v5468_v27  ;;  %v5496_v37 = vadd.f32 %v796_v11, %v5468_v27  ;;  %v745_v41 = vpop.f32.mrb[1].mxu1  ;;  %v798_v10 = vpop.f32.mrb[9].mxu0 }
 0x21d   : > { %v746_v42 = vadd.f32 %v745_v41, %v5468_v27  ;;  %v747_v31 = vpop.f32.mrb[2].mxu1  ;;  %v800_v34 = vpop.f32.mrb[10].mxu0  ;;  %v5503_v26 = vadd.f32 %v798_v10, %v5468_v27 }
 0x21e   : > { %v748_v40 = vadd.f32 %v747_v31, %v5470_v3  ;;  %v749_v55 = vpop.f32.mrb[3].mxu1  ;;  %v802_v54 = vpop.f32.mrb[11].mxu0  ;;  %v870_v57 = vmax.f32 %v744_v38, 0.0  ;;  %v872_v43 = vmax.f32 %v5496_v37, 0.0  ;;  %v5506_v13 = vadd.f32 %v800_v34, %v5470_v3 }
 0x21f   : > { %v750_v58 = vadd.f32 %v749_v55, %v5470_v3  ;;  %v871_v45 = vmax.f32 %v746_v42, 0.0  ;;  %v5509_v17 = vadd.f32 %v802_v54, %v5470_v3  ;;  %v873_v61 = vmax.f32 %v5503_v26, 0.0 }
 0x220   : > { %v878_v50 = vmax.f32 %v748_v40, 0.0  ;;  %v880_v32 = vmax.f32 %v5506_v13, 0.0 }
 0x221   : > { %v879_v12 = vmax.f32 %v750_v58, 0.0  ;;  %v881_v15 = vmax.f32 %v5509_v17, 0.0 }
 0x222   : > { %v5511_v18 = vpack.i.bf16 %v878_v50, %v870_v57  ;;  %v1670_v48 = vpack.c.bf16 %v878_v50, %v870_v57  ;;  %v5555_v38 = vpack.i.bf16 %v880_v32, %v872_v43 }
 0x223   : > { %v753_v9 = vpop.f32.mrb[4].mxu1  ;;  %v806_v62 = vpop.f32.mrb[12].mxu0  ;;  %v1671_v35 = vpack.c.bf16 %v879_v12, %v871_v45  ;;  %v5524_v7 = vpack.i.bf16 %v879_v12, %v871_v45  ;;  %v5573_v12 = vpack.i.bf16 %v881_v15, %v873_v61 }
 0x224   : > { %v754_v46 = vadd.f32 %v753_v9, %v5476_v22  ;;  %v5516_v21 = vadd.f32 %v806_v62, %v5476_v22  ;;  %v755_v23 = vpop.f32.mrb[5].mxu1  ;;  %3963 = vrot.lane.b32.xlu0 %v5511_v18, %s4798_s3  ;;  %v808_v28 = vpop.f32.mrb[13].mxu0  ;;  %3953 = vrot.lane.b32.xlu1 %v5511_v18, %s4799_s26 }
 0x225   : > { %v756_v30 = vadd.f32 %v755_v23, %v5476_v22  ;;  %v757_v36 = vpop.f32.mrb[6].mxu1  ;;  %v810_v39 = vpop.f32.mrb[14].mxu0  ;;  %1987 = vmatprep.subr.bf16.mxu1 %v1671_v35  ;;  %v5528_v44 = vadd.f32 %v808_v28, %v5476_v22 }
 0x226   : > { %v758_v51 = vadd.f32 %v757_v36, %v5480_v52  ;;  %v5532_v6 = vadd.f32 %v810_v39, %v5480_v52  ;;  %v759_v49 = vpop.f32.mrb[7].mxu1  ;;  %v812_v59 = vpop.f32.mrb[15].mxu0  ;;  %1988 = vmatpush1.bf16.msra.mxu1 %v1670_v48  ;;  %v886_v60 = vmax.f32 %v754_v46, 0.0  ;;  %v888_v1 = vmax.f32 %v5516_v21, 0.0 }
 0x227   : > { %v887_v4 = vmax.f32 %v756_v30, 0.0  ;;  %v760_v63 = vadd.f32 %v759_v49, %v5480_v52  ;;  %v813_v29 = vadd.f32 %v812_v59, %v5480_v52  ;;  %v889_v0 = vmax.f32 %v5528_v44, 0.0 }
 0x228   : > { %v894_v5 = vmax.f32 %v758_v51, 0.0  ;;  %3968 = vrot.lane.b32.xlu0 %v5511_v18, %s4800_s17  ;;  %3958 = vrot.lane.b32.xlu1 %v5478_v25, %s4798_s3  ;;  %v896_v33 = vmax.f32 %v5532_v6, 0.0 }
 0x229   : > { %v895_v2 = vmax.f32 %v760_v63, 0.0  ;;  %v897_v42 = vmax.f32 %v813_v29, 0.0 }
 0x22a   : > { %v1678_v8 = vpack.c.bf16 %v894_v5, %v886_v60  ;;  %v5542_v16 = vpack.i.bf16 %v894_v5, %v886_v60  ;;  %v5559_v41 = vpack.i.bf16 %v896_v33, %v888_v1  ;;  %v5625_v5 = vpack.c.bf16 %v896_v33, %v888_v1 }
 0x22b   : > { %v1679_v47 = vpack.c.bf16 %v895_v2, %v887_v4  ;;  %v5549_v11 = vpack.i.bf16 %v895_v2, %v887_v4  ;;  %v5589_v30 = vpack.i.bf16 %v897_v42, %v889_v0  ;;  %v5619_v4 = vpack.c.bf16 %v880_v32, %v872_v43 }
 0x22c   : > { %3978 = vrot.lane.b32.xlu0 %v5511_v18, %s4802_s12  ;;  %3973 = vrot.lane.b32.xlu1 %v5478_v25, %s4800_s17  ;;  %v5621_v63 = vpack.c.bf16 %v897_v42, %v889_v0  ;;  %8254 = vst [vmem:[#allocation23_spill] sm:$0xff] %v5625_v5  ;;  %v4591_v42 = vld [vmem:[#allocation5 + $0x4] ss:$12 sps:$4 sm:$0xff]  }
 0x22d   : > { %1989 = vmatprep.subr.bf16.mxu1 %v1679_v47  ;;  %8252 = vst [vmem:[#allocation21_spill] sm:$0xff] %v5619_v4  ;;  %1913 = vmatprep.mubr.bf16.mxu0 %v4591_v42 }
 0x22e   : > { %1990 = vmatpush1.bf16.msra.mxu1 %v1678_v8  ;;  %8253 = vst [vmem:[#allocation22_spill] sm:$0xff] %v5621_v63  ;;  %2019 = vmatprep.mubr.bf16.mxu1 %v4591_v42 }
 0x22f   : > { %v849_v10 = vpop.f32.mrb[8].mxu1 }
 0x230   : > { %v850_v31 = vadd.f32 %v849_v10, %v5468_v27  ;;  %3988 = vrot.lane.b32.xlu0 %v5511_v18, %s4801_s30  ;;  %v851_v34 = vpop.f32.mrb[9].mxu1  ;;  %3983 = vrot.lane.b32.xlu1 %v5478_v25, %s4802_s12 }
 0x231   : > { %v852_v40 = vadd.f32 %v851_v34, %v5468_v27  ;;  %v853_v55 = vpop.f32.mrb[10].mxu1 }
 0x232   : > { %v874_v54 = vmax.f32 %v850_v31, 0.0  ;;  %v854_v58 = vadd.f32 %v853_v55, %v5470_v3  ;;  %v855_v57 = vpop.f32.mrb[11].mxu1 }
 0x233   : > { %v875_v50 = vmax.f32 %v852_v40, 0.0  ;;  %v856_v45 = vadd.f32 %v855_v57, %v5470_v3 }
 0x234   : > { %v882_v48 = vmax.f32 %v854_v58, 0.0  ;;  %3998 = vrot.lane.b32.xlu0 %v5511_v18, %s4804_s20  ;;  %3993 = vrot.lane.b32.xlu1 %v5478_v25, %s4801_s30 }
 0x235   : > { %v883_v27 = vmax.f32 %v856_v45, 0.0 }
 0x236   : > { %v5579_v9 = vpack.i.bf16 %v882_v48, %v874_v54  ;;  %v5629_v2 = vpack.c.bf16 %v882_v48, %v874_v54 }
 0x237   : > { %v859_v62 = vpop.f32.mrb[12].mxu1  ;;  %v5581_v35 = vpack.i.bf16 %v883_v27, %v875_v50  ;;  %v5627_v29 = vpack.c.bf16 %v883_v27, %v875_v50 }
 0x238   : > { %v860_v3 = vadd.f32 %v859_v62, %v5476_v22  ;;  %4008 = vrot.lane.b32.xlu0 %v5511_v18, %s4803_s19  ;;  %v861_v46 = vpop.f32.mrb[13].mxu1  ;;  %4003 = vrot.lane.b32.xlu1 %v5478_v25, %s4804_s20  ;;  %8256 = vst [vmem:[#allocation25_spill] sm:$0xff] %v5629_v2 }
 0x239   : > { %v862_v23 = vadd.f32 %v861_v46, %v5476_v22  ;;  %v863_v28 = vpop.f32.mrb[14].mxu1  ;;  %8255 = vst [vmem:[#allocation24_spill] sm:$0xff] %v5627_v29 }
 0x23a   : > { %v890_v36 = vmax.f32 %v860_v3, 0.0  ;;  %v864_v39 = vadd.f32 %v863_v28, %v5480_v52  ;;  %v865_v44 = vpop.f32.mrb[15].mxu1 }
 0x23b   : > { %v891_v51 = vmax.f32 %v862_v23, 0.0  ;;  %v866_v6 = vadd.f32 %v865_v44, %v5480_v52  ;;  %v5613_v52 = vpack.c.bf16 %v881_v15, %v873_v61 }
 0x23c   : > { %v898_v49 = vmax.f32 %v864_v39, 0.0  ;;  %4043 = vrot.lane.b32.xlu0 %v5524_v7, %s4800_s17  ;;  %4013 = vrot.lane.b32.xlu1 %v5478_v25, %s4803_s19 }
 0x23d   : > { %v899_v59 = vmax.f32 %v866_v6, 0.0  ;;  %8251 = vst [vmem:[#allocation20_spill] sm:$0xff] %v5613_v52 }
 0x23e   : > { %v5597_v60 = vpack.i.bf16 %v898_v49, %v890_v36  ;;  %v5633_v17 = vpack.c.bf16 %v898_v49, %v890_v36 }
 0x23f   : > { %v5599_v22 = vpack.i.bf16 %v899_v59, %v891_v51  ;;  %v5631_v26 = vpack.c.bf16 %v899_v59, %v891_v51 }
 0x240   : > { %4053 = vrot.lane.b32.xlu0 %v5524_v7, %s4802_s12  ;;  %4018 = vrot.lane.b32.xlu1 %v5485_v53, %s4799_s26  ;;  %8258 = vst [vmem:[#allocation27_spill] sm:$0xff] %v5633_v17 }
 0x241   : > { %8257 = vst [vmem:[#allocation26_spill] sm:$0xff] %v5631_v26 }
 0x244   : > { %4063 = vrot.lane.b32.xlu0 %v5524_v7, %s4801_s30  ;;  %4023 = vrot.lane.b32.xlu1 %v5524_v7, %s4799_s26 }
 0x248   : > { %4073 = vrot.lane.b32.xlu0 %v5524_v7, %s4804_s20  ;;  %4028 = vrot.lane.b32.xlu1 %v5485_v53, %s4798_s3 }
 0x24c   : > { %4083 = vrot.lane.b32.xlu0 %v5524_v7, %s4803_s19  ;;  %4033 = vrot.lane.b32.xlu1 %v5524_v7, %s4798_s3 }
 0x250   : > { %4088 = vrot.lane.b32.xlu0 %v5490_v24, %s4799_s26  ;;  %4038 = vrot.lane.b32.xlu1 %v5485_v53, %s4800_s17 }
 0x254   : > { %4093 = vrot.lane.b32.xlu0 %v5542_v16, %s4799_s26  ;;  %4048 = vrot.lane.b32.xlu1 %v5485_v53, %s4802_s12 }
 0x258   : > { %4098 = vrot.lane.b32.xlu0 %v5490_v24, %s4798_s3  ;;  %4058 = vrot.lane.b32.xlu1 %v5485_v53, %s4801_s30 }
 0x25c   : > { %4103 = vrot.lane.b32.xlu0 %v5542_v16, %s4798_s3  ;;  %4068 = vrot.lane.b32.xlu1 %v5485_v53, %s4804_s20 }
 0x260   : > { %4113 = vrot.lane.b32.xlu0 %v5490_v24, %s4800_s17  ;;  %4078 = vrot.lane.b32.xlu1 %v5485_v53, %s4803_s19 }
 0x264   : > { %4123 = vrot.lane.b32.xlu0 %v5490_v24, %s4802_s12  ;;  %4108 = vrot.lane.b32.xlu1 %v5542_v16, %s4800_s17 }
 0x268   : > { %4133 = vrot.lane.b32.xlu0 %v5490_v24, %s4801_s30  ;;  %4118 = vrot.lane.b32.xlu1 %v5542_v16, %s4802_s12 }
 0x26c   : > { %4143 = vrot.lane.b32.xlu0 %v5490_v24, %s4804_s20  ;;  %4128 = vrot.lane.b32.xlu1 %v5542_v16, %s4801_s30 }
 0x270   : > { %4153 = vrot.lane.b32.xlu0 %v5490_v24, %s4803_s19  ;;  %4138 = vrot.lane.b32.xlu1 %v5542_v16, %s4804_s20 }
 0x274   : > { %4158 = vrot.lane.b32.xlu0 %v5492_v56, %s4799_s26  ;;  %4148 = vrot.lane.b32.xlu1 %v5542_v16, %s4803_s19 }
 0x278   : > { %4163 = vrot.lane.b32.xlu0 %v5549_v11, %s4799_s26  ;;  %4168 = vrot.lane.b32.xlu1 %v5492_v56, %s4798_s3 }
 0x27a   : > { %v5711_v37 = vpop.permute.xlu1 %3948 }
 0x27b   : > { %8259 = vst [vmem:[#allocation28_spill] sm:$0xff] %v5711_v37  ;;  %v8145_v34 = vunpack.i.h.bf16 %v5711_v37  ;;  %v8146_v40 = vunpack.i.l.bf16 %v5711_v37 }
 0x27c   : > { %4178 = vrot.lane.b32.xlu0 %v5492_v56, %s4800_s17  ;;  %4173 = vrot.lane.b32.xlu1 %v5549_v11, %s4798_s3 }
 0x280   : > { %4188 = vrot.lane.b32.xlu0 %v5492_v56, %s4802_s12  ;;  %4183 = vrot.lane.b32.xlu1 %v5549_v11, %s4800_s17 }
 0x284   : > { %4198 = vrot.lane.b32.xlu0 %v5492_v56, %s4801_s30  ;;  %4193 = vrot.lane.b32.xlu1 %v5549_v11, %s4802_s12 }
 0x288   : > { %4208 = vrot.lane.b32.xlu0 %v5492_v56, %s4804_s20  ;;  %4203 = vrot.lane.b32.xlu1 %v5549_v11, %s4801_s30 }
 0x28c   : > { %4218 = vrot.lane.b32.xlu0 %v5492_v56, %s4803_s19  ;;  %4213 = vrot.lane.b32.xlu1 %v5549_v11, %s4804_s20 }
 0x290   : > { %4243 = vrot.lane.b32.xlu0 %v5555_v38, %s4798_s3  ;;  %4223 = vrot.lane.b32.xlu1 %v5555_v38, %s4799_s26 }
 0x294   : > { %4283 = vrot.lane.b32.xlu0 %v5559_v41, %s4799_s26  ;;  %4228 = vrot.lane.b32.xlu1 %v5549_v11, %s4803_s19 }
 0x296   : > { %v5717_v43 = vpop.permute.xlu0 %3963  ;;  %v3954_v13 = vpop.permute.xlu1 %3953 }
 0x297   : > { %v3956_v58 = vunpack.i.h.bf16 %v3954_v13  ;;  %v3955_v57 = vunpack.i.l.bf16 %v3954_v13  ;;  %v8276_v4 = vunpack.i.h.bf16 %v5717_v43 }
 0x298   : > { %4288 = vrot.lane.b32.xlu0 %v5597_v60, %s4799_s26  ;;  %4233 = vrot.lane.b32.xlu1 %v5485_v53, %s4805_s22 }
 0x29a   : > { %v5723_v61 = vpop.permute.xlu0 %3968  ;;  %v5725_v21 = vpop.permute.xlu1 %3958 }
 0x29b   : > { %8260 = vst [vmem:[#allocation29_spill] sm:$0xff] %v5725_v21 }
 0x29c   : > { %4293 = vrot.lane.b32.xlu0 %v5559_v41, %s4798_s3  ;;  %4238 = vrot.lane.b32.xlu1 %v5579_v9, %s4799_s26 }
 0x29e   : > { %v5731_v32 = vpop.permute.xlu0 %3978  ;;  %v5733_v15 = vpop.permute.xlu1 %3973 }
 0x29f   : > { %8261 = vst [vmem:[#allocation30_spill] sm:$0xff] %v5733_v15 }
 0x2a0   : > { %4298 = vrot.lane.b32.xlu0 %v5511_v18, %s4805_s22  ;;  %4248 = vrot.lane.b32.xlu1 %v5555_v38, %s4800_s17 }
 0x2a2   : > { %v5739_v53 = vpop.permute.xlu0 %3988  ;;  %v5741_v1 = vpop.permute.xlu1 %3983 }
 0x2a3   : > { %8262 = vst [vmem:[#allocation31_spill] sm:$0xff] %v5741_v1 }
 0x2a4   : > { %4308 = vrot.lane.b32.xlu0 %v5559_v41, %s4800_s17  ;;  %4253 = vrot.lane.b32.xlu1 %v5555_v38, %s4802_s12 }
 0x2a6   : > { %v5747_v33 = vpop.permute.xlu0 %3998  ;;  %v5749_v8 = vpop.permute.xlu1 %3993 }
 0x2a7   : > { %8263 = vst [vmem:[#allocation32_spill] sm:$0xff] %v5749_v8 }
 0x2a8   : > { %4313 = vrot.lane.b32.xlu0 %v5492_v56, %s4805_s22  ;;  %4258 = vrot.lane.b32.xlu1 %v5555_v38, %s4801_s30 }
 0x2aa   : > { %v5755_v18 = vpop.permute.xlu0 %4008  ;;  %v5757_v47 = vpop.permute.xlu1 %4003 }
 0x2ab   : > { %8264 = vst [vmem:[#allocation33_spill] sm:$0xff] %v5757_v47 }
 0x2ac   : > { %4323 = vrot.lane.b32.xlu0 %v5559_v41, %s4802_s12  ;;  %4263 = vrot.lane.b32.xlu1 %v5555_v38, %s4804_s20 }
 0x2ae   : > { %v5763_v0 = vpop.permute.xlu0 %4043  ;;  %v5765_v10 = vpop.permute.xlu1 %4013 }
 0x2af   : > { %8265 = vst [vmem:[#allocation34_spill] sm:$0xff] %v5763_v0  ;;  %8266 = vst [vmem:[#allocation35_spill] sm:$0xff] %v5765_v10 }
 0x2b0   : > { %4328 = vrot.lane.b32.xlu0 %v5524_v7, %s4805_s22  ;;  %4268 = vrot.lane.b32.xlu1 %v5555_v38, %s4803_s19 }
 0x2b2   : > { %v5771_v56 = vpop.permute.xlu0 %4053  ;;  %v4019_v31 = vpop.permute.xlu1 %4018 }
 0x2b3   : > { %v4021_v55 = vunpack.i.h.bf16 %v4019_v31  ;;  %v4020_v54 = vunpack.i.l.bf16 %v4019_v31 }
 0x2b4   : > { %4338 = vrot.lane.b32.xlu0 %v5559_v41, %s4801_s30  ;;  %4273 = vrot.lane.b32.xlu1 %v5573_v12, %s4799_s26 }
 0x2b5   : > { %v988_v7 = vsel %vm362_vm0, %v8146_v40, %v4020_v54  ;;  %v989_v50 = vsel %vm362_vm0, %v8145_v34, %v4021_v55  ;;  %v984_v27 = vsel %vm362_vm0, %v4020_v54, %v3955_v57  ;;  %v985_v62 = vsel %vm362_vm0, %v4021_v55, %v3956_v58 }
 0x2b6   : > { %v5787_v45 = vpop.permute.xlu0 %4063  ;;  %v5789_v48 = vpop.permute.xlu1 %4023  ;;  %v1684_v23 = vpack.c.bf16 %v989_v50, %v988_v7  ;;  %v1685_v28 = vpack.c.bf16 %v985_v62, %v984_v27 }
 0x2b7   : > { %8267 = vst [vmem:[#allocation36_spill] sm:$0xff] %v5787_v45  ;;  %v8149_v3 = vunpack.i.h.bf16 %v5789_v48  ;;  %v8150_v46 = vunpack.i.l.bf16 %v5789_v48 }
 0x2b8   : > { %4343 = vrot.lane.b32.xlu0 %v5490_v24, %s4805_s22  ;;  %4278 = vrot.lane.b32.xlu1 %v5581_v35, %s4799_s26 }
 0x2b9   : > { %v5805_v36 = vsel %vm362_vm0, %v3955_v57, %v8150_v46  ;;  %v5811_v39 = vsel %vm362_vm0, %v3956_v58, %v8149_v3  ;;  %1885 = vmatprep.subr.bf16.mxu0 %v1685_v28 }
 0x2ba   : > { %v5813_v44 = vpop.permute.xlu0 %4073  ;;  %v5815_v24 = vpop.permute.xlu1 %4028  ;;  %1886 = vmatpush1.bf16.msra.mxu0 %v1684_v23 }
 0x2bb   : > { %8268 = vst [vmem:[#allocation37_spill] sm:$0xff] %v5813_v44  ;;  %v4031_v40 = vunpack.i.h.bf16 %v5815_v24  ;;  %v4030_v14 = vunpack.i.l.bf16 %v5815_v24 }
 0x2bc   : > { %4358 = vrot.lane.b32.xlu0 %v5559_v41, %s4804_s20  ;;  %4303 = vrot.lane.b32.xlu1 %v5478_v25, %s4805_s22 }
 0x2be   : > { %v5823_v6 = vpop.permute.xlu0 %4083  ;;  %v5825_v49 = vpop.permute.xlu1 %4033 }
 0x2bf   : > { %8269 = vst [vmem:[#allocation38_spill] sm:$0xff] %v5823_v6 }
 0x2c0   : > { %4363 = vrot.lane.b32.xlu0 %v5579_v9, %s4798_s3  ;;  %4318 = vrot.lane.b32.xlu1 %v5542_v16, %s4805_s22 }
 0x2c2   : > { %v5831_v59 = vpop.permute.xlu0 %4088  ;;  %v5833_v13 = vpop.permute.xlu1 %4038 }
 0x2c3   : > { %8270 = vst [vmem:[#allocation39_spill] sm:$0xff] %v5831_v59  ;;  %v8156_v51 = vunpack.i.h.bf16 %v5831_v59  ;;  %v8153_v19 = vunpack.i.l.bf16 %v5831_v59  ;;  %v8275_v59 = vunpack.i.l.bf16 %v5717_v43  ;;  %v4041_v6 = vunpack.i.h.bf16 %v5833_v13 }
 0x2c4   : > { %4378 = vrot.lane.b32.xlu0 %v5559_v41, %s4803_s19  ;;  %4333 = vrot.lane.b32.xlu1 %v5555_v38, %s4805_s22 }
 0x2c6   : > { %v5839_v25 = vpop.permute.xlu0 %4093  ;;  %v5841_v42 = vpop.permute.xlu1 %4048 }
 0x2c7   : > { %v8157_v3 = vunpack.i.l.bf16 %v5839_v25  ;;  %v8274_v34 = vunpack.i.h.bf16 %v5839_v25 }
 0x2c8   : > { %4383 = vrot.lane.b32.xlu0 %v5579_v9, %s4800_s17  ;;  %4348 = vrot.lane.b32.xlu1 %v5549_v11, %s4805_s22 }
 0x2ca   : > { %v5847_v16 = vpop.permute.xlu0 %4098  ;;  %v5849_v31 = vpop.permute.xlu1 %4058 }
 0x2cb   : > { %8271 = vst [vmem:[#allocation40_spill] sm:$0xff] %v5847_v16 }
 0x2cc   : > { %4398 = vrot.lane.b32.xlu0 %v5579_v9, %s4802_s12  ;;  %4353 = vrot.lane.b32.xlu1 %v5573_v12, %s4798_s3 }
 0x2ce   : > { %v5855_v38 = vpop.permute.xlu0 %4103  ;;  %v5857_v55 = vpop.permute.xlu1 %4068 }
 0x2d0   : > { %4413 = vrot.lane.b32.xlu0 %v5559_v41, %s4805_s22  ;;  %4368 = vrot.lane.b32.xlu1 %v5581_v35, %s4798_s3 }
 0x2d2   : > { %v5863_v11 = vpop.permute.xlu0 %4113  ;;  %v5865_v54 = vpop.permute.xlu1 %4078 }
 0x2d3   : > { %8272 = vst [vmem:[#allocation41_spill] sm:$0xff] %v5863_v11 }
 0x2d4   : > { %4418 = vrot.lane.b32.xlu0 %v5597_v60, %s4798_s3  ;;  %4373 = vrot.lane.b32.xlu1 %v5573_v12, %s4800_s17 }
 0x2d6   : > { %v5871_v58 = vpop.permute.xlu0 %4123  ;;  %v5873_v57 = vpop.permute.xlu1 %4108 }
 0x2d7   : > { %8273 = vst [vmem:[#allocation42_spill] sm:$0xff] %v5871_v58 }
 0x2d8   : > { %4423 = vrot.lane.b32.xlu0 %v5597_v60, %s4800_s17  ;;  %4388 = vrot.lane.b32.xlu1 %v5581_v35, %s4800_s17 }
 0x2da   : > { %v5879_v41 = vpop.permute.xlu0 %4133  ;;  %v5881_v7 = vpop.permute.xlu1 %4118 }
 0x2dc   : > { %4428 = vrot.lane.b32.xlu0 %v5597_v60, %s4802_s12  ;;  %4393 = vrot.lane.b32.xlu1 %v5573_v12, %s4802_s12 }
 0x2de   : > { %v5887_v50 = vpop.permute.xlu0 %4143  ;;  %v5889_v27 = vpop.permute.xlu1 %4128 }
 0x2e0   : > { %4433 = vrot.lane.b32.xlu0 %v5589_v30, %s4799_s26  ;;  %4403 = vrot.lane.b32.xlu1 %v5581_v35, %s4802_s12 }
 0x2e2   : > { %v5895_v62 = vpop.permute.xlu0 %4153  ;;  %v5897_v23 = vpop.permute.xlu1 %4138 }
 0x2e4   : > { %4438 = vrot.lane.b32.xlu0 %v5599_v22, %s4799_s26  ;;  %4408 = vrot.lane.b32.xlu1 %v5573_v12, %s4801_s30 }
 0x2e6   : > { %v4159_v17 = vpop.permute.xlu0 %4158  ;;  %v5917_v26 = vpop.permute.xlu1 %4148 }
 0x2e7   : > { %v4161_v46 = vunpack.i.h.bf16 %v4159_v17  ;;  %v4160_v37 = vunpack.i.l.bf16 %v4159_v17 }
 0x2e8   : > { %4443 = vrot.lane.b32.xlu0 %v5579_v9, %s4801_s30  ;;  %4448 = vrot.lane.b32.xlu1 %v5589_v30, %s4798_s3 }
 0x2e9   : > { %v990_v2 = vsel %vm362_vm0, %v8153_v19, %v4160_v37  ;;  %v991_v17 = vsel %vm362_vm0, %v8156_v51, %v4161_v46  ;;  %v986_v28 = vsel %vm362_vm0, %v4160_v37, %v8157_v3  ;;  %v987_v29 = vsel %vm362_vm0, %v4161_v46, %v8274_v34 }
 0x2ea   : > { %v5945_v24 = vpop.permute.xlu0 %4163  ;;  %v4169_v5 = vpop.permute.xlu1 %4168  ;;  %v1693_v63 = vpack.c.bf16 %v987_v29, %v986_v28  ;;  %v1692_v19 = vpack.c.bf16 %v991_v17, %v990_v2  ;;  %v1080_v51 = vsel %vm387_vm1, %v4030_v14, %v8275_v59  ;;  %v1081_v37 = vsel %vm387_vm1, %v4031_v40, %v8276_v4 }
 0x2eb   : > { %v4171_v34 = vunpack.i.h.bf16 %v4169_v5  ;;  %v4170_v46 = vunpack.i.l.bf16 %v4169_v5  ;;  %v8277_v59 = vunpack.i.l.bf16 %v5725_v21  ;;  %v8278_v17 = vunpack.i.h.bf16 %v5725_v21 }
 0x2ec   : > { %4453 = vrot.lane.b32.xlu0 %v5599_v22, %s4798_s3  ;;  %4463 = vrot.lane.b32.xlu1 %v5581_v35, %s4801_s30  ;;  %v1701_v52 = vpack.c.bf16 %v1081_v37, %v1080_v51  ;;  %v4040_v29 = vunpack.i.l.bf16 %v5833_v13  ;;  %v8279_v4 = vunpack.i.l.bf16 %v5855_v38  ;;  %v8162_v13 = vunpack.i.h.bf16 %v5847_v16 }
 0x2ed   : > { %v1084_v5 = vsel %vm387_vm1, %v8277_v59, %v4030_v14  ;;  %v1085_v3 = vsel %vm387_vm1, %v8278_v17, %v4031_v40  ;;  %1887 = vmatprep.subr.bf16.mxu0 %v1693_v63  ;;  %v8280_v59 = vunpack.i.h.bf16 %v5855_v38  ;;  %v8289_v63 = vunpack.i.h.bf16 %v5825_v49 }
 0x2ee   : > { %1888 = vmatpush1.bf16.msra.mxu0 %v1692_v19  ;;  %v4179_v2 = vpop.permute.xlu0 %4178  ;;  %v5976_v28 = vpop.permute.xlu1 %4173  ;;  %v1082_v14 = vsel %vm387_vm1, %v4170_v46, %v8279_v4  ;;  %v8163_v19 = vunpack.i.l.bf16 %v5847_v16 }
 0x2ef   : > { %v1083_v40 = vsel %vm387_vm1, %v4171_v34, %v8280_v59  ;;  %1889 = vmatprep.subr.bf16.mxu0 %v1701_v52  ;;  %v1700_v59 = vpack.c.bf16 %v1085_v3, %v1084_v5  ;;  %v1087_v52 = vsel %vm387_vm1, %v8162_v13, %v4171_v34  ;;  %v4181_v17 = vunpack.i.h.bf16 %v4179_v2 }
 0x2f0   : > { %4458 = vrot.lane.b32.xlu0 %v5597_v60, %s4801_s30  ;;  %4468 = vrot.lane.b32.xlu1 %v5589_v30, %s4800_s17  ;;  %v1086_v51 = vsel %vm387_vm1, %v8163_v19, %v4170_v46  ;;  %v1709_v37 = vpack.c.bf16 %v1083_v40, %v1082_v14  ;;  %v4180_v4 = vunpack.i.l.bf16 %v4179_v2  ;;  %v8281_v3 = vunpack.i.l.bf16 %v5723_v61 }
 0x2f1   : > { %v8282_v34 = vunpack.i.h.bf16 %v5723_v61  ;;  %v8283_v14 = vunpack.i.l.bf16 %v5733_v15  ;;  %v8284_v40 = vunpack.i.h.bf16 %v5733_v15  ;;  %v4051_v19 = vunpack.i.h.bf16 %v5841_v42 }
 0x2f2   : > { %1890 = vmatpush1.bf16.msra.mxu0 %v1700_v59  ;;  %v6006_v21 = vpop.permute.xlu0 %4188  ;;  %v6008_v44 = vpop.permute.xlu1 %4183  ;;  %v1176_v5 = vsel %vm412_vm2, %v4040_v29, %v8281_v3  ;;  %v4050_v3 = vunpack.i.l.bf16 %v5841_v42  ;;  %v8287_v42 = vunpack.i.h.bf16 %v5763_v0  ;;  %v8293_v15 = vunpack.i.h.bf16 %v5873_v57 }
 0x2f3   : > { %v1177_v13 = vsel %vm412_vm2, %v4041_v6, %v8282_v34  ;;  %v1180_v2 = vsel %vm412_vm2, %v8283_v14, %v4040_v29  ;;  %v1181_v59 = vsel %vm412_vm2, %v8284_v40, %v4041_v6  ;;  %1891 = vmatprep.subr.bf16.mxu0 %v1709_v37  ;;  %v1708_v29 = vpack.c.bf16 %v1087_v52, %v1086_v51 }
 0x2f4   : > { %4478 = vrot.lane.b32.xlu0 %v5599_v22, %s4800_s17  ;;  %4473 = vrot.lane.b32.xlu1 %v5573_v12, %s4804_s20  ;;  %v8285_v14 = vunpack.i.l.bf16 %v5763_v0  ;;  %v8286_v6 = vunpack.i.l.bf16 %v5723_v61  ;;  %v8288_v40 = vmov %v8282_v34  ;;  %v8290_v51 = vunpack.i.h.bf16 %v5717_v43 }
 0x2f5   : > { %v6049_v46 = vsel %vm412_vm2, %v8288_v40, %v8287_v42  ;;  %v1717_v34 = vpack.c.bf16 %v1177_v13, %v1176_v5  ;;  %v8292_v42 = vunpack.i.l.bf16 %v5873_v57  ;;  %v8294_v13 = vunpack.i.l.bf16 %v5825_v49 }
 0x2f6   : > { %v6041_v37 = vsel %vm412_vm2, %v8286_v6, %v8285_v14  ;;  %v6057_v52 = vsel %vm387_vm1, %v8290_v51, %v8289_v63  ;;  %v4061_v14 = vunpack.i.h.bf16 %v5849_v31  ;;  %v4060_v6 = vunpack.i.l.bf16 %v5849_v31  ;;  %1892 = vmatpush1.bf16.msra.mxu0 %v1708_v29  ;;  %v6061_v16 = vpop.permute.xlu0 %4198  ;;  %v6063_v61 = vpop.permute.xlu1 %4193 }
 0x2f7   : > { %8291 = vst [vmem:[#allocation43_spill] sm:$0xff] %v6063_v61  ;;  %v1178_v40 = vsel %vm412_vm2, %v4180_v4, %v8292_v42  ;;  %v1179_v63 = vsel %vm412_vm2, %v4181_v17, %v8293_v15  ;;  %v8295_v5 = vunpack.i.l.bf16 %v5717_v43  ;;  %v8174_v29 = vunpack.i.h.bf16 %v5863_v11  ;;  %1893 = vmatprep.subr.bf16.mxu0 %v1717_v34 }
 0x2f8   : > { %v8175_v51 = vunpack.i.l.bf16 %v5863_v11  ;;  %v1716_v45 = vpack.c.bf16 %v1181_v59, %v1180_v2  ;;  %v8296_v61 = vunpack.i.l.bf16 %v5741_v1  ;;  %v8297_v0 = vunpack.i.h.bf16 %v5741_v1  ;;  %4483 = vrot.lane.b32.xlu0 %v5579_v9, %s4804_s20  ;;  %4488 = vrot.lane.b32.xlu1 %v5589_v30, %s4802_s12 }
 0x2f9   : > { %v6079_v31 = vsel %vm387_vm1, %v8295_v5, %v8294_v13  ;;  %v8298_v2 = vunpack.i.l.bf16 %v5731_v32  ;;  %v8299_v13 = vunpack.i.h.bf16 %v5731_v32  ;;  %v4191_v42 = vunpack.i.h.bf16 %v6006_v21 }
 0x2fa   : > { %v1276_v15 = vsel %vm437_vm3, %v8296_v61, %v4050_v3  ;;  %v1277_v43 = vsel %vm437_vm3, %v8297_v0, %v4051_v19  ;;  %v1182_v34 = vsel %vm412_vm2, %v8175_v51, %v4180_v4  ;;  %v1183_v0 = vsel %vm412_vm2, %v8174_v29, %v4181_v17  ;;  %1894 = vmatpush1.bf16.msra.mxu0 %v1716_v45  ;;  %v6116_v1 = vpop.permute.xlu1 %4203 }
 0x2fb   : > { %v1272_v59 = vsel %vm437_vm3, %v4050_v3, %v8298_v2  ;;  %v1725_v61 = vpack.c.bf16 %v1179_v63, %v1178_v40  ;;  %v1273_v5 = vsel %vm437_vm3, %v4051_v19, %v8299_v13  ;;  %v4190_v3 = vunpack.i.l.bf16 %v6006_v21  ;;  %v6114_v2 = vpop.permute.xlu0 %4208 }
 0x2fc   : > { %v8300_v4 = vunpack.i.l.bf16 %v5739_v53  ;;  %v8301_v40 = vunpack.i.h.bf16 %v5739_v53  ;;  %v8302_v63 = vunpack.i.l.bf16 %v5749_v8  ;;  %v8303_v45 = vunpack.i.h.bf16 %v5749_v8  ;;  %4493 = vrot.lane.b32.xlu0 %v5599_v22, %s4802_s12  ;;  %4503 = vrot.lane.b32.xlu1 %v5581_v35, %s4804_s20 }
 0x2fd   : > { %1895 = vmatprep.subr.bf16.mxu0 %v1725_v61  ;;  %v4080_v29 = vunpack.i.l.bf16 %v5865_v54  ;;  %v8304_v8 = vunpack.i.l.bf16 %v5881_v7 }
 0x2fe   : > { %v6122_v17 = vsel %vm462_vm4, %v4060_v6, %v8300_v4  ;;  %v6128_v19 = vsel %vm462_vm4, %v4061_v14, %v8301_v40  ;;  %v6134_v21 = vsel %vm462_vm4, %v8302_v63, %v4060_v6  ;;  %v6140_v13 = vsel %vm462_vm4, %v8303_v45, %v4061_v14  ;;  %v6160_v11 = vpop.permute.xlu1 %4213 }
 0x2ff   : > { %v4070_v4 = vunpack.i.l.bf16 %v5857_v55  ;;  %v4071_v40 = vunpack.i.h.bf16 %v5857_v55  ;;  %v1724_v14 = vpack.c.bf16 %v1183_v0, %v1182_v34  ;;  %v1733_v6 = vpack.c.bf16 %v1273_v5, %v1272_v59  ;;  %v6158_v51 = vpop.permute.xlu0 %4218 }
 0x300   : > { %v1732_v63 = vpack.c.bf16 %v1277_v43, %v1276_v15  ;;  %v1749_v61 = vpack.c.bf16 %v6128_v19, %v6122_v17  ;;  %v4081_v55 = vunpack.i.h.bf16 %v5865_v54  ;;  %v1274_v15 = vsel %vm437_vm3, %v4190_v3, %v8304_v8  ;;  %4498 = vrot.lane.b32.xlu0 %v5597_v60, %s4804_s20  ;;  %4508 = vrot.lane.b32.xlu1 %v5589_v30, %s4801_s30 }
 0x301   : > { %1896 = vmatpush1.bf16.msra.mxu0 %v1724_v14  ;;  %v8305_v43 = vunpack.i.h.bf16 %v5881_v7  ;;  %v8306_v34 = vunpack.i.l.bf16 %v5757_v47  ;;  %v8182_v0 = vunpack.i.h.bf16 %v5871_v58  ;;  %v8180_v5 = vunpack.i.l.bf16 %v5871_v58 }
 0x302   : > { %1897 = vmatprep.subr.bf16.mxu0 %v1733_v6  ;;  %v1748_v17 = vpack.c.bf16 %v6140_v13, %v6134_v21  ;;  %v8181_v8 = vunpack.i.l.bf16 %v5765_v10  ;;  %v8307_v19 = vunpack.i.h.bf16 %v5757_v47  ;;  %v8309_v21 = vunpack.i.h.bf16 %v5747_v33 }
 0x303   : > { %v1275_v59 = vsel %vm437_vm3, %v4191_v42, %v8305_v43  ;;  %v6174_v54 = vsel %vm487_vm5, %v8306_v34, %v4070_v4  ;;  %v8308_v43 = vunpack.i.l.bf16 %v5747_v33  ;;  %v1278_v34 = vsel %vm437_vm3, %v8180_v5, %v4190_v3  ;;  %v6225_v5 = vpop.permute.xlu0 %4243 }
 0x304   : > { %v6185_v14 = vsel %vm487_vm5, %v8307_v19, %v4071_v40  ;;  %v6201_v13 = vsel %vm487_vm5, %v4071_v40, %v8309_v21  ;;  %v1279_v19 = vsel %vm437_vm3, %v8182_v0, %v4191_v42  ;;  %v4200_v45 = vunpack.i.l.bf16 %v6061_v16  ;;  %v6227_v42 = vpop.permute.xlu1 %4223  ;;  %4518 = vrot.lane.b32.xlu0 %v5599_v22, %s4801_s30  ;;  %4513 = vrot.lane.b32.xlu1 %v5573_v12, %s4803_s19 }
 0x305   : > { %v6195_v6 = vsel %vm487_vm5, %v4070_v4, %v8308_v43  ;;  %v1741_v4 = vpack.c.bf16 %v1275_v59, %v1274_v15  ;;  %v6216_v43 = vsel %vm512_vm6, %v8181_v8, %v4080_v29  ;;  %v8310_v40 = vunpack.i.h.bf16 %v5765_v10  ;;  %1898 = vmatpush1.bf16.msra.mxu0 %v1732_v63  ;;  %8311 = vst [vmem:[#allocation44_spill] sm:$0xff] %v6227_v42 }
 0x306   : > { %v4201_v3 = vunpack.i.h.bf16 %v6061_v16  ;;  %v8312_v15 = vunpack.i.l.bf16 %v5755_v18  ;;  %v4165_v0 = vunpack.i.l.bf16 %v5945_v24  ;;  %v8189_v10 = vunpack.i.l.bf16 %v6227_v42 }
 0x307   : > { %v6222_v21 = vsel %vm512_vm6, %v8310_v40, %v4081_v55  ;;  %v8190_v40 = vunpack.i.h.bf16 %v6227_v42  ;;  %1899 = vmatprep.subr.bf16.mxu0 %v1741_v4  ;;  %v4166_v47 = vunpack.i.h.bf16 %v5945_v24  ;;  %v8313_v8 = vunpack.i.l.bf16 %v5789_v48  ;;  %v6265_v58 = vpop.permute.xlu0 %4283 }
 0x308   : > { %v6233_v59 = vsel %vm512_vm6, %v4080_v29, %v8312_v15  ;;  %v1740_v29 = vpack.c.bf16 %v1279_v19, %v1278_v34  ;;  %v8314_v24 = vunpack.i.h.bf16 %v5789_v48  ;;  %v8315_v63 = vunpack.i.l.bf16 %v5889_v27  ;;  %4523 = vrot.lane.b32.xlu0 %v5579_v9, %s4803_s19  ;;  %4528 = vrot.lane.b32.xlu1 %v5589_v30, %s4804_s20 }
 0x309   : > { %v976_v4 = vsel %vm362_vm0, %v8313_v8, %v8189_v10  ;;  %v6267_v8 = vpop.permute.xlu1 %4228  ;;  %v8316_v48 = vunpack.i.h.bf16 %v5889_v27 }
 0x30a   : > { %v977_v16 = vsel %vm362_vm0, %v8314_v24, %v8190_v40  ;;  %v1370_v34 = vsel %vm462_vm4, %v4200_v45, %v8315_v63  ;;  %1900 = vmatpush1.bf16.msra.mxu0 %v1740_v29  ;;  %v8317_v40 = vunpack.i.l.bf16 %v5839_v25  ;;  %v8318_v29 = vunpack.i.h.bf16 %v5755_v18 }
 0x30b   : > { %v1687_v10 = vpack.c.bf16 %v977_v16, %v976_v4  ;;  %v1371_v24 = vsel %vm462_vm4, %v4201_v3, %v8316_v48  ;;  %1901 = vmatprep.subr.bf16.mxu0 %v1749_v61  ;;  %v8319_v48 = vunpack.i.h.bf16 %v5839_v25  ;;  %v8321_v61 = vunpack.i.h.bf16 %v5879_v41  ;;  %v6315_v4 = vpop.permute.xlu0 %4288 }
 0x30c   : > { %v982_v63 = vsel %vm362_vm0, %v8317_v40, %v4165_v0  ;;  %v6283_v16 = vsel %vm512_vm6, %v4081_v55, %v8318_v29  ;;  %v8320_v40 = vunpack.i.l.bf16 %v5879_v41  ;;  %v4211_v25 = vunpack.i.h.bf16 %v6114_v2  ;;  %4533 = vrot.lane.b32.xlu0 %v5599_v22, %s4804_s20  ;;  %4543 = vrot.lane.b32.xlu1 %v5589_v30, %s4803_s19  ;;  %s3623_s20 = sshll.u32 %s4869_s28, 4 }
 0x30d   : > { %v983_v42 = vsel %vm362_vm0, %v8319_v48, %v4166_v47  ;;  %v1375_v15 = vsel %vm462_vm4, %v8321_v61, %v4201_v3  ;;  %1991 = vmatprep.subr.bf16.mxu1 %v1687_v10  ;;  %v1757_v55 = vpack.c.bf16 %v1371_v24, %v1370_v34  ;;  %v8322_v29 = vunpack.i.l.bf16 %v6265_v58  ;;  %v6317_v10 = vpop.permute.xlu1 %4233  ;;  %s8087_s10 = scalar_lea.hbm %s8136_s7, %s3623_s20 }
 0x30e   : > { %v1374_v19 = vsel %vm462_vm4, %v8320_v40, %v4200_v45  ;;  %v8323_v48 = vunpack.i.h.bf16 %v6265_v58  ;;  %v4210_v40 = vunpack.i.l.bf16 %v6114_v2  ;;  %1902 = vmatpush1.bf16.msra.mxu0 %v1748_v17  ;;  %v8324_v61 = vpack.c.bf16 %v5811_v39, %v5805_v36 }
 0x30f   : > { %v978_v45 = vsel %vm362_vm0, %v4165_v0, %v8322_v29  ;;  %v8325_v24 = vunpack.i.l.bf16 %v6225_v5  ;;  %v8326_v0 = vunpack.i.l.bf16 %v5825_v49  ;;  %v8328_v2 = vunpack.i.h.bf16 %v5825_v49  ;;  %1903 = vmatprep.subr.bf16.mxu0 %v1757_v55 }
 0x310   : > { %v979_v3 = vsel %vm362_vm0, %v4166_v47, %v8323_v48  ;;  %1992 = vmatpush1.bf16.msra.mxu1 %v8324_v61  ;;  %v8327_v47 = vunpack.i.h.bf16 %v6225_v5  ;;  %v4141_v39 = vunpack.i.h.bf16 %v5897_v23  ;;  %v4176_v17 = vunpack.i.h.bf16 %v5976_v28  ;;  %4538 = vrot.lane.b32.xlu0 %v5597_v60, %s4803_s19 }
 0x311   : > { %v1695_v34 = vpack.c.bf16 %v979_v3, %v978_v45  ;;  %v1072_v29 = vsel %vm387_vm1, %v8326_v0, %v8325_v24  ;;  %v1765_v45 = vpack.c.bf16 %v6201_v13, %v6195_v6  ;;  %v1764_v48 = vpack.c.bf16 %v6185_v14, %v6174_v54  ;;  %v6350_v13 = vpop.permute.xlu0 %4293  ;;  %4548 = vrot.lane.b32.xlu1 %v5581_v35, %s4803_s19 }
 0x312   : > { %v1073_v36 = vsel %vm387_vm1, %v8328_v2, %v8327_v47  ;;  %v4140_v3 = vunpack.i.l.bf16 %v5897_v23  ;;  %v4175_v61 = vunpack.i.l.bf16 %v5976_v28  ;;  %v1756_v49 = vpack.c.bf16 %v1375_v15, %v1374_v19  ;;  %v6352_v15 = vpop.permute.xlu1 %4238 }
 0x313   : > { %v1694_v24 = vpack.c.bf16 %v983_v42, %v982_v63  ;;  %v8193_v55 = vunpack.i.h.bf16 %v5887_v50  ;;  %1993 = vmatprep.subr.bf16.mxu1 %v1695_v34  ;;  %v1703_v0 = vpack.c.bf16 %v1073_v36, %v1072_v29  ;;  %v1781_v6 = vpack.c.bf16 %v6283_v16, %v6233_v59 }
 0x314   : > { %v1780_v54 = vpack.c.bf16 %v6222_v21, %v6216_v43  ;;  %v8194_v28 = vunpack.i.l.bf16 %v5887_v50  ;;  %v8200_v14 = vunpack.i.h.bf16 %v5895_v62  ;;  %1904 = vmatpush1.bf16.msra.mxu0 %v1756_v49  ;;  %v1466_v42 = vsel %vm487_vm5, %v4210_v40, %v4140_v3  ;;  %4553 = vrot.lane.b32.xlu0 %v5599_v22, %s4803_s19  ;;  %s326_s19 = sand.u32 1, %s4779_s25  }
 0x315   : > { %1994 = vmatpush1.bf16.msra.mxu1 %v1694_v24  ;;  %v1467_v59 = vsel %vm487_vm5, %v4211_v25, %v4141_v39  ;;  %v8329_v19 = vunpack.i.h.bf16 %v5855_v38  ;;  %v4185_v16 = vunpack.i.l.bf16 %v6008_v44  ;;  %v8196_v34 = vunpack.i.h.bf16 %v6350_v13  ;;  %1905 = vmatprep.subr.bf16.mxu0 %v1765_v45  ;;  %s3473_s21 = scalar_lea.sflag [#allocation4], %s326_s19 }
 0x316   : > { %v8195_v29 = vunpack.i.l.bf16 %v6350_v13  ;;  %1995 = vmatprep.subr.bf16.mxu1 %v1703_v0  ;;  %v8330_v47 = vunpack.i.l.bf16 %v5855_v38  ;;  %v1470_v36 = vsel %vm487_vm5, %v8194_v28, %v4210_v40  ;;  %v4221_v49 = vunpack.i.h.bf16 %v6158_v51  ;;  %4558 = vrot.lane.b32.xlu1 %v5573_v12, %s4805_s22 }
 0x317   : > { %v1079_v63 = vsel %vm387_vm1, %v8329_v19, %v4176_v17  ;;  %v4220_v24 = vunpack.i.l.bf16 %v6158_v51  ;;  %v1471_v38 = vsel %vm487_vm5, %v8193_v55, %v4211_v25  ;;  %v1773_v45 = vpack.c.bf16 %v1467_v59, %v1466_v42  ;;  %v6401_v42 = vpop.permute.xlu0 %4298  ;;  %v6403_v59 = vpop.permute.xlu1 %4248 }
 0x318   : > { %v1078_v2 = vsel %vm387_vm1, %v8330_v47, %v4175_v61  ;;  %v1074_v40 = vsel %vm387_vm1, %v4175_v61, %v8195_v29  ;;  %v1075_v51 = vsel %vm387_vm1, %v4176_v17, %v8196_v34  ;;  %v8197_v0 = vunpack.i.h.bf16 %v5917_v26  ;;  %1906 = vmatpush1.bf16.msra.mxu0 %v1764_v48  ;;  %4563 = vrot.lane.b32.xlu0 %v5579_v9, %s4805_s22 }
 0x319   : > { %v4150_v19 = vunpack.i.l.bf16 %v5917_v26  ;;  %v4186_v47 = vunpack.i.h.bf16 %v6008_v44  ;;  %v8331_v25 = vpack.c.bf16 %v6057_v52, %v6079_v31  ;;  %v1711_v61 = vpack.c.bf16 %v1075_v51, %v1074_v40  ;;  %1907 = vmatprep.subr.bf16.mxu0 %v1773_v45  ;;  %v8333_v40 = vld [vmem:[#allocation34_spill] sm:$0xff] }
 0x31a   : > { %v8332_v55 = vunpack.i.l.bf16 %v5873_v57  ;;  %v8199_v28 = vunpack.i.h.bf16 %v6403_v59  ;;  %v8198_v44 = vunpack.i.l.bf16 %v6403_v59  ;;  %v1710_v48 = vpack.c.bf16 %v1079_v63, %v1078_v2  ;;  %4573 = vrot.lane.b32.xlu1 %v5589_v30, %s4805_s22 }
 0x31b   : > { %1996 = vmatpush1.bf16.msra.mxu1 %v8331_v25  ;;  %v8201_v52 = vunpack.i.l.bf16 %v5895_v62  ;;  %v1772_v31 = vpack.c.bf16 %v1471_v38, %v1470_v36  ;;  %v1563_v45 = vsel %vm512_vm6, %v4221_v49, %v8197_v0  ;;  %v4301_v63 = vunpack.i.h.bf16 %v6401_v42  ;;  %v6446_v0 = vpop.permute.xlu0 %4308 }
 0x31c   : > { %v6409_v17 = vsel %vm412_vm2, %v8332_v55, %v4185_v16  ;;  %v1562_v55 = vsel %vm512_vm6, %v4220_v24, %v4150_v19  ;;  %v4300_v2 = vunpack.i.l.bf16 %v6401_v42  ;;  %1997 = vmatprep.subr.bf16.mxu1 %v1711_v61  ;;  %v8334_v12 = vunpack.i.l.bf16 %v8333_v40  ;;  %4568 = vrot.lane.b32.xlu0 %v5597_v60, %s4805_s22 }
 0x31d   : > { %v8335_v38 = vunpack.i.h.bf16 %v8333_v40  ;;  %v8336_v25 = vunpack.i.h.bf16 %v5873_v57  ;;  %v4236_v61 = vunpack.i.h.bf16 %v6317_v10  ;;  %v4235_v34 = vunpack.i.l.bf16 %v6317_v10  ;;  %1908 = vmatpush1.bf16.msra.mxu0 %v1772_v31 }
 0x31e   : > { %v1168_v36 = vsel %vm412_vm2, %v8334_v12, %v8198_v44  ;;  %v6448_v12 = vpop.permute.xlu1 %4253  ;;  %v8205_v40 = vunpack.i.h.bf16 %v6446_v0  ;;  %1909 = vmatprep.subr.bf16.mxu0 %v1781_v6  ;;  %v1567_v31 = vsel %vm512_vm6, %v8200_v14, %v4221_v49  ;;  %4578 = vrot.lane.b32.xlu1 %v5581_v35, %s4805_s22 }
 0x31f   : > { %v1169_v51 = vsel %vm412_vm2, %v8335_v38, %v8199_v28  ;;  %v1175_v29 = vsel %vm412_vm2, %v8336_v25, %v4186_v47  ;;  %1998 = vmatpush1.bf16.msra.mxu1 %v1710_v48  ;;  %v8204_v38 = vunpack.i.l.bf16 %v6446_v0  ;;  %v4256_v57 = vunpack.i.h.bf16 %v6448_v12  ;;  %v6493_v49 = vpop.permute.xlu0 %4313 }
 0x320   : > { %v1719_v44 = vpack.c.bf16 %v1169_v51, %v1168_v36  ;;  %v4255_v28 = vunpack.i.l.bf16 %v6448_v12  ;;  %v4056_v25 = vunpack.i.h.bf16 %v5771_v56  ;;  %v1566_v48 = vsel %vm512_vm6, %v8201_v52, %v4220_v24  ;;  %4583 = vrot.lane.b32.xlu0 %v5599_v22, %s4805_s22  ;;  %v1822_v22 = vld [vmem:[%s8133_s4 + $0x10] sm:$0xff]  ;;  %s327_s22 = scalar_lea.vmem [#allocation10], %s326_s19 }
 0x321   : > { %v1789_v36 = vpack.c.bf16 %v1563_v45, %v1562_v55  ;;  %v1170_v6 = vsel %vm412_vm2, %v4185_v16, %v8204_v38  ;;  %v1171_v24 = vsel %vm412_vm2, %v4186_v47, %v8205_v40  ;;  %v1656_v9 = vsel %vm537_vm7, %v4235_v34, %v4300_v2  ;;  %1910 = vmatpush1.bf16.msra.mxu0 %v1780_v54  ;;  %s3485_s8 = sshll.u32 %s327_s22, 4  ;;  %s8089_s8 = int_to_ptr.vmem [resolvable:$true] %s3485_s8 }
 0x322   : > { %1999 = vmatprep.subr.bf16.mxu1 %v1719_v44  ;;  %v1657_v30 = vsel %vm537_vm7, %v4236_v61, %v4301_v63  ;;  %v8337_v16 = vpack.c.bf16 %v6049_v46, %v6041_v37  ;;  %v6495_v47 = vpop.permute.xlu1 %4258  ;;  %v1727_v44 = vpack.c.bf16 %v1171_v24, %v1170_v6  ;;  %v8338_v55 = vunpack.i.l.bf16 %v5771_v56  ;;  %v8342_v24 = vld [vmem:[#allocation43_spill] sm:$0xff]  ;;  %s4713_s28 = scalar_lea.vmem %s8089_s8, 16  ;;  %p4720_p8 = scmp.lt.s32.totalorder %s8089_s8, %s4718_s13 }
 0x323   : > { %v1265_v43 = vsel %vm437_vm3, %v4056_v25, %v4256_v57  ;;  %v8340_v37 = vunpack.i.l.bf16 %v5731_v32  ;;  %1911 = vmatprep.subr.bf16.mxu0 %v1789_v36  ;;  %v8341_v54 = vunpack.i.h.bf16 %v5731_v32  ;;  %v1788_v6 = vpack.c.bf16 %v1567_v31, %v1566_v48  ;;  %v1820_v32 = vld [vmem:[%s8133_s4] sm:$0xff]  ;;  %v6535_v48 = vld [vmem:[#allocation5 + $0x1c] ss:$12 sps:$4 sm:$0xff]   ;;  %p4714_p2 = scmp.ne.s32.totalorder %s8089_s8, %s4713_s28  ;;  %p4721_p11 = scmp.lt.s32.totalorder %s4719_s16, %s4713_s28 }
 0x324   : > { %2000 = vmatpush1.bf16.msra.mxu1 %v8337_v16  ;;  %v1264_v45 = vsel %vm437_vm3, %v8338_v55, %v4255_v28  ;;  %v8339_v46 = vmov %v8338_v55  ;;  %v1726_v56 = vpack.c.bf16 %v1175_v29, %v6409_v17  ;;  %v4196_v16 = vunpack.i.h.bf16 %v8342_v24  ;;  %v6531_v29 = vpop.permute.xlu0 %4323  ;;  %v8343_v31 = vld [vmem:[#allocation36_spill] sm:$0xff]  ;;  %1826 = vperm.xlu1 %3946, %v1820_v32  }
 0x325   : > { %v1268_v21 = vsel %vm437_vm3, %v8340_v37, %v8339_v46  ;;  %v1269_v51 = vsel %vm437_vm3, %v8341_v54, %v4056_v25  ;;  %v4195_v55 = vunpack.i.l.bf16 %v8342_v24  ;;  %2001 = vmatprep.subr.bf16.mxu1 %v1727_v44  ;;  %v1797_v36 = vpack.c.bf16 %v1657_v30, %v1656_v9  ;;  %v6527_v25 = vld [vmem:[#allocation5] ss:$12 sps:$4 sm:$0xff]   ;;  %1912 = vmatpush1.bf16.msra.mxu0 %v1788_v6  ;;  %v1821_v24 = vld [vmem:[%s8133_s4 + $0x8] sm:$0xff]  ;;  %p4715_p4 = pnand %p4714_p2, %p8490_p3  ;;  %p4722_p13 = por %p4721_p11, %p4720_p8 }
 0x326   : > { %v1735_v46 = vpack.c.bf16 %v1265_v43, %v1264_v45  ;;  %v4261_v60 = vunpack.i.h.bf16 %v6495_v47  ;;  %v4260_v35 = vunpack.i.l.bf16 %v6495_v47  ;;  %v6533_v17 = vpop.permute.xlu1 %4263  ;;  %v4065_v9 = vunpack.i.l.bf16 %v8343_v31  ;;  %1831 = vperm.xlu0 %3945, %v1821_v24   ;;  %v8381_v47 = vld [vmem:[#allocation39_spill] sm:$0xff] }
 0x327   : > { %v8203_v30 = vunpack.i.h.bf16 %v6531_v29  ;;  %v8202_v44 = vunpack.i.l.bf16 %v6531_v29  ;;  %1934 = vmatprep.subr.bf16.mxu0 %v1797_v36  ;;  %v4066_v45 = vunpack.i.h.bf16 %v8343_v31  ;;  %v1734_v43 = vpack.c.bf16 %v1269_v51, %v1268_v21  ;;  %p4716_p7 = pneg %p4715_p4 }
 0x328   : > { %2002 = vmatpush1.bf16.msra.mxu1 %v1726_v56  ;;  %v8344_v37 = vunpack.i.l.bf16 %v5881_v7  ;;  %v8345_v6 = vunpack.i.h.bf16 %v5881_v7  ;;  %1914 = vmatmul.mubr.bf16.vlgmr.msra.gmra.mrb[16].mxu0 %v6527_v25  ;;  %v6566_v51 = vpop.permute.xlu0 %4328  ;;  %v1360_v32 = vsel %vm462_vm4, %v4065_v9, %v4260_v35  ;;  %v4206_v52 = vunpack.i.h.bf16 %v6116_v1 }
 0x329   : > { %2003 = vmatprep.subr.bf16.mxu1 %v1735_v46  ;;  %v1266_v21 = vsel %vm437_vm3, %v4195_v55, %v8202_v44  ;;  %v1267_v7 = vsel %vm437_vm3, %v4196_v16, %v8203_v30  ;;  %1923 = vmatprep.mubr.bf16.mxu0 %v6535_v48  ;;  %v4205_v44 = vunpack.i.l.bf16 %v6116_v1  ;;  %v8352_v40 = vunpack.i.l.bf16 %v5889_v27  ;;  %p4723_p5 = pnand %p4722_p13, %p4716_p7 }
 0x32a   : > { %v1270_v54 = vsel %vm437_vm3, %v8344_v37, %v4195_v55  ;;  %v1271_v56 = vsel %vm437_vm3, %v8345_v6, %v4196_v16  ;;  %v6568_v36 = vpop.permute.xlu1 %4268  ;;  %v1743_v46 = vpack.c.bf16 %v1267_v7, %v1266_v21  ;;  %v1361_v55 = vsel %vm462_vm4, %v4066_v45, %v4261_v60  ;;  %v8348_v6 = vld [vmem:[#allocation37_spill] sm:$0xff]  ;;  %1836 = vperm.xlu1 %3946, %v1822_v22  }
 0x32b   : > { %v8346_v16 = vunpack.i.l.bf16 %v5739_v53  ;;  %v4076_v21 = vunpack.i.h.bf16 %v8348_v6  ;;  %v4075_v7 = vunpack.i.l.bf16 %v8348_v6  ;;  %v1742_v14 = vpack.c.bf16 %v1271_v56, %v1270_v54 }
 0x32c   : > { %2004 = vmatpush1.bf16.msra.mxu1 %v1734_v43  ;;  %v8347_v43 = vunpack.i.h.bf16 %v5739_v53  ;;  %v1751_v30 = vpack.c.bf16 %v1361_v55, %v1360_v32  ;;  %v1823_v53 = vld [vmem:[%s8133_s4 + $0x18] sm:$0xff]  ;;  %v6598_v24 = vpop.permute.xlu0 %4338  ;;  %v8350_v55 = vunpack.i.h.bf16 %v5747_v33 }
 0x32d   : > { %v1364_v31 = vsel %vm462_vm4, %v8346_v16, %v4065_v9  ;;  %2005 = vmatprep.subr.bf16.mxu1 %v1743_v46  ;;  %v6594_v9 = vld [vmem:[#allocation5 + $0x18] ss:$12 sps:$4 sm:$0xff]   ;;  %v8209_v16 = vunpack.i.l.bf16 %v6533_v17  ;;  %v8207_v56 = vunpack.i.h.bf16 %v6598_v24  ;;  %v8206_v1 = vunpack.i.l.bf16 %v6598_v24  ;;  %1841 = vperm.xlu0 %3945, %v1823_v53  }
 0x32e   : > { %v1365_v37 = vsel %vm462_vm4, %v8347_v43, %v4066_v45  ;;  %v8208_v45 = vunpack.i.h.bf16 %v6533_v17  ;;  %v6600_v54 = vpop.permute.xlu1 %4273  ;;  %v8349_v46 = vunpack.i.l.bf16 %v5747_v33  ;;  %v8351_v43 = vld [vmem:[#allocation38_spill] sm:$0xff] }
 0x32f   : > { %v1750_v22 = vpack.c.bf16 %v1365_v37, %v1364_v31  ;;  %v4086_v6 = vunpack.i.h.bf16 %v8351_v43  ;;  %v4085_v38 = vunpack.i.l.bf16 %v8351_v43  ;;  %v8353_v31 = vunpack.i.h.bf16 %v5889_v27 }
 0x330   : > { %2006 = vmatpush1.bf16.msra.mxu1 %v1742_v14  ;;  %v1460_v32 = vsel %vm487_vm5, %v8349_v46, %v4075_v7  ;;  %v1461_v14 = vsel %vm487_vm5, %v8350_v55, %v4076_v21  ;;  %v1362_v33 = vsel %vm462_vm4, %v4205_v44, %v8206_v1  ;;  %v1363_v53 = vsel %vm462_vm4, %v4206_v52, %v8207_v56  ;;  %v6631_v46 = vpop.permute.xlu0 %4343 }
 0x331   : > { %2007 = vmatprep.subr.bf16.mxu1 %v1751_v30  ;;  %v1366_v30 = vsel %vm462_vm4, %v8352_v40, %v4205_v44  ;;  %v1367_v37 = vsel %vm462_vm4, %v8353_v31, %v4206_v52  ;;  %1924 = vmatmul.mubr.bf16.gmra.mrb[20].mxu0 %v6594_v9  ;;  %v1759_v27 = vpack.c.bf16 %v1363_v53, %v1362_v33  ;;  %v8354_v43 = vmov 0  }
 0x332   : > { %v6633_v40 = vpop.permute.xlu1 %4278  ;;  %v1456_v55 = vsel %vm487_vm5, %v4075_v7, %v8209_v16  ;;  %v1457_v44 = vsel %vm487_vm5, %v4076_v21, %v8208_v45  ;;  %1966 = vmatprep.mubr.bf16.mxu0 %v8354_v43  ;;  %v4216_v52 = vunpack.i.h.bf16 %v6160_v11  ;;  %v1758_v31 = vpack.c.bf16 %v1367_v37, %v1366_v30 }
 0x333   : > { %v8355_v33 = vunpack.i.l.bf16 %v5755_v18  ;;  %v8356_v7 = vunpack.i.h.bf16 %v5755_v18  ;;  %v1767_v21 = vpack.c.bf16 %v1457_v44, %v1456_v55  ;;  %v1766_v56 = vpack.c.bf16 %v1461_v14, %v1460_v32 }
 0x334   : > { %2008 = vmatpush1.bf16.msra.mxu1 %v1750_v22  ;;  %v4215_v22 = vunpack.i.l.bf16 %v6160_v11  ;;  %v8214_v45 = vunpack.i.h.bf16 %v6568_v36  ;;  %v8215_v11 = vunpack.i.l.bf16 %v6568_v36  ;;  %v8212_v30 = vunpack.i.h.bf16 %v6631_v46 }
 0x335   : > { %2009 = vmatprep.subr.bf16.mxu1 %v1759_v27  ;;  %v6650_v53 = vsel %vm512_vm6, %v8355_v33, %v4085_v38  ;;  %v6656_v1 = vsel %vm512_vm6, %v8356_v7, %v4086_v6  ;;  %v8211_v37 = vunpack.i.l.bf16 %v6631_v46  ;;  %v6662_v27 = vpop.permute.xlu0 %4358  ;;  %v1463_v44 = vsel %vm487_vm5, %v4141_v39, %v4216_v52 }
 0x336   : > { %v6664_v33 = vpop.permute.xlu1 %4303  ;;  %v8223_v18 = vunpack.i.h.bf16 %v6662_v27  ;;  %v8222_v7 = vunpack.i.l.bf16 %v6662_v27  ;;  %v1462_v14 = vsel %vm487_vm5, %v4140_v3, %v4215_v22  ;;  %v4315_v16 = vunpack.i.l.bf16 %v6493_v49 }
 0x337   : > { %v8213_v55 = vunpack.i.h.bf16 %v6664_v33  ;;  %v8210_v32 = vunpack.i.l.bf16 %v6664_v33 }
 0x338   : > { %2010 = vmatpush1.bf16.msra.mxu1 %v1758_v31  ;;  %v4316_v31 = vunpack.i.h.bf16 %v6493_v49  ;;  %v1458_v39 = vsel %vm487_vm5, %v4215_v22, %v8222_v7  ;;  %v1459_v3 = vsel %vm487_vm5, %v4216_v52, %v8223_v18  ;;  %v1553_v22 = vsel %vm512_vm6, %v4086_v6, %v8214_v45 }
 0x339   : > { %2011 = vmatprep.subr.bf16.mxu1 %v1767_v21  ;;  %v1660_v21 = vsel %vm537_vm7, %v8210_v32, %v4235_v34  ;;  %v1661_v23 = vsel %vm537_vm7, %v8213_v55, %v4236_v61  ;;  %v6700_v34 = vpop.permute.xlu0 %4363  ;;  %v1775_v32 = vpack.c.bf16 %v1459_v3, %v1458_v39  ;;  %v1552_v61 = vsel %vm512_vm6, %v4085_v38, %v8215_v11 }
 0x33a   : > { %v1796_v49 = vpack.c.bf16 %v1661_v23, %v1660_v21  ;;  %v6702_v10 = vpop.permute.xlu1 %4318  ;;  %v1663_v52 = vsel %vm537_vm7, %v8212_v30, %v4316_v31  ;;  %v4231_v38 = vunpack.i.h.bf16 %v6267_v8  ;;  %v4230_v39 = vunpack.i.l.bf16 %v6267_v8 }
 0x33b   : > { %v4321_v21 = vunpack.i.h.bf16 %v6702_v10  ;;  %v4320_v23 = vunpack.i.l.bf16 %v6702_v10  ;;  %v1774_v6 = vpack.c.bf16 %v1463_v44, %v1462_v14  ;;  %v1783_v3 = vpack.c.bf16 %v1553_v22, %v1552_v61  ;;  %v6752_v61 = vld [vmem:[#allocation5 + $0x8] ss:$12 sps:$4 sm:$0xff]   ;;  %v6863_v10 = vld [vmem:[#allocation5 + $0x4] ss:$12 sps:$4 sm:$0xff]  }
 0x33c   : > { %2012 = vmatpush1.bf16.msra.mxu1 %v1766_v56  ;;  %v1662_v56 = vsel %vm537_vm7, %v8211_v37, %v4315_v16  ;;  %1935 = vmatpush1.bf16.msra.mxu0 %v1796_v49  ;;  %v4276_v22 = vunpack.i.h.bf16 %v6600_v54  ;;  %v4290_v18 = vunpack.i.l.bf16 %v6315_v4 }
 0x33d   : > { %2013 = vmatprep.subr.bf16.mxu1 %v1775_v32  ;;  %v1658_v37 = vsel %vm537_vm7, %v4315_v16, %v4320_v23  ;;  %v1659_v30 = vsel %vm537_vm7, %v4316_v31, %v4321_v21  ;;  %v1804_v55 = vpack.c.bf16 %v1663_v52, %v1662_v56  ;;  %v6732_v45 = vpop.permute.xlu0 %4378  ;;  %v1782_v32 = vpack.c.bf16 %v6656_v1, %v6650_v53 }
 0x33e   : > { %v6734_v11 = vpop.permute.xlu1 %4333  ;;  %v1805_v8 = vpack.c.bf16 %v1659_v30, %v1658_v37  ;;  %v8219_v14 = vunpack.i.h.bf16 %v6732_v45  ;;  %v8218_v16 = vunpack.i.l.bf16 %v6732_v45  ;;  %v1558_v31 = vsel %vm512_vm6, %v4150_v19, %v4230_v39 }
 0x33f   : > { %v8216_v44 = vunpack.i.h.bf16 %v6734_v11  ;;  %v8217_v49 = vunpack.i.l.bf16 %v6734_v11  ;;  %v8357_v30 = vunpack.i.h.bf16 %v5917_v26  ;;  %v4331_v53 = vunpack.i.h.bf16 %v6566_v51 }
 0x340   : > { %2014 = vmatpush1.bf16.msra.mxu1 %v1774_v6  ;;  %v4330_v37 = vunpack.i.l.bf16 %v6566_v51  ;;  %1936 = vmatprep.subr.bf16.mxu0 %v1805_v8  ;;  %v4275_v56 = vunpack.i.l.bf16 %v6600_v54  ;;  %v1554_v26 = vsel %vm512_vm6, %v4230_v39, %v8218_v16  ;;  %v1555_v19 = vsel %vm512_vm6, %v4231_v38, %v8219_v14  ;;  %v8358_v6 = vld [vmem:[#allocation20_spill] sm:$0xff] }
 0x341   : > { %2015 = vmatprep.subr.bf16.mxu1 %v1783_v3  ;;  %v1559_v1 = vsel %vm512_vm6, %v8357_v30, %v4231_v38  ;;  %1937 = vmatpush1.bf16.msra.mxu0 %v1804_v55  ;;  %v6764_v51 = vpop.permute.xlu0 %4383  ;;  %v1791_v3 = vpack.c.bf16 %v1555_v19, %v1554_v26  ;;  %v1649_v55 = vsel %vm537_vm7, %v4331_v53, %v8216_v44  ;;  %v4241_v39 = vunpack.i.h.bf16 %v6352_v15  ;;  %v8359_v26 = vld [vmem:[#allocation21_spill] sm:$0xff] }
 0x342   : > { %v4349_v52 = vpop.permute.xlu1 %4348  ;;  %2093 = vmatprep.subr.bf16.mxu0 %v8358_v6  ;;  %v1648_v54 = vsel %vm537_vm7, %v4330_v37, %v8217_v49  ;;  %v4240_v38 = vunpack.i.l.bf16 %v6352_v15  ;;  %v1652_v8 = vsel %vm537_vm7, %v4300_v2, %v4330_v37  ;;  %v1790_v30 = vpack.c.bf16 %v1559_v1, %v1558_v31  ;;  %v8360_v31 = vld [vmem:[#allocation22_spill] sm:$0xff]  ;;  %v8361_v37 = vld [vmem:[#allocation44_spill] sm:$0xff] }
 0x343   : > { %v1799_v19 = vpack.c.bf16 %v1649_v55, %v1648_v54  ;;  %v969_v42 = vsel %vm362_vm0, %v4276_v22, %v4241_v39  ;;  %v8363_v55 = vunpack.i.h.bf16 %v8361_v37  ;;  %v6812_v49 = vld [vmem:[#allocation5 + $0x20] ss:$12 sps:$4 sm:$0xff]   ;;  %v4350_v16 = vunpack.i.l.bf16 %v4349_v52 }
 0x344   : > { %2016 = vmatpush1.bf16.msra.mxu1 %v1782_v32  ;;  %v1653_v32 = vsel %vm537_vm7, %v4301_v63, %v4331_v53  ;;  %3615 = vmatmul.mubr.msk.bf16.vlgmr.msra.gmra.mrb[16].mxu0 %vm1874_vm10, %v6752_v61  ;;  %v968_v6 = vsel %vm362_vm0, %v4275_v56, %v4240_v38 }
 0x345   : > { %2017 = vmatprep.subr.bf16.mxu1 %v1791_v3  ;;  %2094 = vmatpush1.bf16.msra.mxu0 %v8359_v26  ;;  %v6797_v63 = vpop.permute.xlu0 %4398  ;;  %v8362_v3 = vunpack.i.l.bf16 %v8361_v37  ;;  %v1798_v26 = vpack.c.bf16 %v1653_v32, %v1652_v8  ;;  %v1689_v44 = vpack.c.bf16 %v969_v42, %v968_v6  ;;  %v8366_v8 = vld [vmem:[#allocation23_spill] sm:$0xff] }
 0x346   : > { %1976 = vmatprep.mubr.bf16.mxu0 %v8354_v43  ;;  %v6799_v2 = vpop.permute.xlu1 %4353  ;;  %2095 = vmatprep.subr.bf16.mxu0 %v8360_v31  ;;  %v4351_v31 = vunpack.i.h.bf16 %v4349_v52  ;;  %v4385_v52 = vunpack.i.l.bf16 %v6764_v51 }
 0x347   : > { %v4356_v1 = vunpack.i.h.bf16 %v6799_v2  ;;  %v4355_v53 = vunpack.i.l.bf16 %v6799_v2  ;;  %v972_v54 = vsel %vm362_vm0, %v8362_v3, %v4275_v56  ;;  %v8365_v56 = vunpack.i.l.bf16 %v6225_v5 }
 0x348   : > { %2018 = vmatpush1.bf16.msra.mxu1 %v1790_v30  ;;  %v973_v30 = vsel %vm362_vm0, %v8363_v55, %v4276_v22  ;;  %v8375_v2 = vunpack.i.l.bf16 %v6265_v58 }
 0x349   : > { %2040 = vmatprep.subr.bf16.mxu1 %v1799_v19  ;;  %v8364_v19 = vunpack.i.h.bf16 %v6225_v5  ;;  %v6828_v22 = vsel %vm387_vm1, %v8365_v56, %v4355_v53  ;;  %2096 = vmatpush1.bf16.msra.mxu0 %v8366_v8  ;;  %v6834_v32 = vpop.permute.xlu0 %4413  ;;  %v1688_v42 = vpack.c.bf16 %v973_v30, %v972_v54  ;;  %v8374_v8 = vld [vmem:[#allocation26_spill] sm:$0xff] }
 0x34a   : > { %v6836_v6 = vpop.permute.xlu1 %4368  ;;  %2097 = vmatprep.subr.bf16.mxu0 %v1689_v44  ;;  %v8221_v5 = vunpack.i.h.bf16 %v6834_v32  ;;  %v8220_v37 = vunpack.i.l.bf16 %v6834_v32  ;;  %v1655_v44 = vsel %vm537_vm7, %v4321_v21, %v4351_v31 }
 0x34b   : > { %v6820_v14 = vsel %vm387_vm1, %v8364_v19, %v4356_v1  ;;  %2020 = vmatmul.mubr.bf16.vlgmr.msra.gmra.mrb[16].mxu1 %v6527_v25  ;;  %v1654_v25 = vsel %vm537_vm7, %v4320_v23, %v4350_v16  ;;  %v8368_v19 = vunpack.i.h.bf16 %v6403_v59 }
 0x34c   : > { %2041 = vmatpush1.bf16.msra.mxu1 %v1798_v26  ;;  %2029 = vmatprep.mubr.bf16.mxu1 %v6535_v48  ;;  %v1650_v3 = vsel %vm537_vm7, %v4350_v16, %v8220_v37  ;;  %v1651_v48 = vsel %vm537_vm7, %v4351_v31, %v8221_v5  ;;  %v1806_v26 = vpack.c.bf16 %v1655_v44, %v1654_v25  ;;  %v8367_v16 = vunpack.i.l.bf16 %v6403_v59  ;;  %v8370_v37 = vld [vmem:[#allocation28_spill] sm:$0xff] }
 0x34d   : > { %3616 = vmatmul.mubr.msk.bf16.gmra.mrb[20].mxu0 %vm1874_vm10, %v6812_v49  ;;  %v6859_v54 = vpop.permute.xlu0 %4418  ;;  %v1807_v23 = vpack.c.bf16 %v1651_v48, %v1650_v3  ;;  %v4281_v44 = vunpack.i.h.bf16 %v6633_v40  ;;  %v4280_v59 = vunpack.i.l.bf16 %v6633_v40  ;;  %v8369_v3 = vld [vmem:[#allocation24_spill] sm:$0xff]  ;;  %v8371_v5 = vunpack.i.l.bf16 %v8370_v37 }
 0x34e   : > { %2098 = vmatpush1.bf16.msra.mxu0 %v1688_v42  ;;  %v6861_v55 = vpop.permute.xlu1 %4373  ;;  %2125 = vmatprep.mubr.bf16.mxu0 %v6863_v10 }
 0x34f   : > { %v8226_v21 = vunpack.i.h.bf16 %v6861_v55  ;;  %v8227_v30 = vunpack.i.l.bf16 %v6861_v55  ;;  %2042 = vmatprep.subr.bf16.mxu1 %v1807_v23  ;;  %v992_v7 = vsel %vm362_vm0, %v4280_v59, %v8371_v5 }
 0x350   : > { %2043 = vmatpush1.bf16.msra.mxu1 %v1806_v26  ;;  %v965_v26 = vsel %vm362_vm0, %v4241_v39, %v4281_v44  ;;  %v4291_v39 = vunpack.i.h.bf16 %v6315_v4  ;;  %v4371_v4 = vunpack.i.h.bf16 %v6836_v6 }
 0x351   : > { %v6874_v31 = vsel %vm412_vm2, %v8367_v16, %v8227_v30  ;;  %v6882_v56 = vsel %vm412_vm2, %v8368_v19, %v8226_v21  ;;  %v6887_v42 = vpop.permute.xlu0 %4423  ;;  %2199 = vmatprep.subr.bf16.mxu1 %v8369_v3  ;;  %v4366_v19 = vunpack.i.h.bf16 %v6700_v34  ;;  %v4365_v3 = vunpack.i.l.bf16 %v6700_v34 }
 0x352   : > { %v6889_v25 = vpop.permute.xlu1 %4388  ;;  %v4370_v30 = vunpack.i.l.bf16 %v6836_v6 }
 0x353   : > { %2030 = vmatmul.mubr.bf16.gmra.mrb[20].mxu1 %v6594_v9  ;;  %v964_v9 = vsel %vm362_vm0, %v4240_v38, %v4280_v59  ;;  %v8372_v38 = vunpack.i.h.bf16 %v8370_v37  ;;  %v1064_v12 = vsel %vm387_vm1, %v4355_v53, %v4365_v3 }
 0x354   : > { %2072 = vmatprep.mubr.bf16.mxu1 %v8354_v43 }
 0x355   : > { %v6895_v48 = vpop.permute.xlu0 %4428  ;;  %v993_v15 = vsel %vm362_vm0, %v4281_v44, %v8372_v38  ;;  %v8373_v44 = vld [vmem:[#allocation25_spill] sm:$0xff]  ;;  %v1690_v38 = vpack.c.bf16 %v965_v26, %v964_v9 }
 0x356   : > { %v6897_v23 = vpop.permute.xlu1 %4393 }
 0x357   : > { %v8224_v16 = vunpack.i.h.bf16 %v6897_v23  ;;  %v8225_v40 = vunpack.i.l.bf16 %v6897_v23 }
 0x359   : > { %v6927_v34 = vsel %vm437_vm3, %v4255_v28, %v8225_v40  ;;  %v6935_v5 = vsel %vm437_vm3, %v4256_v57, %v8224_v16  ;;  %v4434_v28 = vpop.permute.xlu0 %4433  ;;  %v1065_v57 = vsel %vm387_vm1, %v4356_v1, %v4366_v19  ;;  %v1691_v16 = vpack.c.bf16 %v993_v15, %v992_v7  ;;  %v8377_v15 = vld [vmem:[#allocation27_spill] sm:$0xff] }
 0x35a   : > { %v6943_v59 = vpop.permute.xlu1 %4403  ;;  %v4436_v37 = vunpack.i.h.bf16 %v4434_v28  ;;  %v4386_v40 = vunpack.i.h.bf16 %v6764_v51  ;;  %v1705_v9 = vpack.c.bf16 %v1065_v57, %v1064_v12  ;;  %v6970_v51 = vsel %vm387_vm1, %v4366_v19, %v4371_v4 }
 0x35b   : > { %3617 = vmatmul.mubr.msk.bf16.vlgmr.msra.gmra.mrb[16].mxu1 %vm1874_vm10, %v6752_v61  ;;  %v6983_v57 = vsel %vm387_vm1, %v4365_v3, %v4370_v30 }
 0x35c   : > { %2200 = vmatpush1.bf16.msra.mxu1 %v8373_v44  ;;  %2082 = vmatprep.mubr.bf16.mxu1 %v8354_v43  ;;  %v4435_v44 = vunpack.i.l.bf16 %v4434_v28 }
 0x35d   : > { %2201 = vmatprep.subr.bf16.mxu1 %v8374_v8  ;;  %v8376_v8 = vunpack.i.h.bf16 %v6265_v58  ;;  %v4439_v6 = vpop.permute.xlu0 %4438  ;;  %v971_v58 = vsel %vm362_vm0, %v4436_v37, %v4291_v39 }
 0x35e   : > { %v974_v1 = vsel %vm362_vm0, %v8375_v2, %v4435_v44  ;;  %v6973_v28 = vpop.permute.xlu1 %4408  ;;  %v970_v53 = vsel %vm362_vm0, %v4435_v44, %v4290_v18  ;;  %v4441_v2 = vunpack.i.h.bf16 %v4439_v6 }
 0x35f   : > { %v975_v7 = vsel %vm362_vm0, %v8376_v8, %v4436_v37  ;;  %v4440_v8 = vunpack.i.l.bf16 %v4439_v6  ;;  %v8228_v12 = vunpack.i.h.bf16 %v6973_v28  ;;  %v8229_v19 = vunpack.i.l.bf16 %v6973_v28 }
 0x360   : > { %v1696_v26 = vpack.c.bf16 %v975_v7, %v974_v1  ;;  %2202 = vmatpush1.bf16.msra.mxu1 %v8377_v15  ;;  %v1697_v1 = vpack.c.bf16 %v971_v58, %v970_v53  ;;  %v8378_v7 = vld [vmem:[#allocation29_spill] sm:$0xff]  ;;  %v967_v6 = vsel %vm362_vm0, %v4291_v39, %v4441_v2  ;;  %v8382_v53 = vunpack.i.l.bf16 %v8381_v47 }
 0x361   : > { %2203 = vmatprep.subr.bf16.mxu1 %v1691_v16  ;;  %v8379_v15 = vunpack.i.l.bf16 %v8378_v7  ;;  %v8380_v21 = vunpack.i.h.bf16 %v8378_v7  ;;  %v966_v37 = vsel %vm362_vm0, %v4290_v18, %v4440_v8  ;;  %v7003_v3 = vsel %vm462_vm4, %v4260_v35, %v8229_v19  ;;  %v7019_v35 = vpop.permute.xlu0 %4443 }
 0x362   : > { %v4421_v18 = vunpack.i.h.bf16 %v6859_v54  ;;  %2099 = vmatprep.subr.bf16.mxu0 %v1697_v1  ;;  %v4420_v58 = vunpack.i.l.bf16 %v6859_v54  ;;  %v4390_v7 = vunpack.i.l.bf16 %v6889_v25  ;;  %v1698_v39 = vpack.c.bf16 %v967_v6, %v966_v37 }
 0x363   : > { %v1088_v44 = vsel %vm387_vm1, %v4370_v30, %v8379_v15  ;;  %v1089_v16 = vsel %vm387_vm1, %v4371_v4, %v8380_v21  ;;  %v7011_v21 = vsel %vm462_vm4, %v4261_v60, %v8228_v12  ;;  %3618 = vmatmul.mubr.msk.bf16.gmra.mrb[20].mxu1 %vm1874_vm10, %v6812_v49  ;;  %v4391_v30 = vunpack.i.h.bf16 %v6889_v25  ;;  %v4449_v4 = vpop.permute.xlu1 %4448  ;;  %2100 = vmatpush1.bf16.msra.mxu0 %v1696_v26 }
 0x364   : > { %2204 = vmatpush1.bf16.msra.mxu1 %v1690_v38  ;;  %v994_v60 = vsel %vm362_vm0, %v4440_v8, %v8382_v53  ;;  %v4451_v15 = vunpack.i.h.bf16 %v4449_v4  ;;  %v4450_v12 = vunpack.i.l.bf16 %v4449_v4  ;;  %2231 = vmatprep.mubr.bf16.mxu1 %v6863_v10  ;;  %v8383_v38 = vunpack.i.h.bf16 %v8381_v47 }
 0x365   : > { %2101 = vmatprep.subr.bf16.mxu0 %v1705_v9  ;;  %v8384_v19 = vunpack.i.l.bf16 %v6861_v55  ;;  %v8385_v54 = vunpack.i.h.bf16 %v6861_v55  ;;  %v8386_v26 = vunpack.i.h.bf16 %v6350_v13  ;;  %v8387_v9 = vunpack.i.l.bf16 %v6350_v13  ;;  %v4454_v4 = vpop.permute.xlu0 %4453 }
 0x366   : > { %v995_v1 = vsel %vm362_vm0, %v4441_v2, %v8383_v38  ;;  %v1066_v6 = vsel %vm387_vm1, %v4450_v12, %v4420_v58  ;;  %v1706_v55 = vpack.c.bf16 %v6970_v51, %v6983_v57  ;;  %v1707_v53 = vpack.c.bf16 %v1089_v16, %v1088_v44 }
 0x367   : > { %v1160_v8 = vsel %vm412_vm2, %v8384_v19, %v4385_v52  ;;  %v1161_v25 = vsel %vm412_vm2, %v8385_v54, %v4386_v40  ;;  %v1071_v10 = vsel %vm387_vm1, %v8386_v26, %v4451_v15  ;;  %v1070_v2 = vsel %vm387_vm1, %v8387_v9, %v4450_v12  ;;  %v7056_v47 = vpop.permute.xlu1 %4463  ;;  %v8389_v54 = vld [vmem:[#allocation30_spill] sm:$0xff] }
 0x368   : > { %v1699_v37 = vpack.c.bf16 %v995_v1, %v994_v60  ;;  %v7054_v19 = vsel %vm412_vm2, %v4386_v40, %v4391_v30  ;;  %v1067_v13 = vsel %vm387_vm1, %v4451_v15, %v4421_v18  ;;  %v7062_v60 = vsel %vm412_vm2, %v4385_v52, %v4390_v7 }
 0x369   : > { %v1712_v38 = vpack.c.bf16 %v1071_v10, %v1070_v2  ;;  %v8388_v51 = vpack.c.bf16 %v6820_v14, %v6828_v22  ;;  %v4456_v12 = vunpack.i.h.bf16 %v4454_v4  ;;  %v4455_v40 = vunpack.i.l.bf16 %v4454_v4  ;;  %v8392_v10 = vld [vmem:[#allocation40_spill] sm:$0xff] }
 0x36a   : > { %2205 = vmatprep.subr.bf16.mxu1 %v1699_v37  ;;  %v1713_v57 = vpack.c.bf16 %v1067_v13, %v1066_v6  ;;  %v1721_v1 = vpack.c.bf16 %v1161_v25, %v1160_v8  ;;  %v8390_v44 = vunpack.i.l.bf16 %v8389_v54  ;;  %v8391_v15 = vunpack.i.h.bf16 %v8389_v54  ;;  %v7084_v25 = vpop.permute.xlu0 %4458 }
 0x36b   : > { %2102 = vmatpush1.bf16.msra.mxu0 %v8388_v51  ;;  %2206 = vmatpush1.bf16.msra.mxu1 %v1698_v39  ;;  %v4426_v26 = vunpack.i.h.bf16 %v6887_v42  ;;  %v4425_v14 = vunpack.i.l.bf16 %v6887_v42  ;;  %v1062_v22 = vsel %vm387_vm1, %v4420_v58, %v4455_v40  ;;  %v1063_v39 = vsel %vm387_vm1, %v4421_v18, %v4456_v12 }
 0x36c   : > { %v1184_v16 = vsel %vm412_vm2, %v4390_v7, %v8390_v44  ;;  %v1185_v52 = vsel %vm412_vm2, %v4391_v30, %v8391_v15  ;;  %2207 = vmatprep.subr.bf16.mxu1 %v1707_v53  ;;  %v1722_v8 = vpack.c.bf16 %v7054_v19, %v7062_v60  ;;  %v4406_v7 = vunpack.i.h.bf16 %v6943_v59  ;;  %2103 = vmatprep.subr.bf16.mxu0 %v1713_v57  ;;  %v4469_v30 = vpop.permute.xlu1 %4468 }
 0x36d   : > { %v8393_v9 = vunpack.i.l.bf16 %v8392_v10  ;;  %v8394_v58 = vunpack.i.h.bf16 %v8392_v10  ;;  %v4405_v2 = vunpack.i.l.bf16 %v6943_v59  ;;  %v4471_v37 = vunpack.i.h.bf16 %v4469_v30 }
 0x36e   : > { %v4470_v6 = vunpack.i.l.bf16 %v4469_v30  ;;  %v1723_v19 = vpack.c.bf16 %v1185_v52, %v1184_v16  ;;  %v4446_v4 = vunpack.i.h.bf16 %v7019_v35  ;;  %v4445_v53 = vunpack.i.l.bf16 %v7019_v35  ;;  %v4479_v54 = vpop.permute.xlu0 %4478 }
 0x36f   : > { %v1090_v42 = vsel %vm387_vm1, %v4455_v40, %v8393_v9  ;;  %v1091_v18 = vsel %vm387_vm1, %v4456_v12, %v8394_v58  ;;  %2104 = vmatpush1.bf16.msra.mxu0 %v1712_v38  ;;  %v1714_v13 = vpack.c.bf16 %v1063_v39, %v1062_v22  ;;  %2208 = vmatpush1.bf16.msra.mxu1 %v1706_v55  ;;  %v8395_v51 = vunpack.i.h.bf16 %v6446_v0 }
 0x370   : > { %2105 = vmatprep.subr.bf16.mxu0 %v1721_v1  ;;  %v1715_v60 = vpack.c.bf16 %v1091_v18, %v1090_v42  ;;  %v8396_v12 = vunpack.i.l.bf16 %v6446_v0  ;;  %v1162_v38 = vsel %vm412_vm2, %v4470_v6, %v4425_v14  ;;  %v1163_v57 = vsel %vm412_vm2, %v4471_v37, %v4426_v26  ;;  %v7115_v44 = vpop.permute.xlu1 %4473 }
 0x371   : > { %v1167_v40 = vsel %vm412_vm2, %v8395_v51, %v4471_v37  ;;  %v8397_v55 = vunpack.i.h.bf16 %v6797_v63  ;;  %v1729_v0 = vpack.c.bf16 %v1163_v57, %v1162_v38  ;;  %v8398_v16 = vunpack.i.l.bf16 %v6797_v63  ;;  %v8409_v38 = vld [vmem:[#allocation41_spill] sm:$0xff] }
 0x372   : > { %v1166_v59 = vsel %vm412_vm2, %v8396_v12, %v4470_v6  ;;  %2209 = vmatprep.subr.bf16.mxu1 %v1715_v60  ;;  %v8399_v15 = vunpack.i.l.bf16 %v6897_v23  ;;  %v8401_v39 = vunpack.i.h.bf16 %v6897_v23  ;;  %v8403_v58 = vpack.c.bf16 %v6882_v56, %v6874_v31  ;;  %v8404_v60 = vld [vmem:[#allocation31_spill] sm:$0xff] }
 0x373   : > { %v7113_v1 = vsel %vm437_vm3, %v8397_v55, %v4406_v7  ;;  %v8400_v22 = vmov %v8397_v55  ;;  %v8402_v10 = vmov %v8398_v16  ;;  %v1728_v42 = vpack.c.bf16 %v1167_v40, %v1166_v59  ;;  %2210 = vmatpush1.bf16.msra.mxu1 %v1714_v13  ;;  %v7166_v59 = vpop.permute.xlu0 %4483 }
 0x374   : > { %v1256_v52 = vsel %vm437_vm3, %v8399_v15, %v8398_v16  ;;  %v1257_v30 = vsel %vm437_vm3, %v8401_v39, %v8400_v22  ;;  %v7133_v9 = vsel %vm437_vm3, %v8402_v10, %v4405_v2  ;;  %2106 = vmatpush1.bf16.msra.mxu0 %v8403_v58  ;;  %v4481_v18 = vunpack.i.h.bf16 %v4479_v54  ;;  %2211 = vmatprep.subr.bf16.mxu1 %v1723_v19 }
 0x375   : > { %v4480_v37 = vunpack.i.l.bf16 %v4479_v54  ;;  %v4431_v6 = vunpack.i.h.bf16 %v6895_v48  ;;  %v4430_v23 = vunpack.i.l.bf16 %v6895_v48  ;;  %2107 = vmatprep.subr.bf16.mxu0 %v1729_v0  ;;  %v8405_v51 = vunpack.i.l.bf16 %v8404_v60 }
 0x376   : > { %v8406_v12 = vunpack.i.h.bf16 %v8404_v60  ;;  %v1159_v56 = vsel %vm412_vm2, %v4426_v26, %v4481_v18  ;;  %v8407_v48 = vunpack.i.l.bf16 %v6973_v28  ;;  %v4489_v26 = vpop.permute.xlu1 %4488  ;;  %v1737_v19 = vpack.c.bf16 %v1257_v30, %v1256_v52 }
 0x377   : > { %v1280_v63 = vsel %vm437_vm3, %v4405_v2, %v8405_v51  ;;  %v1158_v31 = vsel %vm412_vm2, %v4425_v14, %v4480_v37  ;;  %v8408_v2 = vunpack.i.h.bf16 %v6973_v28  ;;  %v1738_v14 = vpack.c.bf16 %v7113_v1, %v7133_v9  ;;  %2212 = vmatpush1.bf16.msra.mxu1 %v1722_v8  ;;  %v4494_v51 = vpop.permute.xlu0 %4493 }
 0x378   : > { %v1281_v40 = vsel %vm437_vm3, %v4406_v7, %v8406_v12  ;;  %v1352_v13 = vsel %vm462_vm4, %v8407_v48, %v4445_v53  ;;  %v8410_v57 = vunpack.i.l.bf16 %v8409_v38  ;;  %v8411_v54 = vunpack.i.h.bf16 %v8409_v38  ;;  %2108 = vmatpush1.bf16.msra.mxu0 %v1728_v42 }
 0x379   : > { %v1353_v7 = vsel %vm462_vm4, %v8408_v2, %v4446_v4  ;;  %v4466_v0 = vunpack.i.h.bf16 %v7056_v47  ;;  %v4491_v16 = vunpack.i.h.bf16 %v4489_v26  ;;  %v4490_v15 = vunpack.i.l.bf16 %v4489_v26  ;;  %2109 = vmatprep.subr.bf16.mxu0 %v1737_v19 }
 0x37a   : > { %v1186_v55 = vsel %vm412_vm2, %v4480_v37, %v8410_v57  ;;  %v1187_v28 = vsel %vm412_vm2, %v4481_v18, %v8411_v54  ;;  %v1739_v1 = vpack.c.bf16 %v1281_v40, %v1280_v63  ;;  %v4465_v22 = vunpack.i.l.bf16 %v7056_v47  ;;  %v7193_v63 = vpop.permute.xlu1 %4503 }
 0x37b   : > { %v1730_v39 = vpack.c.bf16 %v1159_v56, %v1158_v31  ;;  %v1731_v52 = vpack.c.bf16 %v1187_v28, %v1186_v55  ;;  %v1753_v30 = vpack.c.bf16 %v1353_v7, %v1352_v13  ;;  %v8412_v10 = vunpack.i.h.bf16 %v6531_v29  ;;  %v7237_v38 = vpop.permute.xlu0 %4498  ;;  %v8420_v55 = vld [vmem:[#allocation42_spill] sm:$0xff] }
 0x37c   : > { %v8413_v58 = vunpack.i.l.bf16 %v6531_v29  ;;  %v1258_v18 = vsel %vm437_vm3, %v4490_v15, %v4430_v23  ;;  %v1259_v47 = vsel %vm437_vm3, %v4491_v16, %v4431_v6  ;;  %v4476_v8 = vunpack.i.h.bf16 %v7115_v44 }
 0x37d   : > { %v1263_v9 = vsel %vm437_vm3, %v8412_v10, %v4491_v16  ;;  %v4475_v37 = vunpack.i.l.bf16 %v7115_v44  ;;  %v4486_v60 = vunpack.i.h.bf16 %v7166_v59  ;;  %2213 = vmatprep.subr.bf16.mxu1 %v1731_v52  ;;  %v1745_v29 = vpack.c.bf16 %v1259_v47, %v1258_v18 }
 0x37e   : > { %v1262_v42 = vsel %vm437_vm3, %v8413_v58, %v4490_v15  ;;  %v4485_v12 = vunpack.i.l.bf16 %v7166_v59  ;;  %v8414_v31 = vpack.c.bf16 %v6935_v5, %v6927_v34  ;;  %v4496_v56 = vunpack.i.h.bf16 %v4494_v51  ;;  %2214 = vmatpush1.bf16.msra.mxu1 %v1730_v39  ;;  %v4509_v57 = vpop.permute.xlu1 %4508 }
 0x37f   : > { %v1744_v40 = vpack.c.bf16 %v1263_v9, %v1262_v42  ;;  %v4495_v48 = vunpack.i.l.bf16 %v4494_v51  ;;  %v7203_v44 = vsel %vm462_vm4, %v4446_v4, %v4466_v0  ;;  %v7209_v13 = vsel %vm462_vm4, %v4445_v53, %v4465_v22  ;;  %2215 = vmatprep.subr.bf16.mxu1 %v1739_v1  ;;  %v8415_v4 = vld [vmem:[#allocation32_spill] sm:$0xff]  ;;  %v4519_v51 = vpop.permute.xlu0 %4518 }
 0x380   : > { %2110 = vmatpush1.bf16.msra.mxu0 %v8414_v31  ;;  %v4461_v2 = vunpack.i.h.bf16 %v7084_v25  ;;  %v4460_v7 = vunpack.i.l.bf16 %v7084_v25  ;;  %v1255_v5 = vsel %vm437_vm3, %v4431_v6, %v4496_v56  ;;  %v8416_v59 = vunpack.i.l.bf16 %v8415_v4 }
 0x381   : > { %2111 = vmatprep.subr.bf16.mxu0 %v1745_v29  ;;  %v1254_v34 = vsel %vm437_vm3, %v4430_v23, %v4495_v48  ;;  %v8417_v53 = vunpack.i.h.bf16 %v8415_v4  ;;  %v8418_v25 = vunpack.i.l.bf16 %v6533_v17  ;;  %v8419_v23 = vunpack.i.h.bf16 %v6533_v17 }
 0x382   : > { %v1376_v35 = vsel %vm462_vm4, %v4465_v22, %v8416_v59  ;;  %v8421_v54 = vunpack.i.l.bf16 %v8420_v55  ;;  %v4511_v15 = vunpack.i.h.bf16 %v4509_v57  ;;  %v4510_v17 = vunpack.i.l.bf16 %v4509_v57  ;;  %2216 = vmatpush1.bf16.msra.mxu1 %v1738_v14  ;;  %v8426_v59 = vld [vmem:[#allocation33_spill] sm:$0xff] }
 0x383   : > { %v1377_v26 = vsel %vm462_vm4, %v4466_v0, %v8417_v53  ;;  %v7229_v19 = vsel %vm487_vm5, %v8418_v25, %v4475_v37  ;;  %v7235_v6 = vsel %vm487_vm5, %v8419_v23, %v4476_v8  ;;  %v8422_v0 = vunpack.i.h.bf16 %v8420_v55 }
 0x384   : > { %v1282_v28 = vsel %vm437_vm3, %v4495_v48, %v8421_v54  ;;  %2112 = vmatpush1.bf16.msra.mxu0 %v1744_v40  ;;  %v1448_v1 = vsel %vm487_vm5, %v4475_v37, %v4485_v12  ;;  %v1449_v22 = vsel %vm487_vm5, %v4476_v8, %v4486_v60  ;;  %v1746_v39 = vpack.c.bf16 %v1255_v5, %v1254_v34 }
 0x385   : > { %v1283_v16 = vsel %vm437_vm3, %v4496_v56, %v8422_v0  ;;  %v4506_v52 = vunpack.i.h.bf16 %v7193_v63  ;;  %v4505_v10 = vunpack.i.l.bf16 %v7193_v63  ;;  %2113 = vmatprep.subr.bf16.mxu0 %v1753_v30  ;;  %v8423_v58 = vunpack.i.h.bf16 %v6598_v24  ;;  %v4514_v63 = vpop.permute.xlu1 %4513 }
 0x386   : > { %v1747_v9 = vpack.c.bf16 %v1283_v16, %v1282_v28  ;;  %v8424_v18 = vunpack.i.l.bf16 %v6598_v24  ;;  %v1354_v8 = vsel %vm462_vm4, %v4510_v17, %v4460_v7  ;;  %v1355_v37 = vsel %vm462_vm4, %v4511_v15, %v4461_v2 }
 0x387   : > { %v1359_v42 = vsel %vm462_vm4, %v8423_v58, %v4511_v15  ;;  %v1754_v14 = vpack.c.bf16 %v7203_v44, %v7209_v13  ;;  %v1768_v30 = vpack.c.bf16 %v7235_v6, %v7229_v19  ;;  %v1755_v29 = vpack.c.bf16 %v1377_v26, %v1376_v35  ;;  %v4524_v19 = vpop.permute.xlu0 %4523 }
 0x388   : > { %v1358_v47 = vsel %vm462_vm4, %v8424_v18, %v4510_v17  ;;  %2217 = vmatprep.subr.bf16.mxu1 %v1747_v9  ;;  %v1761_v24 = vpack.c.bf16 %v1355_v37, %v1354_v8  ;;  %v8425_v31 = vpack.c.bf16 %v7011_v21, %v7003_v3  ;;  %v4521_v56 = vunpack.i.h.bf16 %v4519_v51 }
 0x389   : > { %v1760_v40 = vpack.c.bf16 %v1359_v42, %v1358_v47  ;;  %v4520_v48 = vunpack.i.l.bf16 %v4519_v51  ;;  %v1769_v34 = vpack.c.bf16 %v1449_v22, %v1448_v1  ;;  %v7274_v5 = vsel %vm487_vm5, %v4486_v60, %v4506_v52  ;;  %2218 = vmatpush1.bf16.msra.mxu1 %v1746_v39  ;;  %v4529_v23 = vpop.permute.xlu1 %4528 }
 0x38a   : > { %2114 = vmatpush1.bf16.msra.mxu0 %v8425_v31  ;;  %v7278_v44 = vsel %vm487_vm5, %v4485_v12, %v4505_v10  ;;  %v4501_v13 = vunpack.i.h.bf16 %v7237_v38  ;;  %v4500_v4 = vunpack.i.l.bf16 %v7237_v38  ;;  %v1351_v21 = vsel %vm462_vm4, %v4461_v2, %v4521_v56  ;;  %2219 = vmatprep.subr.bf16.mxu1 %v1755_v29 }
 0x38b   : > { %2115 = vmatprep.subr.bf16.mxu0 %v1761_v24  ;;  %v1350_v3 = vsel %vm462_vm4, %v4460_v7, %v4520_v48  ;;  %v8427_v60 = vunpack.i.l.bf16 %v8426_v59  ;;  %v8428_v12 = vunpack.i.h.bf16 %v8426_v59  ;;  %v4516_v26 = vunpack.i.h.bf16 %v4514_v63  ;;  %v4534_v18 = vpop.permute.xlu0 %4533 }
 0x38c   : > { %v4515_v25 = vunpack.i.l.bf16 %v4514_v63  ;;  %v8429_v7 = vunpack.i.l.bf16 %v5879_v41  ;;  %v8430_v6 = vunpack.i.h.bf16 %v5879_v41  ;;  %v4526_v57 = vunpack.i.h.bf16 %v4524_v19 }
 0x38d   : > { %v1472_v35 = vsel %vm487_vm5, %v4505_v10, %v8427_v60  ;;  %v1473_v53 = vsel %vm487_vm5, %v4506_v52, %v8428_v12  ;;  %v4525_v55 = vunpack.i.l.bf16 %v4524_v19  ;;  %v4531_v54 = vunpack.i.h.bf16 %v4529_v23  ;;  %2220 = vmatpush1.bf16.msra.mxu1 %v1754_v14  ;;  %v4544_v47 = vpop.permute.xlu1 %4543 }
 0x38e   : > { %v1378_v2 = vsel %vm462_vm4, %v4520_v48, %v8429_v7  ;;  %v1379_v38 = vsel %vm462_vm4, %v4521_v56, %v8430_v6  ;;  %2116 = vmatpush1.bf16.msra.mxu0 %v1760_v40  ;;  %v4530_v28 = vunpack.i.l.bf16 %v4529_v23  ;;  %v1762_v0 = vpack.c.bf16 %v1351_v21, %v1350_v3 }
 0x38f   : > { %2117 = vmatprep.subr.bf16.mxu0 %v1769_v34  ;;  %v1763_v16 = vpack.c.bf16 %v1379_v38, %v1378_v2  ;;  %v1771_v15 = vpack.c.bf16 %v1473_v53, %v1472_v35  ;;  %v8431_v17 = vunpack.i.h.bf16 %v6662_v27  ;;  %v8432_v41 = vunpack.i.l.bf16 %v6662_v27  ;;  %v4539_v56 = vpop.permute.xlu0 %4538 }
 0x390   : > { %v1450_v39 = vsel %vm487_vm5, %v4530_v28, %v4500_v4  ;;  %v1451_v52 = vsel %vm487_vm5, %v4531_v54, %v4501_v13  ;;  %v8433_v10 = vunpack.i.l.bf16 %v6568_v36  ;;  %v8434_v58 = vunpack.i.h.bf16 %v6568_v36 }
 0x391   : > { %v1455_v1 = vsel %vm487_vm5, %v8431_v17, %v4531_v54  ;;  %v1454_v22 = vsel %vm487_vm5, %v8432_v41, %v4530_v28  ;;  %2221 = vmatprep.subr.bf16.mxu1 %v1763_v16  ;;  %v1777_v8 = vpack.c.bf16 %v1451_v52, %v1450_v39  ;;  %v4536_v37 = vunpack.i.h.bf16 %v4534_v18  ;;  %v4549_v48 = vpop.permute.xlu1 %4548  ;;  %v8439_v28 = vld [vmem:[#allocation35_spill] sm:$0xff] }
 0x392   : > { %v1548_v9 = vsel %vm512_vm6, %v8433_v10, %v4515_v25  ;;  %v1549_v42 = vsel %vm512_vm6, %v8434_v58, %v4516_v26  ;;  %v1776_v27 = vpack.c.bf16 %v1455_v1, %v1454_v22  ;;  %2118 = vmatpush1.bf16.msra.mxu0 %v1768_v30  ;;  %v4535_v14 = vunpack.i.l.bf16 %v4534_v18  ;;  %2222 = vmatpush1.bf16.msra.mxu1 %v1762_v0 }
 0x393   : > { %v1544_v51 = vsel %vm512_vm6, %v4515_v25, %v4525_v55  ;;  %v1545_v63 = vsel %vm512_vm6, %v4516_v26, %v4526_v57  ;;  %v4546_v29 = vunpack.i.h.bf16 %v4544_v47  ;;  %2119 = vmatprep.subr.bf16.mxu0 %v1777_v8  ;;  %v1770_v36 = vpack.c.bf16 %v7274_v5, %v7278_v44  ;;  %2223 = vmatprep.subr.bf16.mxu1 %v1771_v15  ;;  %v4554_v6 = vpop.permute.xlu0 %4553 }
 0x394   : > { %v1784_v24 = vpack.c.bf16 %v1549_v42, %v1548_v9  ;;  %v1446_v40 = vsel %vm487_vm5, %v4500_v4, %v4535_v14  ;;  %v1447_v30 = vsel %vm487_vm5, %v4501_v13, %v4536_v37  ;;  %v4545_v31 = vunpack.i.l.bf16 %v4544_v47 }
 0x395   : > { %v1785_v34 = vpack.c.bf16 %v1545_v63, %v1544_v51  ;;  %v8435_v3 = vunpack.i.l.bf16 %v5887_v50  ;;  %v8436_v59 = vunpack.i.h.bf16 %v5887_v50  ;;  %v4541_v44 = vunpack.i.h.bf16 %v4539_v56  ;;  %v4559_v38 = vpop.permute.xlu1 %4558 }
 0x396   : > { %2120 = vmatpush1.bf16.msra.mxu0 %v1776_v27  ;;  %v4540_v4 = vunpack.i.l.bf16 %v4539_v56  ;;  %v4551_v60 = vunpack.i.h.bf16 %v4549_v48  ;;  %v4550_v13 = vunpack.i.l.bf16 %v4549_v48  ;;  %v1778_v35 = vpack.c.bf16 %v1447_v30, %v1446_v40  ;;  %2224 = vmatpush1.bf16.msra.mxu1 %v1770_v36  ;;  %v4598_v48 = vld [vmem:[#allocation5] ss:$12 sps:$4 sm:$0xff]  }
 0x397   : > { %v1474_v21 = vsel %vm487_vm5, %v4535_v14, %v8435_v3  ;;  %v1475_v5 = vsel %vm487_vm5, %v4536_v37, %v8436_v59  ;;  %v8437_v12 = vunpack.i.h.bf16 %v6732_v45  ;;  %2121 = vmatprep.subr.bf16.mxu0 %v1785_v34  ;;  %v1547_v23 = vsel %vm512_vm6, %v4546_v29, %v4541_v44  ;;  %v4564_v9 = vpop.permute.xlu0 %4563 }
 0x398   : > { %v1779_v26 = vpack.c.bf16 %v1475_v5, %v1474_v21  ;;  %v1541_v50 = vsel %vm512_vm6, %v4526_v57, %v4551_v60  ;;  %v1540_v25 = vsel %vm512_vm6, %v4525_v55, %v4550_v13  ;;  %v1546_v19 = vsel %vm512_vm6, %v4545_v31, %v4540_v4 }
 0x399   : > { %v1551_v53 = vsel %vm512_vm6, %v8437_v12, %v4546_v29  ;;  %v8438_v7 = vunpack.i.l.bf16 %v6732_v45  ;;  %v1793_v54 = vpack.c.bf16 %v1547_v23, %v1546_v19  ;;  %v8440_v57 = vunpack.i.l.bf16 %v8439_v28  ;;  %v4574_v58 = vpop.permute.xlu1 %4573 }
 0x39a   : > { %2225 = vmatprep.subr.bf16.mxu1 %v1779_v26  ;;  %v8441_v0 = vunpack.i.h.bf16 %v8439_v28  ;;  %2122 = vmatpush1.bf16.msra.mxu0 %v1784_v24  ;;  %v4556_v15 = vunpack.i.h.bf16 %v4554_v6  ;;  %v4555_v45 = vunpack.i.l.bf16 %v4554_v6  ;;  %v4561_v17 = vunpack.i.h.bf16 %v4559_v38 }
 0x39b   : > { %v1550_v2 = vsel %vm512_vm6, %v8438_v7, %v4545_v31  ;;  %v1568_v55 = vsel %vm512_vm6, %v4550_v13, %v8440_v57  ;;  %v4560_v1 = vunpack.i.l.bf16 %v4559_v38  ;;  %v1786_v41 = vpack.c.bf16 %v1541_v50, %v1540_v25  ;;  %2226 = vmatpush1.bf16.msra.mxu1 %v1778_v35  ;;  %2123 = vmatprep.subr.bf16.mxu0 %v1793_v54 }
 0x39c   : > { %v1569_v16 = vsel %vm512_vm6, %v4551_v60, %v8441_v0  ;;  %v1792_v39 = vpack.c.bf16 %v1551_v53, %v1550_v2  ;;  %v1542_v52 = vsel %vm512_vm6, %v4540_v4, %v4555_v45  ;;  %v1543_v10 = vsel %vm512_vm6, %v4541_v44, %v4556_v15  ;;  %v4599_v4 = vld [vmem:[#allocation5 + $0x1c] ss:$12 sps:$4 sm:$0xff]  }
 0x39d   : > { %v1787_v22 = vpack.c.bf16 %v1569_v16, %v1568_v55  ;;  %v8442_v42 = vunpack.i.l.bf16 %v5895_v62  ;;  %v8443_v18 = vunpack.i.h.bf16 %v5895_v62  ;;  %v8444_v8 = vunpack.i.l.bf16 %v6734_v11  ;;  %v4579_v34 = vpop.permute.xlu1 %4578 }
 0x39e   : > { %v8445_v14 = vunpack.i.h.bf16 %v6734_v11  ;;  %2124 = vmatpush1.bf16.msra.mxu0 %v1792_v39  ;;  %v4566_v63 = vunpack.i.h.bf16 %v4564_v9  ;;  %v4565_v29 = vunpack.i.l.bf16 %v4564_v9  ;;  %v1794_v36 = vpack.c.bf16 %v1543_v10, %v1542_v52  ;;  %v4569_v11 = vpop.permute.xlu0 %4568  ;;  %v2338_v9 = vld [vmem:[#allocation7] sm:$0xff] }
 0x39f   : > { %2227 = vmatprep.subr.bf16.mxu1 %v1787_v22  ;;  %v1570_v27 = vsel %vm512_vm6, %v4555_v45, %v8442_v42  ;;  %v1571_v47 = vsel %vm512_vm6, %v4556_v15, %v8443_v18  ;;  %v1644_v37 = vsel %vm537_vm7, %v8444_v8, %v4560_v1  ;;  %v4576_v24 = vunpack.i.h.bf16 %v4574_v58  ;;  %v2564_v18 = vld [vmem:[#allocation7 + $0x200] sm:$0xff] }
 0x3a0   : > { %v1645_v51 = vsel %vm537_vm7, %v8445_v14, %v4561_v17  ;;  %2228 = vmatpush1.bf16.msra.mxu1 %v1786_v41  ;;  %v4575_v62 = vunpack.i.l.bf16 %v4574_v58  ;;  %v1795_v40 = vpack.c.bf16 %v1571_v47, %v1570_v27  ;;  %v1640_v30 = vsel %vm537_vm7, %v4560_v1, %v4565_v29  ;;  %v2339_v27 = vld [vmem:[#allocation7 + $0x8] sm:$0xff] }
 0x3a1   : > { %v1641_v31 = vsel %vm537_vm7, %v4561_v17, %v4566_v63  ;;  %v1800_v56 = vpack.c.bf16 %v1645_v51, %v1644_v37  ;;  %2126 = vmatmul.mubr.bf16.vlgmr.msra.gmra.mrb[24].mxu0 %v4598_v48  ;;  %v4571_v21 = vunpack.i.h.bf16 %v4569_v11  ;;  %v4570_v59 = vunpack.i.l.bf16 %v4569_v11  ;;  %v4600_v17 = vld [vmem:[#allocation5 + $0x18] ss:$12 sps:$4 sm:$0xff]   ;;  %v2346_v37 = vld [vmem:[#allocation7 + $0x40] sm:$0xff] }
 0x3a2   : > { %2229 = vmatprep.subr.bf16.mxu1 %v1795_v40  ;;  %v1801_v3 = vpack.c.bf16 %v1641_v31, %v1640_v30  ;;  %v4581_v5 = vunpack.i.h.bf16 %v4579_v34  ;;  %v4580_v44 = vunpack.i.l.bf16 %v4579_v34  ;;  %2135 = vmatprep.mubr.bf16.mxu0 %v4599_v4  ;;  %v8446_v60 = vunpack.i.h.bf16 %v6834_v32  ;;  %v2452_v14 = vld [vmem:[#allocation7 + $0x108] sm:$0xff] }
 0x3a3   : > { %v8447_v35 = vunpack.i.l.bf16 %v6834_v32  ;;  %v1642_v50 = vsel %vm537_vm7, %v4575_v62, %v4570_v59  ;;  %v1643_v25 = vsel %vm537_vm7, %v4576_v24, %v4571_v21  ;;  %v4584_v32 = vpop.permute.xlu0 %4583  ;;  %v8448_v7 = vunpack.i.l.bf16 %v6664_v33  ;;  %v2565_v51 = vld [vmem:[#allocation7 + $0x208] sm:$0xff] }
 0x3a4   : > { %v1647_v13 = vsel %vm537_vm7, %v8446_v60, %v4576_v24  ;;  %2230 = vmatpush1.bf16.msra.mxu1 %v1794_v36  ;;  %2146 = vmatprep.subr.bf16.mxu0 %v1801_v3  ;;  %v1637_v53 = vsel %vm537_vm7, %v4566_v63, %v4581_v5  ;;  %v1636_v26 = vsel %vm537_vm7, %v4565_v29, %v4580_v44  ;;  %v8449_v6 = vunpack.i.h.bf16 %v6664_v33  ;;  %v2459_v36 = vld [vmem:[#allocation7 + $0x140] sm:$0xff]  ;;  %v2347_v31 = vld [vmem:[#allocation7 + $0x48] sm:$0xff] }
 0x3a5   : > { %v1646_v12 = vsel %vm537_vm7, %v8447_v35, %v4575_v62  ;;  %2147 = vmatpush1.bf16.msra.mxu0 %v1800_v56  ;;  %v1802_v19 = vpack.c.bf16 %v1637_v53, %v1636_v26  ;;  %v1809_v23 = vpack.c.bf16 %v1643_v25, %v1642_v50  ;;  %v1664_v2 = vsel %vm537_vm7, %v4580_v44, %v8448_v7  ;;  %v2572_v24 = vld [vmem:[#allocation7 + $0x240] sm:$0xff]  ;;  %v2678_v44 = vld [vmem:[#allocation7 + $0x308] sm:$0xff] }
 0x3a6   : > { %v1665_v38 = vsel %vm537_vm7, %v4581_v5, %v8449_v6  ;;  %v1808_v54 = vpack.c.bf16 %v1647_v13, %v1646_v12  ;;  %v4586_v28 = vunpack.i.h.bf16 %v4584_v32  ;;  %v4585_v57 = vunpack.i.l.bf16 %v4584_v32  ;;  %v2677_v62 = vld [vmem:[#allocation7 + $0x300] sm:$0xff]  ;;  %v2573_v5 = vld [vmem:[#allocation7 + $0x248] sm:$0xff] }
 0x3a7   : > { %2232 = vmatmul.mubr.bf16.vlgmr.msra.gmra.mrb[24].mxu1 %v4598_v48  ;;  %v1803_v55 = vpack.c.bf16 %v1665_v38, %v1664_v2  ;;  %2148 = vmatprep.subr.bf16.mxu0 %v1809_v23  ;;  %v8450_v33 = vunpack.i.l.bf16 %v6631_v46  ;;  %v8451_v1 = vunpack.i.h.bf16 %v6631_v46  ;;  %v7436_v46 = vpop.permute.xlu1 %1826  ;;  %v7439_v58 = vpop.permute.xlu0 %1831  ;;  %v2460_v48 = vld [vmem:[#allocation7 + $0x148] sm:$0xff]  ;;  %v2685_v12 = vld [vmem:[#allocation7 + $0x340] sm:$0xff]  ;;  %vm3470_vm6 = vcmask 73728  }
 0x3a8   : > { %2241 = vmatprep.mubr.bf16.mxu1 %v4599_v4  ;;  %v1638_v0 = vsel %vm537_vm7, %v4570_v59, %v4585_v57  ;;  %v1639_v16 = vsel %vm537_vm7, %v4571_v21, %v4586_v28 }
 0x3a9   : > { %2252 = vmatprep.subr.bf16.mxu1 %v1803_v55  ;;  %2149 = vmatpush1.bf16.msra.mxu0 %v1808_v54  ;;  %v1666_v15 = vsel %vm537_vm7, %v4585_v57, %v8450_v33  ;;  %v1810_v45 = vpack.c.bf16 %v1639_v16, %v1638_v0  ;;  %v1667_v41 = vsel %vm537_vm7, %v4586_v28, %v8451_v1  ;;  %v2686_v54 = vld [vmem:[#allocation7 + $0x348] sm:$0xff]  ;;  %v2790_v28 = vld [vmem:[#allocation7 + $0x400] sm:$0xff] }
 0x3aa   : > { %2136 = vmatmul.mubr.bf16.gmra.mrb[28].mxu0 %v4600_v17  ;;  %2253 = vmatpush1.bf16.msra.mxu1 %v1802_v19  ;;  %v1811_v22 = vpack.c.bf16 %v1667_v41, %v1666_v15  ;;  %v2799_v1 = vld [vmem:[#allocation7 + $0x448] sm:$0xff] }
 0x3ab   : > { %2178 = vmatprep.mubr.bf16.mxu0 %v8354_v43  ;;  %v7462_v53 = vpop.permute.xlu1 %1836 }
 0x3ac   : > { %2254 = vmatprep.subr.bf16.mxu1 %v1811_v22  ;;  %v7475_v57 = vpop.permute.xlu0 %1841 }
 0x3ae   : > { %2255 = vmatpush1.bf16.msra.mxu1 %v1810_v45  ;;  %v2791_v45 = vld [vmem:[#allocation7 + $0x408] sm:$0xff] }
 0x3af   : > { %2242 = vmatmul.mubr.bf16.gmra.mrb[28].mxu1 %v4600_v17  ;;  %v2798_v17 = vld [vmem:[#allocation7 + $0x440] sm:$0xff] }
 0x3b0   : > { %2284 = vmatprep.mubr.bf16.mxu1 %v8354_v43 }
 0x3b2   : > { %3619 = vmatmul.mubr.msk.bf16.vlgmr.msra.gmra.mrb[24].mxu0 %vm1874_vm10, %v6752_v61 }
 0x3b3   : > { %2188 = vmatprep.mubr.bf16.mxu0 %v8354_v43 }
 0x3b7   : > { %3621 = vmatmul.mubr.msk.bf16.vlgmr.msra.gmra.mrb[24].mxu1 %vm1874_vm10, %v6752_v61 }
 0x3b8   : > { %2294 = vmatprep.mubr.bf16.mxu1 %v8354_v43  ;;  %v2451_v43 = vld [vmem:[#allocation7 + $0x100] sm:$0xff] }
 0x3ba   : > { %3620 = vmatmul.mubr.msk.bf16.gmra.mrb[28].mxu0 %vm1874_vm10, %v6812_v49 }
 0x3bf   : > { %3622 = vmatmul.mubr.msk.bf16.gmra.mrb[28].mxu1 %vm1874_vm10, %v6812_v49 }
 0x417   : > { %v1968_v39 = vpop.f32.mrb[16].mxu0 }
 0x418   : > { %v3627_v52 = vadd.f32 %v1968_v39, %v7436_v46  ;;  %v1970_v10 = vpop.f32.mrb[17].mxu0 }
 0x419   : > { %v3628_v42 = vadd.f32 %v1970_v10, %v7436_v46  ;;  %v1972_v61 = vpop.f32.mrb[18].mxu0 }
 0x41a   : > { %v7442_v47 = vmax.f32 %v3627_v52, 0.0  ;;  %v3629_v8 = vadd.f32 %v1972_v61, %v7439_v58  ;;  %v1974_v49 = vpop.f32.mrb[19].mxu0 }
 0x41b   : > { %v7445_v63 = vmax.f32 %v3628_v42, 0.0  ;;  %v3630_v29 = vadd.f32 %v1974_v49, %v7439_v58  ;;  %v2904_v42 = vld [vmem:[#allocation7 + $0x508] sm:$0xff] }
 0x41c   : > { %v7448_v40 = vmax.f32 %v3629_v8, 0.0  ;;  %v2370_v30 = vmul.f32 %v2338_v9, %v7442_v47  ;;  %v2483_v56 = vmul.f32 %v2451_v43, %v7442_v47  ;;  %v2596_v11 = vmul.f32 %v2564_v18, %v7442_v47  ;;  %v2903_v9 = vld [vmem:[#allocation7 + $0x500] sm:$0xff]  ;;  %v2912_v49 = vld [vmem:[#allocation7 + $0x548] sm:$0xff] }
 0x41d   : > { %v7453_v34 = vmax.f32 %v3630_v29, 0.0  ;;  %v2371_v3 = vmul.f32 %v2339_v27, %v7445_v63  ;;  %v2484_v21 = vmul.f32 %v2452_v14, %v7445_v63  ;;  %v2597_v59 = vmul.f32 %v2565_v51, %v7445_v63  ;;  %v2911_v8 = vld [vmem:[#allocation7 + $0x540] sm:$0xff] }
 0x41e   : > { %v2378_v4 = vmul.f32 %v2346_v37, %v7448_v40  ;;  %v2491_v60 = vmul.f32 %v2459_v36, %v7448_v40  ;;  %v2604_v13 = vmul.f32 %v2572_v24, %v7448_v40  ;;  %v2709_v35 = vmul.f32 %v2677_v62, %v7442_v47  ;;  %v3016_v36 = vld [vmem:[#allocation7 + $0x600] sm:$0xff]  ;;  %v3017_v24 = vld [vmem:[#allocation7 + $0x608] sm:$0xff] }
 0x41f   : > { %v7464_v50 = vadd.f32 %v2371_v3, %v2370_v30  ;;  %v2379_v25 = vmul.f32 %v2347_v31, %v7453_v34  ;;  %v7467_v19 = vadd.f32 %v2484_v21, %v2483_v56  ;;  %v2492_v32 = vmul.f32 %v2460_v48, %v7453_v34  ;;  %v3024_v62 = vld [vmem:[#allocation7 + $0x640] sm:$0xff]  ;;  %v3130_v21 = vld [vmem:[#allocation7 + $0x708] sm:$0xff] }
 0x420   : > { %v1978_v26 = vpop.f32.mrb[20].mxu0  ;;  %v7471_v2 = vadd.f32 %v2597_v59, %v2596_v11  ;;  %v2605_v6 = vmul.f32 %v2573_v5, %v7453_v34  ;;  %v2710_v38 = vmul.f32 %v2678_v44, %v7445_v63  ;;  %v2717_v15 = vmul.f32 %v2685_v12, %v7448_v40  ;;  %v3025_v11 = vld [vmem:[#allocation7 + $0x648] sm:$0xff]  ;;  %v3129_v3 = vld [vmem:[#allocation7 + $0x700] sm:$0xff] }
 0x421   : > { %v3631_v23 = vadd.f32 %v1978_v26, %v7462_v53  ;;  %v1980_v7 = vpop.f32.mrb[21].mxu0  ;;  %v7478_v16 = vadd.f32 %v2379_v25, %v2378_v4  ;;  %v7480_v33 = vadd.f32 %v2492_v32, %v2491_v60  ;;  %v2718_v43 = vmul.f32 %v2686_v54, %v7453_v34  ;;  %v3137_v60 = vld [vmem:[#allocation7 + $0x740] sm:$0xff] }
 0x422   : > { %v3632_v55 = vadd.f32 %v1980_v7, %v7462_v53  ;;  %v1982_v0 = vpop.f32.mrb[22].mxu0  ;;  %v7486_v52 = vadd.f32 %v2605_v6, %v2604_v13  ;;  %v7488_v10 = vadd.f32 %v2710_v38, %v2709_v35  ;;  %v2822_v18 = vmul.f32 %v2790_v28, %v7442_v47  ;;  %v3138_v13 = vld [vmem:[#allocation7 + $0x748] sm:$0xff]  ;;  %v3242_v35 = vld [vmem:[#allocation7 + $0x800] sm:$0xff] }
 0x423   : > { %v7483_v41 = vmax.f32 %v3631_v23, 0.0  ;;  %v3633_v22 = vadd.f32 %v1982_v0, %v7475_v57  ;;  %v1984_v39 = vpop.f32.mrb[23].mxu0  ;;  %v2823_v14 = vmul.f32 %v2791_v45, %v7445_v63  ;;  %v2830_v51 = vmul.f32 %v2798_v17, %v7448_v40  ;;  %v3243_v23 = vld [vmem:[#allocation7 + $0x808] sm:$0xff]  ;;  %v3250_v7 = vld [vmem:[#allocation7 + $0x840] sm:$0xff] }
 0x424   : > { %v7490_v61 = vmax.f32 %v3632_v55, 0.0  ;;  %v3634_v27 = vadd.f32 %v1984_v39, %v7475_v57  ;;  %v2831_v29 = vmul.f32 %v2799_v1, %v7453_v34  ;;  %v7502_v31 = vadd.f32 %v2718_v43, %v2717_v15  ;;  %v3251_v55 = vld [vmem:[#allocation7 + $0x848] sm:$0xff]  ;;  %v3355_v0 = vld [vmem:[#allocation7 + $0x900] sm:$0xff] }
 0x425   : > { %v7495_v37 = vmax.f32 %v3633_v22, 0.0  ;;  %v2935_v56 = vmul.f32 %v2903_v9, %v7442_v47  ;;  %v2936_v48 = vmul.f32 %v2904_v42, %v7445_v63  ;;  %v7506_v59 = vadd.f32 %v2823_v14, %v2822_v18  ;;  %v3356_v15 = vld [vmem:[#allocation7 + $0x908] sm:$0xff]  ;;  %v3363_v39 = vld [vmem:[#allocation7 + $0x940] sm:$0xff] }
 0x426   : > { %v7500_v30 = vmax.f32 %v3634_v27, 0.0  ;;  %v7508_v5 = vadd.f32 %v2831_v29, %v2830_v51  ;;  %v2943_v44 = vmul.f32 %v2911_v8, %v7448_v40  ;;  %v2944_v4 = vmul.f32 %v2912_v49, %v7453_v34  ;;  %v3364_v9 = vld [vmem:[#allocation7 + $0x948] sm:$0xff]  ;;  %v2362_v42 = vld [vmem:[#allocation7 + $0xc0] sm:$0xff] }
 0x427   : > { %v7512_v12 = vadd.f32 %v2936_v48, %v2935_v56  ;;  %v3048_v26 = vmul.f32 %v3016_v36, %v7442_v47  ;;  %v3049_v25 = vmul.f32 %v3017_v24, %v7445_v63  ;;  %v3056_v32 = vmul.f32 %v3024_v62, %v7448_v40  ;;  %v2363_v49 = vld [vmem:[#allocation7 + $0xc8] sm:$0xff]  ;;  %v2354_v24 = vld [vmem:[#allocation7 + $0x80] sm:$0xff] }
 0x428   : > { %v7517_v6 = vadd.f32 %v2944_v4, %v2943_v44  ;;  %v3057_v38 = vmul.f32 %v3025_v11, %v7453_v34  ;;  %v3161_v54 = vmul.f32 %v3129_v3, %v7442_v47  ;;  %v3162_v28 = vmul.f32 %v3130_v21, %v7445_v63  ;;  %v2355_v62 = vld [vmem:[#allocation7 + $0x88] sm:$0xff]  ;;  %v2475_v44 = vld [vmem:[#allocation7 + $0x1c0] sm:$0xff] }
 0x429   : > { %v7522_v45 = vadd.f32 %v3049_v25, %v3048_v26  ;;  %v3169_v17 = vmul.f32 %v3137_v60, %v7448_v40  ;;  %v3170_v1 = vmul.f32 %v3138_v13, %v7453_v34  ;;  %v3274_v22 = vmul.f32 %v3242_v35, %v7442_v47  ;;  %v2476_v35 = vld [vmem:[#allocation7 + $0x1c8] sm:$0xff] }
 0x42a   : > { %v7527_v27 = vadd.f32 %v3057_v38, %v3056_v32  ;;  %v7529_v43 = vadd.f32 %v3162_v28, %v3161_v54  ;;  %v3275_v18 = vmul.f32 %v3243_v23, %v7445_v63  ;;  %v3282_v8 = vmul.f32 %v3250_v7, %v7448_v40  ;;  %v2340_v32 = vld [vmem:[#allocation7 + $0x10] sm:$0xff] }
 0x42b   : > { %v7533_v14 = vadd.f32 %v3170_v1, %v3169_v17  ;;  %v3283_v51 = vmul.f32 %v3251_v55, %v7453_v34  ;;  %v3387_v29 = vmul.f32 %v3355_v0, %v7442_v47  ;;  %v3388_v36 = vmul.f32 %v3356_v15, %v7445_v63  ;;  %v2566_v23 = vld [vmem:[#allocation7 + $0x210] sm:$0xff]  ;;  %v2341_v0 = vld [vmem:[#allocation7 + $0x18] sm:$0xff] }
 0x42c   : > { %v7538_v48 = vadd.f32 %v3275_v18, %v3274_v22  ;;  %v3395_v11 = vmul.f32 %v3363_v39, %v7448_v40  ;;  %v3396_v3 = vmul.f32 %v3364_v9, %v7453_v34  ;;  %v2394_v21 = vmul.f32 %v2362_v42, %v7495_v37  ;;  %v2453_v40 = vld [vmem:[#allocation7 + $0x110] sm:$0xff]  ;;  %v2454_v15 = vld [vmem:[#allocation7 + $0x118] sm:$0xff] }
 0x42d   : > { %v7544_v13 = vadd.f32 %v3283_v51, %v3282_v8  ;;  %v7546_v47 = vadd.f32 %v3388_v36, %v3387_v29  ;;  %v2395_v63 = vmul.f32 %v2363_v49, %v7500_v30  ;;  %v2386_v7 = vmul.f32 %v2354_v24, %v7483_v41  ;;  %v2567_v17 = vld [vmem:[#allocation7 + $0x218] sm:$0xff]  ;;  %v2348_v42 = vld [vmem:[#allocation7 + $0x50] sm:$0xff] }
 0x42e   : > { %v2074_v56 = vpop.f32.mrb[16].mxu1  ;;  %v7550_v34 = vadd.f32 %v3396_v3, %v3395_v11  ;;  %v2387_v38 = vmul.f32 %v2355_v62, %v7490_v61  ;;  %v7560_v22 = vmul.f32 %v2475_v44, %v7495_v37  ;;  %v2461_v18 = vld [vmem:[#allocation7 + $0x150] sm:$0xff]  ;;  %v7568_v49 = vmul.f32 %v2476_v35, %v7500_v30  ;;  %v2349_v36 = vld [vmem:[#allocation7 + $0x58] sm:$0xff] }
 0x42f   : > { %v3635_v4 = vadd.f32 %v2074_v56, %v7436_v46  ;;  %v2076_v60 = vpop.f32.mrb[17].mxu1  ;;  %v7557_v1 = vadd.f32 %v2395_v63, %v2394_v21  ;;  %v2462_v62 = vld [vmem:[#allocation7 + $0x158] sm:$0xff]  ;;  %v2574_v11 = vld [vmem:[#allocation7 + $0x250] sm:$0xff] }
 0x430   : > { %v3636_v26 = vadd.f32 %v2076_v60, %v7436_v46  ;;  %v2078_v25 = vpop.f32.mrb[18].mxu1  ;;  %v7565_v8 = vadd.f32 %v2387_v38, %v2386_v7 }
 0x431   : > { %v7554_v54 = vmax.f32 %v3635_v4, 0.0  ;;  %v3637_v28 = vadd.f32 %v2078_v25, %v7439_v58  ;;  %v2080_v55 = vpop.f32.mrb[19].mxu1  ;;  %v2575_v25 = vld [vmem:[#allocation7 + $0x258] sm:$0xff] }
 0x432   : > { %v7562_v39 = vmax.f32 %v3636_v26, 0.0  ;;  %v3638_v9 = vadd.f32 %v2080_v55, %v7439_v58 }
 0x433   : > { %v7570_v51 = vmax.f32 %v3637_v28, 0.0  ;;  %v2372_v29 = vmul.f32 %v2340_v32, %v7554_v54  ;;  %v2485_v24 = vmul.f32 %v2453_v40, %v7554_v54  ;;  %v2598_v56 = vmul.f32 %v2566_v23, %v7554_v54 }
 0x434   : > { %v7575_v3 = vmax.f32 %v3638_v9, 0.0  ;;  %v2373_v21 = vmul.f32 %v2341_v0, %v7562_v39  ;;  %v2486_v44 = vmul.f32 %v2454_v15, %v7562_v39  ;;  %v2599_v4 = vmul.f32 %v2567_v17, %v7562_v39  ;;  %v2679_v15 = vld [vmem:[#allocation7 + $0x310] sm:$0xff] }
 0x435   : > { %v2403_v60 = vadd.f32 %v7464_v50, %v2372_v29  ;;  %v2380_v63 = vmul.f32 %v2348_v42, %v7570_v51  ;;  %v2516_v35 = vadd.f32 %v7467_v19, %v2485_v24  ;;  %v2493_v26 = vmul.f32 %v2461_v18, %v7570_v51  ;;  %v2680_v29 = vld [vmem:[#allocation7 + $0x318] sm:$0xff] }
 0x436   : > { %v2084_v32 = vpop.f32.mrb[20].mxu1  ;;  %v2381_v40 = vmul.f32 %v2349_v36, %v7575_v3  ;;  %v2494_v23 = vmul.f32 %v2462_v62, %v7575_v3  ;;  %v2629_v7 = vadd.f32 %v7471_v2, %v2598_v56  ;;  %v2606_v38 = vmul.f32 %v2574_v11, %v7570_v51  ;;  %v2687_v36 = vld [vmem:[#allocation7 + $0x350] sm:$0xff] }
 0x437   : > { %v3639_v28 = vadd.f32 %v2084_v32, %v7462_v53  ;;  %v2086_v55 = vpop.f32.mrb[21].mxu1  ;;  %v7589_v50 = vadd.f32 %v2403_v60, %v2373_v21  ;;  %v2412_v0 = vadd.f32 %v7478_v16, %v2380_v63  ;;  %v7592_v19 = vadd.f32 %v2516_v35, %v2486_v44  ;;  %v2688_v21 = vld [vmem:[#allocation7 + $0x358] sm:$0xff]  ;;  %v2792_v44 = vld [vmem:[#allocation7 + $0x410] sm:$0xff] }
 0x438   : > { %v3640_v17 = vadd.f32 %v2086_v55, %v7462_v53  ;;  %v2088_v9 = vpop.f32.mrb[22].mxu1  ;;  %v2525_v42 = vadd.f32 %v7480_v33, %v2493_v26  ;;  %v7596_v18 = vadd.f32 %v2629_v7, %v2599_v4  ;;  %v2607_v2 = vmul.f32 %v2575_v25, %v7575_v3  ;;  %v2793_v35 = vld [vmem:[#allocation7 + $0x418] sm:$0xff]  ;;  %v2800_v26 = vld [vmem:[#allocation7 + $0x450] sm:$0xff] }
 0x439   : > { %v7599_v24 = vmax.f32 %v3639_v28, 0.0  ;;  %v3641_v62 = vadd.f32 %v2088_v9, %v7475_v57  ;;  %v2090_v56 = vpop.f32.mrb[23].mxu1  ;;  %v7602_v16 = vadd.f32 %v2412_v0, %v2381_v40  ;;  %v2638_v11 = vadd.f32 %v7486_v52, %v2606_v38  ;;  %v2801_v25 = vld [vmem:[#allocation7 + $0x458] sm:$0xff]  ;;  %v2905_v38 = vld [vmem:[#allocation7 + $0x510] sm:$0xff] }
 0x43a   : > { %v7605_v60 = vmax.f32 %v3640_v17, 0.0  ;;  %v3642_v33 = vadd.f32 %v2090_v56, %v7475_v57  ;;  %v7608_v4 = vadd.f32 %v2525_v42, %v2494_v23  ;;  %v2711_v63 = vmul.f32 %v2679_v15, %v7554_v54  ;;  %v2906_v28 = vld [vmem:[#allocation7 + $0x518] sm:$0xff]  ;;  %v2913_v17 = vld [vmem:[#allocation7 + $0x550] sm:$0xff] }
 0x43b   : > { %v7611_v32 = vmax.f32 %v3641_v62, 0.0  ;;  %v7613_v7 = vadd.f32 %v2638_v11, %v2607_v2  ;;  %v2712_v40 = vmul.f32 %v2680_v29, %v7562_v39  ;;  %v2719_v52 = vmul.f32 %v2687_v36, %v7570_v51  ;;  %v2914_v9 = vld [vmem:[#allocation7 + $0x558] sm:$0xff]  ;;  %v3018_v62 = vld [vmem:[#allocation7 + $0x610] sm:$0xff] }
 0x43c   : > { %v7617_v55 = vmax.f32 %v3642_v33, 0.0  ;;  %v2742_v23 = vadd.f32 %v7488_v10, %v2711_v63  ;;  %v2720_v0 = vmul.f32 %v2688_v21, %v7575_v3  ;;  %v2824_v15 = vmul.f32 %v2792_v44, %v7554_v54  ;;  %v3019_v56 = vld [vmem:[#allocation7 + $0x618] sm:$0xff]  ;;  %v3026_v33 = vld [vmem:[#allocation7 + $0x650] sm:$0xff] }
 0x43d   : > { %v2751_v42 = vadd.f32 %v7502_v31, %v2719_v52  ;;  %v2825_v2 = vmul.f32 %v2793_v35, %v7562_v39  ;;  %v2832_v29 = vmul.f32 %v2800_v26, %v7570_v51  ;;  %v2833_v36 = vmul.f32 %v2801_v25, %v7575_v3  ;;  %v3027_v63 = vld [vmem:[#allocation7 + $0x658] sm:$0xff]  ;;  %v3131_v25 = vld [vmem:[#allocation7 + $0x710] sm:$0xff] }
 0x43e   : > { %v7626_v11 = vadd.f32 %v2742_v23, %v2712_v40  ;;  %v2855_v10 = vadd.f32 %v7506_v59, %v2824_v15  ;;  %v2937_v21 = vmul.f32 %v2905_v38, %v7554_v54  ;;  %v2938_v44 = vmul.f32 %v2906_v28, %v7562_v39  ;;  %v3132_v52 = vld [vmem:[#allocation7 + $0x718] sm:$0xff]  ;;  %v3139_v23 = vld [vmem:[#allocation7 + $0x750] sm:$0xff] }
 0x43f   : > { %v7631_v20 = vadd.f32 %v2751_v42, %v2720_v0  ;;  %v2864_v31 = vadd.f32 %v7508_v5, %v2832_v29  ;;  %v2945_v35 = vmul.f32 %v2913_v17, %v7570_v51  ;;  %v2946_v26 = vmul.f32 %v2914_v9, %v7575_v3  ;;  %v3140_v15 = vld [vmem:[#allocation7 + $0x758] sm:$0xff]  ;;  %v3244_v42 = vld [vmem:[#allocation7 + $0x810] sm:$0xff] }
 0x440   : > { %v7636_v40 = vadd.f32 %v2855_v10, %v2825_v2  ;;  %v2968_v59 = vadd.f32 %v7512_v12, %v2937_v21  ;;  %v3050_v38 = vmul.f32 %v3018_v62, %v7554_v54  ;;  %v3051_v28 = vmul.f32 %v3019_v56, %v7562_v39  ;;  %v3245_v29 = vld [vmem:[#allocation7 + $0x818] sm:$0xff]  ;;  %v3252_v10 = vld [vmem:[#allocation7 + $0x850] sm:$0xff] }
 0x441   : > { %v7641_v0 = vadd.f32 %v2864_v31, %v2833_v36  ;;  %v2977_v5 = vadd.f32 %v7517_v6, %v2945_v35  ;;  %v3058_v17 = vmul.f32 %v3026_v33, %v7570_v51  ;;  %v3059_v9 = vmul.f32 %v3027_v63, %v7575_v3  ;;  %v3253_v21 = vld [vmem:[#allocation7 + $0x858] sm:$0xff]  ;;  %v3357_v31 = vld [vmem:[#allocation7 + $0x910] sm:$0xff] }
 0x442   : > { %v7646_v2 = vadd.f32 %v2968_v59, %v2938_v44  ;;  %v3081_v12 = vadd.f32 %v7522_v45, %v3050_v38  ;;  %v3163_v62 = vmul.f32 %v3131_v25, %v7554_v54  ;;  %v3164_v56 = vmul.f32 %v3132_v52, %v7562_v39  ;;  %v3358_v35 = vld [vmem:[#allocation7 + $0x918] sm:$0xff]  ;;  %v3365_v59 = vld [vmem:[#allocation7 + $0x950] sm:$0xff] }
 0x443   : > { %v7651_v36 = vadd.f32 %v2977_v5, %v2946_v26  ;;  %v3090_v6 = vadd.f32 %v7527_v27, %v3058_v17  ;;  %v3171_v33 = vmul.f32 %v3139_v23, %v7570_v51  ;;  %v3172_v63 = vmul.f32 %v3140_v15, %v7575_v3  ;;  %v3366_v38 = vld [vmem:[#allocation7 + $0x958] sm:$0xff]  ;;  %v2364_v5 = vld [vmem:[#allocation7 + $0xd0] sm:$0xff] }
 0x444   : > { %v7656_v44 = vadd.f32 %v3081_v12, %v3051_v28  ;;  %v3194_v45 = vadd.f32 %v7529_v43, %v3163_v62  ;;  %v3276_v25 = vmul.f32 %v3244_v42, %v7554_v54  ;;  %v3277_v52 = vmul.f32 %v3245_v29, %v7562_v39  ;;  %v2365_v17 = vld [vmem:[#allocation7 + $0xd8] sm:$0xff]  ;;  %v2356_v12 = vld [vmem:[#allocation7 + $0x90] sm:$0xff] }
 0x445   : > { %v7661_v26 = vadd.f32 %v3090_v6, %v3059_v9  ;;  %v3203_v27 = vadd.f32 %v7533_v14, %v3171_v33  ;;  %v3284_v23 = vmul.f32 %v3252_v10, %v7570_v51  ;;  %v3285_v15 = vmul.f32 %v3253_v21, %v7575_v3  ;;  %v2357_v62 = vld [vmem:[#allocation7 + $0x98] sm:$0xff]  ;;  %v2477_v6 = vld [vmem:[#allocation7 + $0x1d0] sm:$0xff] }
 0x446   : > { %v7666_v28 = vadd.f32 %v3194_v45, %v3164_v56  ;;  %v3307_v43 = vadd.f32 %v7538_v48, %v3276_v25  ;;  %v3389_v42 = vmul.f32 %v3357_v31, %v7554_v54  ;;  %v3390_v29 = vmul.f32 %v3358_v35, %v7562_v39  ;;  %v2478_v33 = vld [vmem:[#allocation7 + $0x1d8] sm:$0xff]  ;;  %v2467_v31 = vld [vmem:[#allocation7 + $0x180] sm:$0xff]  ;;  %v2469_v45 = vld [vmem:[#allocation7 + $0x190] sm:$0xff] }
 0x447   : > { %v7671_v9 = vadd.f32 %v3203_v27, %v3172_v63  ;;  %v3316_v14 = vadd.f32 %v7544_v13, %v3284_v23  ;;  %v3397_v10 = vmul.f32 %v3365_v59, %v7570_v51  ;;  %v3398_v21 = vmul.f32 %v3366_v38, %v7575_v3  ;;  %v2468_v3 = vld [vmem:[#allocation7 + $0x188] sm:$0xff]  ;;  %v2470_v25 = vld [vmem:[#allocation7 + $0x198] sm:$0xff]  ;;  %v2588_v27 = vld [vmem:[#allocation7 + $0x2c0] sm:$0xff] }
 0x448   : > { %v7676_v56 = vadd.f32 %v3307_v43, %v3277_v52  ;;  %v3420_v48 = vadd.f32 %v7546_v47, %v3389_v42  ;;  %v2396_v54 = vmul.f32 %v2364_v5, %v7611_v32  ;;  %v2397_v39 = vmul.f32 %v2365_v17, %v7617_v55  ;;  %v2589_v23 = vld [vmem:[#allocation7 + $0x2c8] sm:$0xff]  ;;  %v2590_v43 = vld [vmem:[#allocation7 + $0x2d0] sm:$0xff]  ;;  %v2591_v42 = vld [vmem:[#allocation7 + $0x2d8] sm:$0xff] }
 0x449   : > { %v7681_v35 = vadd.f32 %v3316_v14, %v3285_v15  ;;  %v3429_v63 = vadd.f32 %v7550_v34, %v3397_v10  ;;  %v2388_v13 = vmul.f32 %v2356_v12, %v7599_v24  ;;  %v2389_v51 = vmul.f32 %v2357_v62, %v7605_v60  ;;  %v2581_v10 = vld [vmem:[#allocation7 + $0x288] sm:$0xff] }
 0x44a   : > { %v7686_v52 = vadd.f32 %v3420_v48, %v3390_v29  ;;  %v2430_v47 = vadd.f32 %v7557_v1, %v2396_v54  ;;  %v2509_v59 = vmul.f32 %v2477_v6, %v7611_v32  ;;  %v2510_v38 = vmul.f32 %v2478_v33, %v7617_v55  ;;  %v2580_v29 = vld [vmem:[#allocation7 + $0x280] sm:$0xff]  ;;  %v2583_v33 = vld [vmem:[#allocation7 + $0x298] sm:$0xff]  ;;  %v2702_v54 = vld [vmem:[#allocation7 + $0x3c8] sm:$0xff] }
 0x44b   : > { %v7691_v15 = vadd.f32 %v3429_v63, %v3398_v21  ;;  %v2421_v34 = vadd.f32 %v7565_v8, %v2388_v13  ;;  %v2542_v5 = vadd.f32 %v7568_v49, %v7560_v22  ;;  %v2499_v17 = vmul.f32 %v2467_v31, %v7483_v41  ;;  %v2582_v21 = vld [vmem:[#allocation7 + $0x290] sm:$0xff]  ;;  %v2701_v48 = vld [vmem:[#allocation7 + $0x3c0] sm:$0xff] }
 0x44c   : > { %v7697_v12 = vadd.f32 %v2430_v47, %v2397_v39  ;;  %v2500_v1 = vmul.f32 %v2468_v3, %v7490_v61  ;;  %v2501_v62 = vmul.f32 %v2469_v45, %v7599_v24  ;;  %v2502_v14 = vmul.f32 %v2470_v25, %v7605_v60  ;;  %v2703_v3 = vld [vmem:[#allocation7 + $0x3d0] sm:$0xff]  ;;  %v2704_v45 = vld [vmem:[#allocation7 + $0x3d8] sm:$0xff] }
 0x44d   : > { %v7702_v6 = vadd.f32 %v2421_v34, %v2389_v51  ;;  %v2543_v8 = vadd.f32 %v2542_v5, %v2509_v59  ;;  %v2620_v22 = vmul.f32 %v2588_v27, %v7495_v37  ;;  %v2621_v49 = vmul.f32 %v2589_v23, %v7500_v30  ;;  %v2693_v27 = vld [vmem:[#allocation7 + $0x380] sm:$0xff]  ;;  %v2694_v23 = vld [vmem:[#allocation7 + $0x388] sm:$0xff] }
 0x44e   : > { %v2533_v39 = vadd.f32 %v2500_v1, %v2499_v17  ;;  %v2622_v31 = vmul.f32 %v2590_v43, %v7611_v32  ;;  %v2623_v63 = vmul.f32 %v2591_v42, %v7617_v55  ;;  %v2612_v13 = vmul.f32 %v2580_v29, %v7483_v41  ;;  %v2695_v42 = vld [vmem:[#allocation7 + $0x390] sm:$0xff]  ;;  %v2696_v29 = vld [vmem:[#allocation7 + $0x398] sm:$0xff] }
 0x44f   : > { %8452 = vst [vmem:[#allocation34_spill] sm:$0xff] %v7702_v6  ;;  %v7709_v25 = vadd.f32 %v2543_v8, %v2510_v38  ;;  %v2655_v51 = vadd.f32 %v2621_v49, %v2620_v22  ;;  %v2613_v47 = vmul.f32 %v2581_v10, %v7490_v61  ;;  %v2614_v59 = vmul.f32 %v2582_v21, %v7599_v24  ;;  %v2814_v10 = vld [vmem:[#allocation7 + $0x4c0] sm:$0xff]  ;;  %v2815_v22 = vld [vmem:[#allocation7 + $0x4c8] sm:$0xff] }
 0x450   : > { %v2534_v34 = vadd.f32 %v2533_v39, %v2501_v62  ;;  %v2615_v5 = vmul.f32 %v2583_v33, %v7605_v60  ;;  %v2733_v17 = vmul.f32 %v2701_v48, %v7495_v37  ;;  %v2734_v43 = vmul.f32 %v2702_v54, %v7500_v30  ;;  %v2816_v48 = vld [vmem:[#allocation7 + $0x4d0] sm:$0xff]  ;;  %v2817_v39 = vld [vmem:[#allocation7 + $0x4d8] sm:$0xff]  ;;  %v2806_v54 = vld [vmem:[#allocation7 + $0x480] sm:$0xff] }
 0x451   : > { %8453 = vst [vmem:[#allocation43_spill] sm:$0xff] %v7709_v25  ;;  %v2656_v1 = vadd.f32 %v2655_v51, %v2622_v31  ;;  %v2646_v6 = vadd.f32 %v2613_v47, %v2612_v13  ;;  %v2735_v38 = vmul.f32 %v2703_v3, %v7611_v32  ;;  %v2736_v8 = vmul.f32 %v2704_v45, %v7617_v55  ;;  %v2807_v45 = vld [vmem:[#allocation7 + $0x488] sm:$0xff]  ;;  %v2927_v51 = vld [vmem:[#allocation7 + $0x5c0] sm:$0xff] }
 0x452   : > { %v7718_v21 = vadd.f32 %v2534_v34, %v2502_v14  ;;  %v2768_v49 = vadd.f32 %v2734_v43, %v2733_v17  ;;  %v2725_v62 = vmul.f32 %v2693_v27, %v7483_v41  ;;  %v2726_v33 = vmul.f32 %v2694_v23, %v7490_v61  ;;  %v2808_v17 = vld [vmem:[#allocation7 + $0x490] sm:$0xff]  ;;  %v2809_v23 = vld [vmem:[#allocation7 + $0x498] sm:$0xff]  ;;  %v2928_v43 = vld [vmem:[#allocation7 + $0x5c8] sm:$0xff] }
 0x453   : > { %v7722_v25 = vadd.f32 %v2656_v1, %v2623_v63  ;;  %v2647_v31 = vadd.f32 %v2646_v6, %v2614_v59  ;;  %v2727_v13 = vmul.f32 %v2695_v42, %v7599_v24  ;;  %v2728_v3 = vmul.f32 %v2696_v29, %v7605_v60  ;;  %v2929_v42 = vld [vmem:[#allocation7 + $0x5d0] sm:$0xff] }
 0x454   : > { %8454 = vst [vmem:[#allocation36_spill] sm:$0xff] %v7718_v21  ;;  %v2769_v47 = vadd.f32 %v2768_v49, %v2735_v38  ;;  %v2759_v14 = vadd.f32 %v2726_v33, %v2725_v62  ;;  %v2846_v34 = vmul.f32 %v2814_v10, %v7495_v37  ;;  %v2847_v27 = vmul.f32 %v2815_v22, %v7500_v30  ;;  %v2930_v49 = vld [vmem:[#allocation7 + $0x5d8] sm:$0xff]  ;;  %v2919_v22 = vld [vmem:[#allocation7 + $0x580] sm:$0xff]  ;;  %v2920_v62 = vld [vmem:[#allocation7 + $0x588] sm:$0xff] }
 0x455   : > { %8455 = vst [vmem:[#allocation37_spill] sm:$0xff] %v7722_v25  ;;  %v7728_v21 = vadd.f32 %v2647_v31, %v2615_v5  ;;  %v2848_v63 = vmul.f32 %v2816_v48, %v7611_v32  ;;  %v2849_v6 = vmul.f32 %v2817_v39, %v7617_v55  ;;  %v2838_v59 = vmul.f32 %v2806_v54, %v7483_v41  ;;  %v2921_v31 = vld [vmem:[#allocation7 + $0x590] sm:$0xff]  ;;  %v2922_v54 = vld [vmem:[#allocation7 + $0x598] sm:$0xff] }
 0x456   : > { %v7733_v29 = vadd.f32 %v2769_v47, %v2736_v8  ;;  %v2760_v1 = vadd.f32 %v2759_v14, %v2727_v13  ;;  %v2881_v38 = vadd.f32 %v2847_v27, %v2846_v34  ;;  %v2839_v10 = vmul.f32 %v2807_v45, %v7490_v61  ;;  %v3040_v45 = vld [vmem:[#allocation7 + $0x6c0] sm:$0xff]  ;;  %v3041_v14 = vld [vmem:[#allocation7 + $0x6c8] sm:$0xff] }
 0x457   : > { %8456 = vst [vmem:[#allocation38_spill] sm:$0xff] %v7728_v21  ;;  %v2840_v33 = vmul.f32 %v2808_v17, %v7599_v24  ;;  %v2841_v5 = vmul.f32 %v2809_v23, %v7605_v60  ;;  %v2959_v48 = vmul.f32 %v2927_v51, %v7495_v37  ;;  %v2960_v39 = vmul.f32 %v2928_v43, %v7500_v30  ;;  %v3042_v51 = vld [vmem:[#allocation7 + $0x6d0] sm:$0xff]  ;;  %v3032_v43 = vld [vmem:[#allocation7 + $0x680] sm:$0xff] }
 0x458   : > { %8457 = vst [vmem:[#allocation20_spill] sm:$0xff] %v7733_v29  ;;  %v7740_v21 = vadd.f32 %v2760_v1, %v2728_v3  ;;  %v2882_v8 = vadd.f32 %v2881_v38, %v2848_v63  ;;  %v2872_v13 = vadd.f32 %v2839_v10, %v2838_v59  ;;  %v2961_v47 = vmul.f32 %v2929_v42, %v7611_v32  ;;  %v3043_v29 = vld [vmem:[#allocation7 + $0x6d8] sm:$0xff]  ;;  %v3033_v42 = vld [vmem:[#allocation7 + $0x688] sm:$0xff]  ;;  %v3153_v1 = vld [vmem:[#allocation7 + $0x7c0] sm:$0xff] }
 0x459   : > { %v2962_v34 = vmul.f32 %v2930_v49, %v7617_v55  ;;  %v2994_v27 = vadd.f32 %v2960_v39, %v2959_v48  ;;  %v2951_v17 = vmul.f32 %v2919_v22, %v7483_v41  ;;  %v2952_v23 = vmul.f32 %v2920_v62, %v7490_v61  ;;  %v3034_v48 = vld [vmem:[#allocation7 + $0x690] sm:$0xff]  ;;  %v3035_v62 = vld [vmem:[#allocation7 + $0x698] sm:$0xff]  ;;  %v3154_v39 = vld [vmem:[#allocation7 + $0x7c8] sm:$0xff] }
 0x45a   : > { %8458 = vst [vmem:[#allocation21_spill] sm:$0xff] %v7740_v21  ;;  %v7746_v25 = vadd.f32 %v2882_v8, %v2849_v6  ;;  %v2873_v3 = vadd.f32 %v2872_v13, %v2840_v33  ;;  %v2953_v63 = vmul.f32 %v2921_v31, %v7599_v24  ;;  %v2954_v59 = vmul.f32 %v2922_v54, %v7605_v60  ;;  %v3155_v54 = vld [vmem:[#allocation7 + $0x7d0] sm:$0xff] }
 0x45b   : > { %v2995_v38 = vadd.f32 %v2994_v27, %v2961_v47  ;;  %v2985_v10 = vadd.f32 %v2952_v23, %v2951_v17  ;;  %v3072_v49 = vmul.f32 %v3040_v45, %v7495_v37  ;;  %v3073_v22 = vmul.f32 %v3041_v14, %v7500_v30  ;;  %v3156_v27 = vld [vmem:[#allocation7 + $0x7d8] sm:$0xff]  ;;  %v3145_v14 = vld [vmem:[#allocation7 + $0x780] sm:$0xff]  ;;  %v3146_v17 = vld [vmem:[#allocation7 + $0x788] sm:$0xff] }
 0x45c   : > { %8459 = vst [vmem:[#allocation22_spill] sm:$0xff] %v7746_v25  ;;  %v7752_v21 = vadd.f32 %v2873_v3, %v2841_v5  ;;  %v3074_v6 = vmul.f32 %v3042_v51, %v7611_v32  ;;  %v3075_v33 = vmul.f32 %v3043_v29, %v7617_v55  ;;  %v3064_v31 = vmul.f32 %v3032_v43, %v7483_v41  ;;  %v3147_v3 = vld [vmem:[#allocation7 + $0x790] sm:$0xff]  ;;  %v3148_v43 = vld [vmem:[#allocation7 + $0x798] sm:$0xff] }
 0x45d   : > { %v7757_v8 = vadd.f32 %v2995_v38, %v2962_v34  ;;  %v2986_v13 = vadd.f32 %v2985_v10, %v2953_v63  ;;  %v3107_v47 = vadd.f32 %v3073_v22, %v3072_v49  ;;  %v3065_v45 = vmul.f32 %v3033_v42, %v7490_v61  ;;  %v3266_v42 = vld [vmem:[#allocation7 + $0x8c0] sm:$0xff]  ;;  %v3267_v10 = vld [vmem:[#allocation7 + $0x8c8] sm:$0xff] }
 0x45e   : > { %8460 = vst [vmem:[#allocation44_spill] sm:$0xff] %v7752_v21  ;;  %v3066_v23 = vmul.f32 %v3034_v48, %v7599_v24  ;;  %v3067_v5 = vmul.f32 %v3035_v62, %v7605_v60  ;;  %v3185_v51 = vmul.f32 %v3153_v1, %v7495_v37  ;;  %v3186_v29 = vmul.f32 %v3154_v39, %v7500_v30  ;;  %v3268_v1 = vld [vmem:[#allocation7 + $0x8d0] sm:$0xff]  ;;  %v3258_v39 = vld [vmem:[#allocation7 + $0x880] sm:$0xff] }
 0x45f   : > { %8461 = vst [vmem:[#allocation23_spill] sm:$0xff] %v7757_v8  ;;  %v7764_v21 = vadd.f32 %v2986_v13, %v2954_v59  ;;  %v3108_v34 = vadd.f32 %v3107_v47, %v3074_v6  ;;  %v3098_v63 = vadd.f32 %v3065_v45, %v3064_v31  ;;  %v3187_v38 = vmul.f32 %v3155_v54, %v7611_v32  ;;  %v3269_v8 = vld [vmem:[#allocation7 + $0x8d8] sm:$0xff]  ;;  %v3259_v54 = vld [vmem:[#allocation7 + $0x888] sm:$0xff]  ;;  %v3379_v13 = vld [vmem:[#allocation7 + $0x9c0] sm:$0xff] }
 0x460   : > { %v3188_v49 = vmul.f32 %v3156_v27, %v7617_v55  ;;  %v3220_v22 = vadd.f32 %v3186_v29, %v3185_v51  ;;  %v3177_v48 = vmul.f32 %v3145_v14, %v7483_v41  ;;  %v3178_v62 = vmul.f32 %v3146_v17, %v7490_v61  ;;  %v3260_v51 = vld [vmem:[#allocation7 + $0x890] sm:$0xff]  ;;  %v3261_v17 = vld [vmem:[#allocation7 + $0x898] sm:$0xff]  ;;  %v3380_v29 = vld [vmem:[#allocation7 + $0x9c8] sm:$0xff] }
 0x461   : > { %8462 = vst [vmem:[#allocation24_spill] sm:$0xff] %v7764_v21  ;;  %v7770_v25 = vadd.f32 %v3108_v34, %v3075_v33  ;;  %v3099_v59 = vadd.f32 %v3098_v63, %v3066_v23  ;;  %v3179_v6 = vmul.f32 %v3147_v3, %v7599_v24  ;;  %v3180_v31 = vmul.f32 %v3148_v43, %v7605_v60  ;;  %v3381_v43 = vld [vmem:[#allocation7 + $0x9d0] sm:$0xff] }
 0x462   : > { %v3221_v47 = vadd.f32 %v3220_v22, %v3187_v38  ;;  %v3211_v45 = vadd.f32 %v3178_v62, %v3177_v48  ;;  %v3298_v27 = vmul.f32 %v3266_v42, %v7495_v37  ;;  %v3299_v14 = vmul.f32 %v3267_v10, %v7500_v30  ;;  %v3382_v22 = vld [vmem:[#allocation7 + $0x9d8] sm:$0xff]  ;;  %v3371_v10 = vld [vmem:[#allocation7 + $0x980] sm:$0xff]  ;;  %v3372_v48 = vld [vmem:[#allocation7 + $0x988] sm:$0xff] }
 0x463   : > { %v7776_v21 = vadd.f32 %v3099_v59, %v3067_v5  ;;  %v3300_v33 = vmul.f32 %v3268_v1, %v7611_v32  ;;  %v3301_v23 = vmul.f32 %v3269_v8, %v7617_v55  ;;  %v3290_v3 = vmul.f32 %v3258_v39, %v7483_v41  ;;  %v3373_v59 = vld [vmem:[#allocation7 + $0x990] sm:$0xff] }
 0x464   : > { %v7781_v34 = vadd.f32 %v3221_v47, %v3188_v49  ;;  %v3212_v63 = vadd.f32 %v3211_v45, %v3179_v6  ;;  %v3333_v38 = vadd.f32 %v3299_v14, %v3298_v27  ;;  %v3291_v42 = vmul.f32 %v3259_v54, %v7490_v61  ;;  %v3374_v45 = vld [vmem:[#allocation7 + $0x998] sm:$0xff] }
 0x465   : > { %8463 = vst [vmem:[#allocation28_spill] sm:$0xff] %v7776_v21  ;;  %v3292_v62 = vmul.f32 %v3260_v51, %v7599_v24  ;;  %v3293_v5 = vmul.f32 %v3261_v17, %v7605_v60  ;;  %v3411_v1 = vmul.f32 %v3379_v13, %v7495_v37  ;;  %v3412_v8 = vmul.f32 %v3380_v29, %v7500_v30 }
 0x466   : > { %8464 = vst [vmem:[#allocation25_spill] sm:$0xff] %v7781_v34  ;;  %v7788_v39 = vadd.f32 %v3212_v63, %v3180_v31  ;;  %v3334_v49 = vadd.f32 %v3333_v38, %v3300_v33  ;;  %v3324_v47 = vadd.f32 %v3291_v42, %v3290_v3  ;;  %v3413_v6 = vmul.f32 %v3381_v43, %v7611_v32  ;;  %v2342_v38 = vld [vmem:[#allocation7 + $0x20] sm:$0xff] }
 0x467   : > { %v3414_v54 = vmul.f32 %v3382_v22, %v7617_v55  ;;  %v3446_v27 = vadd.f32 %v3412_v8, %v3411_v1  ;;  %v3403_v14 = vmul.f32 %v3371_v10, %v7483_v41  ;;  %v3404_v51 = vmul.f32 %v3372_v48, %v7490_v61  ;;  %v2343_v10 = vld [vmem:[#allocation7 + $0x28] sm:$0xff]  ;;  %v2568_v48 = vld [vmem:[#allocation7 + $0x220] sm:$0xff] }
 0x468   : > { %8465 = vst [vmem:[#allocation26_spill] sm:$0xff] %v7788_v39  ;;  %v7794_v17 = vadd.f32 %v3334_v49, %v3301_v23  ;;  %v3325_v37 = vadd.f32 %v3324_v47, %v3292_v62  ;;  %v3405_v30 = vmul.f32 %v3373_v59, %v7599_v24  ;;  %v3406_v31 = vmul.f32 %v3374_v45, %v7605_v60  ;;  %v2455_v24 = vld [vmem:[#allocation7 + $0x120] sm:$0xff]  ;;  %v2351_v47 = vld [vmem:[#allocation7 + $0x68] sm:$0xff] }
 0x469   : > { %v3447_v13 = vadd.f32 %v3446_v27, %v3413_v6  ;;  %v3437_v29 = vadd.f32 %v3404_v51, %v3403_v14  ;;  %v2350_v1 = vld [vmem:[#allocation7 + $0x60] sm:$0xff]  ;;  %v2456_v6 = vld [vmem:[#allocation7 + $0x128] sm:$0xff] }
 0x46a   : > { %8466 = vst [vmem:[#allocation27_spill] sm:$0xff] %v7794_v17  ;;  %v7798_v33 = vadd.f32 %v3325_v37, %v3293_v5  ;;  %v2682_v39 = vld [vmem:[#allocation7 + $0x328] sm:$0xff] }
 0x46b   : > { %v7800_v32 = vadd.f32 %v3447_v13, %v3414_v54  ;;  %v3438_v3 = vadd.f32 %v3437_v29, %v3405_v30 }
 0x46c   : > { %8467 = vst [vmem:[#allocation29_spill] sm:$0xff] %v7798_v33 }
 0x46d   : > { %8468 = vst [vmem:[#allocation39_spill] sm:$0xff] %v7800_v32  ;;  %v7802_v55 = vadd.f32 %v3438_v3, %v3406_v31  ;;  %v2344_v31 = vld [vmem:[#allocation7 + $0x30] sm:$0xff] }
 0x46f   : > { %8469 = vst [vmem:[#allocation30_spill] sm:$0xff] %v7802_v55  ;;  %v2464_v55 = vld [vmem:[#allocation7 + $0x168] sm:$0xff] }
 0x485   : > { %v2180_v43 = vpop.f32.mrb[24].mxu0 }
 0x486   : > { %v3643_v41 = vadd.f32 %v2180_v43, %v7436_v46  ;;  %v2182_v61 = vpop.f32.mrb[25].mxu0 }
 0x487   : > { %v3644_v23 = vadd.f32 %v2182_v61, %v7436_v46  ;;  %v2184_v63 = vpop.f32.mrb[26].mxu0 }
 0x488   : > { %v7806_v42 = vmax.f32 %v3643_v41, 0.0  ;;  %v3645_v60 = vadd.f32 %v2184_v63, %v7439_v58  ;;  %v2186_v22 = vpop.f32.mrb[27].mxu0 }
 0x489   : > { %v7809_v62 = vmax.f32 %v3644_v23, 0.0  ;;  %v3646_v5 = vadd.f32 %v2186_v22, %v7439_v58 }
 0x48a   : > { %v7812_v8 = vmax.f32 %v3645_v60, 0.0  ;;  %v2286_v59 = vpop.f32.mrb[24].mxu1  ;;  %v2374_v49 = vmul.f32 %v2342_v38, %v7806_v42  ;;  %v2487_v45 = vmul.f32 %v2455_v24, %v7806_v42  ;;  %v7821_v37 = vmul.f32 %v2568_v48, %v7806_v42  ;;  %v2345_v38 = vld [vmem:[#allocation7 + $0x38] sm:$0xff] }
 0x48b   : > { %v7816_v54 = vmax.f32 %v3646_v5, 0.0  ;;  %v3651_v27 = vadd.f32 %v2286_v59, %v7436_v46  ;;  %v2288_v14 = vpop.f32.mrb[25].mxu1  ;;  %v2375_v51 = vmul.f32 %v2343_v10, %v7809_v62  ;;  %v2488_v60 = vmul.f32 %v2456_v6, %v7809_v62  ;;  %v2352_v5 = vld [vmem:[#allocation7 + $0x70] sm:$0xff] }
 0x48c   : > { %v3652_v30 = vadd.f32 %v2288_v14, %v7436_v46  ;;  %v2290_v13 = vpop.f32.mrb[26].mxu1  ;;  %v2405_v29 = vadd.f32 %v7589_v50, %v2374_v49  ;;  %v2382_v3 = vmul.f32 %v2350_v1, %v7812_v8  ;;  %v2518_v43 = vadd.f32 %v7592_v19, %v2487_v45  ;;  %v2463_v46 = vld [vmem:[#allocation7 + $0x160] sm:$0xff] }
 0x48d   : > { %v7827_v41 = vmax.f32 %v3651_v27, 0.0  ;;  %v3653_v61 = vadd.f32 %v2290_v13, %v7439_v58  ;;  %v2292_v23 = vpop.f32.mrb[27].mxu1  ;;  %v2190_v63 = vpop.f32.mrb[28].mxu0  ;;  %v2383_v24 = vmul.f32 %v2351_v47, %v7816_v54  ;;  %v2353_v47 = vld [vmem:[#allocation7 + $0x78] sm:$0xff]  ;;  %v2457_v27 = vld [vmem:[#allocation7 + $0x130] sm:$0xff] }
 0x48e   : > { %v7832_v22 = vmax.f32 %v3652_v30, 0.0  ;;  %v3654_v50 = vadd.f32 %v2292_v23, %v7439_v58  ;;  %v3647_v10 = vadd.f32 %v2190_v63, %v7462_v53  ;;  %v2192_v48 = vpop.f32.mrb[29].mxu0  ;;  %v2406_v19 = vadd.f32 %v2405_v29, %v2375_v51  ;;  %v2458_v63 = vld [vmem:[#allocation7 + $0x138] sm:$0xff] }
 0x48f   : > { %v7836_v1 = vmax.f32 %v3653_v61, 0.0  ;;  %v3648_v59 = vadd.f32 %v2192_v48, %v7462_v53  ;;  %v2194_v49 = vpop.f32.mrb[30].mxu0  ;;  %v2376_v45 = vmul.f32 %v2344_v31, %v7827_v41  ;;  %v2414_v6 = vadd.f32 %v7602_v16, %v2382_v3 }
 0x490   : > { %v7841_v14 = vmax.f32 %v3654_v50, 0.0  ;;  %v3649_v58 = vadd.f32 %v2194_v49, %v7475_v57  ;;  %v2196_v30 = vpop.f32.mrb[31].mxu0  ;;  %v2377_v13 = vmul.f32 %v2345_v38, %v7832_v22  ;;  %v2495_v51 = vmul.f32 %v2463_v46, %v7812_v8  ;;  %v2465_v38 = vld [vmem:[#allocation7 + $0x170] sm:$0xff] }
 0x491   : > { %v7846_v29 = vmax.f32 %v3647_v10, 0.0  ;;  %v3650_v61 = vadd.f32 %v2196_v30, %v7475_v57  ;;  %v2407_v23 = vadd.f32 %v2406_v19, %v2376_v45  ;;  %v2384_v31 = vmul.f32 %v2352_v5, %v7836_v1  ;;  %v2466_v5 = vld [vmem:[#allocation7 + $0x178] sm:$0xff] }
 0x492   : > { %v7850_v48 = vmax.f32 %v3648_v59, 0.0  ;;  %v2296_v16 = vpop.f32.mrb[28].mxu1  ;;  %v2385_v3 = vmul.f32 %v2353_v47, %v7841_v14  ;;  %v2415_v50 = vadd.f32 %v2414_v6, %v2383_v24  ;;  %v2489_v49 = vmul.f32 %v2457_v27, %v7827_v41  ;;  %v2569_v6 = vld [vmem:[#allocation7 + $0x228] sm:$0xff] }
 0x493   : > { %v7854_v32 = vmax.f32 %v3649_v58, 0.0  ;;  %v7856_v46 = vmax.f32 %v3650_v61, 0.0  ;;  %v3655_v10 = vadd.f32 %v2296_v16, %v7462_v53  ;;  %v2298_v19 = vpop.f32.mrb[29].mxu1  ;;  %v2408_v45 = vadd.f32 %v2407_v23, %v2377_v13  ;;  %v2570_v13 = vld [vmem:[#allocation7 + $0x230] sm:$0xff] }
 0x494   : > { %v3656_v59 = vadd.f32 %v2298_v19, %v7462_v53  ;;  %v2300_v30 = vpop.f32.mrb[30].mxu1  ;;  %v2416_v33 = vadd.f32 %v2415_v50, %v2384_v31  ;;  %v2490_v47 = vmul.f32 %v2458_v63, %v7832_v22  ;;  %v2519_v24 = vadd.f32 %v2518_v43, %v2488_v60  ;;  %v2571_v63 = vld [vmem:[#allocation7 + $0x238] sm:$0xff]  ;;  %v2576_v43 = vld [vmem:[#allocation7 + $0x260] sm:$0xff]  ;;  %v2577_v60 = vld [vmem:[#allocation7 + $0x268] sm:$0xff] }
 0x495   : > { %v7861_v27 = vmax.f32 %v3655_v10, 0.0  ;;  %v3657_v58 = vadd.f32 %v2300_v30, %v7475_v57  ;;  %v2302_v17 = vpop.f32.mrb[31].mxu1  ;;  %2409 = vadd.xlane.f32.xlu1 %v2408_v45  ;;  %v2496_v61 = vmul.f32 %v2464_v55, %v7816_v54  ;;  %v2497_v16 = vmul.f32 %v2465_v38, %v7836_v1  ;;  %v2578_v30 = vld [vmem:[#allocation7 + $0x270] sm:$0xff]  ;;  %v2681_v38 = vld [vmem:[#allocation7 + $0x320] sm:$0xff] }
 0x496   : > { %v3658_v23 = vadd.f32 %v2302_v17, %v7475_v57  ;;  %v2417_v53 = vadd.f32 %v2416_v33, %v2385_v3  ;;  %v2520_v19 = vadd.f32 %v2519_v24, %v2489_v49  ;;  %v2498_v31 = vmul.f32 %v2466_v5, %v7841_v14  ;;  %v2579_v3 = vld [vmem:[#allocation7 + $0x278] sm:$0xff]  ;;  %v2683_v49 = vld [vmem:[#allocation7 + $0x330] sm:$0xff]  ;;  %v2689_v24 = vld [vmem:[#allocation7 + $0x360] sm:$0xff] }
 0x497   : > { %v7868_v50 = vmax.f32 %v3656_v59, 0.0  ;;  %v7870_v10 = vmax.f32 %v3657_v58, 0.0  ;;  %v2527_v45 = vadd.f32 %v7608_v4, %v2495_v51  ;;  %v2601_v55 = vmul.f32 %v2569_v6, %v7809_v62  ;;  %v2690_v6 = vld [vmem:[#allocation7 + $0x368] sm:$0xff] }
 0x498   : > { %v7874_v34 = vmax.f32 %v3658_v23, 0.0  ;;  %2418 = vadd.xlane.f32.xlu0 %v2417_v53  ;;  %v2521_v57 = vadd.f32 %v2520_v19, %v2490_v47  ;;  %v2602_v17 = vmul.f32 %v2570_v13, %v7827_v41  ;;  %v2631_v33 = vadd.f32 %v7596_v18, %v7821_v37  ;;  %v2684_v23 = vld [vmem:[#allocation7 + $0x338] sm:$0xff]  ;;  %v2691_v37 = vld [vmem:[#allocation7 + $0x370] sm:$0xff] }
 0x499   : > { %v2528_v5 = vadd.f32 %v2527_v45, %v2496_v61  ;;  %v2603_v59 = vmul.f32 %v2571_v63, %v7832_v22  ;;  %v2608_v4 = vmul.f32 %v2576_v43, %v7812_v8  ;;  %v2609_v51 = vmul.f32 %v2577_v60, %v7816_v54  ;;  %v2794_v43 = vld [vmem:[#allocation7 + $0x420] sm:$0xff] }
 0x49a   : > { %2522 = vadd.xlane.f32.xlu1 %v2521_v57  ;;  %v2632_v58 = vadd.f32 %v2631_v33, %v2601_v55  ;;  %v2610_v47 = vmul.f32 %v2578_v30, %v7836_v1  ;;  %v2713_v13 = vmul.f32 %v2681_v38, %v7806_v42  ;;  %v2714_v18 = vmul.f32 %v2682_v39, %v7809_v62  ;;  %v2692_v55 = vld [vmem:[#allocation7 + $0x378] sm:$0xff]  ;;  %v2795_v38 = vld [vmem:[#allocation7 + $0x428] sm:$0xff]  ;;  %v2796_v33 = vld [vmem:[#allocation7 + $0x430] sm:$0xff] }
 0x49b   : > { %v2529_v53 = vadd.f32 %v2528_v5, %v2497_v16  ;;  %v2611_v61 = vmul.f32 %v2579_v3, %v7841_v14  ;;  %v2640_v19 = vadd.f32 %v7613_v7, %v2608_v4  ;;  %v2715_v63 = vmul.f32 %v2683_v49, %v7827_v41  ;;  %v2802_v7 = vld [vmem:[#allocation7 + $0x460] sm:$0xff]  ;;  %v2797_v4 = vld [vmem:[#allocation7 + $0x438] sm:$0xff] }
 0x49c   : > { %v2633_v60 = vadd.f32 %v2632_v58, %v2602_v17  ;;  %v2744_v45 = vadd.f32 %v7626_v11, %v2713_v13  ;;  %v2721_v30 = vmul.f32 %v2689_v24, %v7812_v8  ;;  %v2722_v57 = vmul.f32 %v2690_v6, %v7816_v54  ;;  %v2803_v58 = vld [vmem:[#allocation7 + $0x468] sm:$0xff]  ;;  %v2804_v24 = vld [vmem:[#allocation7 + $0x470] sm:$0xff] }
 0x49d   : > { %v2530_v39 = vadd.f32 %v2529_v53, %v2498_v31  ;;  %v2641_v21 = vadd.f32 %v2640_v19, %v2609_v51  ;;  %v2716_v16 = vmul.f32 %v2684_v23, %v7832_v22  ;;  %v2723_v3 = vmul.f32 %v2691_v37, %v7836_v1  ;;  %v2805_v23 = vld [vmem:[#allocation7 + $0x478] sm:$0xff]  ;;  %v2907_v53 = vld [vmem:[#allocation7 + $0x520] sm:$0xff]  ;;  %v2908_v19 = vld [vmem:[#allocation7 + $0x528] sm:$0xff] }
 0x49e   : > { %v2634_v5 = vadd.f32 %v2633_v60, %v2603_v59  ;;  %v2745_v49 = vadd.f32 %v2744_v45, %v2714_v18  ;;  %v2753_v17 = vadd.f32 %v7631_v20, %v2721_v30  ;;  %v2826_v11 = vmul.f32 %v2794_v43, %v7806_v42  ;;  %v2909_v43 = vld [vmem:[#allocation7 + $0x530] sm:$0xff] }
 0x49f   : > { %2531 = vadd.xlane.f32.xlu0 %v2530_v39  ;;  %v2642_v6 = vadd.f32 %v2641_v21, %v2610_v47  ;;  %v2724_v13 = vmul.f32 %v2692_v55, %v7841_v14  ;;  %v2827_v31 = vmul.f32 %v2795_v38, %v7809_v62  ;;  %v2828_v51 = vmul.f32 %v2796_v33, %v7827_v41  ;;  %v2915_v55 = vld [vmem:[#allocation7 + $0x560] sm:$0xff]  ;;  %v2917_v39 = vld [vmem:[#allocation7 + $0x570] sm:$0xff] }
 0x4a0   : > { %2635 = vadd.xlane.f32.xlu1 %v2634_v5  ;;  %v2746_v37 = vadd.f32 %v2745_v49, %v2715_v63  ;;  %v2754_v59 = vadd.f32 %v2753_v17, %v2722_v57  ;;  %v2857_v18 = vadd.f32 %v7636_v40, %v2826_v11  ;;  %v2834_v20 = vmul.f32 %v2802_v7, %v7812_v8  ;;  %v2910_v57 = vld [vmem:[#allocation7 + $0x538] sm:$0xff]  ;;  %v2916_v40 = vld [vmem:[#allocation7 + $0x568] sm:$0xff]  ;;  %v3020_v17 = vld [vmem:[#allocation7 + $0x620] sm:$0xff] }
 0x4a1   : > { %v2643_v60 = vadd.f32 %v2642_v6, %v2611_v61  ;;  %v2829_v21 = vmul.f32 %v2797_v4, %v7832_v22  ;;  %v2835_v47 = vmul.f32 %v2803_v58, %v7816_v54  ;;  %v2836_v45 = vmul.f32 %v2804_v24, %v7836_v1  ;;  %v2918_v11 = vld [vmem:[#allocation7 + $0x578] sm:$0xff]  ;;  %v3021_v58 = vld [vmem:[#allocation7 + $0x628] sm:$0xff]  ;;  %v3022_v24 = vld [vmem:[#allocation7 + $0x630] sm:$0xff] }
 0x4a2   : > { %v2747_v30 = vadd.f32 %v2746_v37, %v2716_v16  ;;  %v2755_v38 = vadd.f32 %v2754_v59, %v2723_v3  ;;  %v2858_v33 = vadd.f32 %v2857_v18, %v2827_v31  ;;  %v2866_v63 = vadd.f32 %v7641_v0, %v2834_v20  ;;  %v3028_v59 = vld [vmem:[#allocation7 + $0x660] sm:$0xff] }
 0x4a3   : > { %2644 = vadd.xlane.f32.xlu0 %v2643_v60  ;;  %v2837_v7 = vmul.f32 %v2805_v23, %v7841_v14  ;;  %v2939_v61 = vmul.f32 %v2907_v53, %v7806_v42  ;;  %v2940_v5 = vmul.f32 %v2908_v19, %v7809_v62  ;;  %v2941_v49 = vmul.f32 %v2909_v43, %v7827_v41  ;;  %v3029_v19 = vld [vmem:[#allocation7 + $0x668] sm:$0xff]  ;;  %v3030_v43 = vld [vmem:[#allocation7 + $0x670] sm:$0xff] }
 0x4a4   : > { %2748 = vadd.xlane.f32.xlu1 %v2747_v30  ;;  %v2756_v4 = vadd.f32 %v2755_v38, %v2724_v13  ;;  %v2859_v16 = vadd.f32 %v2858_v33, %v2828_v51  ;;  %v2867_v3 = vadd.f32 %v2866_v63, %v2835_v47  ;;  %v2947_v0 = vmul.f32 %v2915_v55, %v7812_v8  ;;  %v3023_v51 = vld [vmem:[#allocation7 + $0x638] sm:$0xff]  ;;  %v3133_v30 = vld [vmem:[#allocation7 + $0x720] sm:$0xff]  ;;  %v3134_v63 = vld [vmem:[#allocation7 + $0x728] sm:$0xff] }
 0x4a5   : > { %v2942_v6 = vmul.f32 %v2910_v57, %v7832_v22  ;;  %v2970_v31 = vadd.f32 %v7646_v2, %v2939_v61  ;;  %v2948_v23 = vmul.f32 %v2916_v40, %v7816_v54  ;;  %v2949_v37 = vmul.f32 %v2917_v39, %v7836_v1  ;;  %v3135_v57 = vld [vmem:[#allocation7 + $0x730] sm:$0xff] }
 0x4a6   : > { %v2860_v18 = vadd.f32 %v2859_v16, %v2829_v21  ;;  %v2868_v20 = vadd.f32 %v2867_v3, %v2836_v45  ;;  %v2979_v13 = vadd.f32 %v7651_v36, %v2947_v0  ;;  %v3052_v53 = vmul.f32 %v3020_v17, %v7806_v42  ;;  %v3031_v36 = vld [vmem:[#allocation7 + $0x678] sm:$0xff]  ;;  %v3143_v0 = vld [vmem:[#allocation7 + $0x770] sm:$0xff] }
 0x4a7   : > { %2757 = vadd.xlane.f32.xlu0 %v2756_v4  ;;  %v2971_v60 = vadd.f32 %v2970_v31, %v2940_v5  ;;  %v2950_v47 = vmul.f32 %v2918_v11, %v7841_v14  ;;  %v3053_v2 = vmul.f32 %v3021_v58, %v7809_v62  ;;  %v3054_v55 = vmul.f32 %v3022_v24, %v7827_v41  ;;  %v3136_v17 = vld [vmem:[#allocation7 + $0x738] sm:$0xff]  ;;  %v3142_v11 = vld [vmem:[#allocation7 + $0x768] sm:$0xff] }
 0x4a8   : > { %2861 = vadd.xlane.f32.xlu1 %v2860_v18  ;;  %v2869_v38 = vadd.f32 %v2868_v20, %v2837_v7  ;;  %v2980_v21 = vadd.f32 %v2979_v13, %v2948_v23  ;;  %v3083_v45 = vadd.f32 %v7656_v44, %v3052_v53  ;;  %v3060_v33 = vmul.f32 %v3028_v59, %v7812_v8  ;;  %v3141_v44 = vld [vmem:[#allocation7 + $0x760] sm:$0xff]  ;;  %v3247_v13 = vld [vmem:[#allocation7 + $0x828] sm:$0xff] }
 0x4a9   : > { %v2972_v40 = vadd.f32 %v2971_v60, %v2941_v49  ;;  %v3055_v39 = vmul.f32 %v3023_v51, %v7832_v22  ;;  %v3061_v61 = vmul.f32 %v3029_v19, %v7816_v54  ;;  %v3062_v5 = vmul.f32 %v3030_v43, %v7836_v1  ;;  %v3246_v23 = vld [vmem:[#allocation7 + $0x820] sm:$0xff]  ;;  %v3248_v51 = vld [vmem:[#allocation7 + $0x830] sm:$0xff] }
 0x4aa   : > { %v2981_v4 = vadd.f32 %v2980_v21, %v2949_v37  ;;  %v3084_v16 = vadd.f32 %v3083_v45, %v3053_v2  ;;  %v3092_v7 = vadd.f32 %v7661_v26, %v3060_v33  ;;  %v3165_v3 = vmul.f32 %v3133_v30, %v7806_v42  ;;  %v3144_v26 = vld [vmem:[#allocation7 + $0x778] sm:$0xff]  ;;  %v3254_v60 = vld [vmem:[#allocation7 + $0x860] sm:$0xff]  ;;  %v3256_v21 = vld [vmem:[#allocation7 + $0x870] sm:$0xff] }
 0x4ab   : > { %2870 = vadd.xlane.f32.xlu0 %v2869_v38  ;;  %v2973_v58 = vadd.f32 %v2972_v40, %v2942_v6  ;;  %v3063_v49 = vmul.f32 %v3031_v36, %v7841_v14  ;;  %v3166_v24 = vmul.f32 %v3134_v63, %v7809_v62  ;;  %v3167_v31 = vmul.f32 %v3135_v57, %v7827_v41  ;;  %v3359_v57 = vld [vmem:[#allocation7 + $0x920] sm:$0xff] }
 0x4ac   : > { %v2982_v59 = vadd.f32 %v2981_v4, %v2950_v47  ;;  %v3085_v18 = vadd.f32 %v3084_v16, %v3054_v55  ;;  %v3093_v37 = vadd.f32 %v3092_v7, %v3061_v61  ;;  %v3196_v20 = vadd.f32 %v7666_v28, %v3165_v3  ;;  %v3249_v55 = vld [vmem:[#allocation7 + $0x838] sm:$0xff]  ;;  %v3255_v28 = vld [vmem:[#allocation7 + $0x868] sm:$0xff]  ;;  %v3361_v16 = vld [vmem:[#allocation7 + $0x930] sm:$0xff] }
 0x4ad   : > { %2974 = vadd.xlane.f32.xlu1 %v2973_v58  ;;  %v3168_v53 = vmul.f32 %v3136_v17, %v7832_v22  ;;  %v3173_v6 = vmul.f32 %v3141_v44, %v7812_v8  ;;  %v3174_v19 = vmul.f32 %v3142_v11, %v7816_v54  ;;  %v3175_v43 = vmul.f32 %v3143_v0, %v7836_v1  ;;  %v3360_v4 = vld [vmem:[#allocation7 + $0x928] sm:$0xff]  ;;  %v3367_v11 = vld [vmem:[#allocation7 + $0x960] sm:$0xff] }
 0x4ae   : > { %v3086_v2 = vadd.f32 %v3085_v18, %v3055_v39  ;;  %v3094_v30 = vadd.f32 %v3093_v37, %v3062_v5  ;;  %v3197_v47 = vadd.f32 %v3196_v20, %v3166_v24  ;;  %v3278_v38 = vmul.f32 %v3246_v23, %v7806_v42  ;;  %v3257_v5 = vld [vmem:[#allocation7 + $0x878] sm:$0xff]  ;;  %v3369_v23 = vld [vmem:[#allocation7 + $0x970] sm:$0xff] }
 0x4af   : > { %2983 = vadd.xlane.f32.xlu0 %v2982_v59  ;;  %v3176_v45 = vmul.f32 %v3144_v26, %v7841_v14  ;;  %v3205_v36 = vadd.f32 %v7671_v9, %v3173_v6  ;;  %v3279_v33 = vmul.f32 %v3247_v13, %v7809_v62  ;;  %v3280_v63 = vmul.f32 %v3248_v51, %v7827_v41  ;;  %v3362_v24 = vld [vmem:[#allocation7 + $0x938] sm:$0xff]  ;;  %v2366_v6 = vld [vmem:[#allocation7 + $0xe0] sm:$0xff] }
 0x4b0   : > { %v3095_v40 = vadd.f32 %v3094_v30, %v3063_v49  ;;  %v3198_v61 = vadd.f32 %v3197_v47, %v3167_v31  ;;  %v3309_v39 = vadd.f32 %v7676_v56, %v3278_v38  ;;  %v3286_v17 = vmul.f32 %v3254_v60, %v7812_v8  ;;  %v3368_v31 = vld [vmem:[#allocation7 + $0x968] sm:$0xff]  ;;  %v3370_v26 = vld [vmem:[#allocation7 + $0x978] sm:$0xff]  ;;  %v2358_v30 = vld [vmem:[#allocation7 + $0xa0] sm:$0xff] }
 0x4b1   : > { %3087 = vadd.xlane.f32.xlu1 %v3086_v2  ;;  %v3206_v7 = vadd.f32 %v3205_v36, %v3174_v19  ;;  %v3281_v3 = vmul.f32 %v3249_v55, %v7832_v22  ;;  %v3287_v9 = vmul.f32 %v3255_v28, %v7816_v54  ;;  %v3288_v44 = vmul.f32 %v3256_v21, %v7836_v1  ;;  %v2367_v19 = vld [vmem:[#allocation7 + $0xe8] sm:$0xff]  ;;  %v2479_v36 = vld [vmem:[#allocation7 + $0x1e0] sm:$0xff] }
 0x4b2   : > { %v3199_v0 = vadd.f32 %v3198_v61, %v3168_v53  ;;  %v3310_v58 = vadd.f32 %v3309_v39, %v3279_v33  ;;  %v3318_v49 = vadd.f32 %v7681_v35, %v3286_v17  ;;  %v3391_v56 = vmul.f32 %v3359_v57, %v7806_v42  ;;  %v2368_v42 = vld [vmem:[#allocation7 + $0xf0] sm:$0xff]  ;;  %v2359_v28 = vld [vmem:[#allocation7 + $0xa8] sm:$0xff]  ;;  %v2361_v57 = vld [vmem:[#allocation7 + $0xb8] sm:$0xff] }
 0x4b3   : > { %3096 = vadd.xlane.f32.xlu0 %v3095_v40  ;;  %v3207_v59 = vadd.f32 %v3206_v7, %v3175_v43  ;;  %v3289_v18 = vmul.f32 %v3257_v5, %v7841_v14  ;;  %v3392_v37 = vmul.f32 %v3360_v4, %v7809_v62  ;;  %v3393_v20 = vmul.f32 %v3361_v16, %v7827_v41  ;;  %v2481_v61 = vld [vmem:[#allocation7 + $0x1f0] sm:$0xff]  ;;  %v2471_v4 = vld [vmem:[#allocation7 + $0x1a0] sm:$0xff] }
 0x4b4   : > { %v3311_v13 = vadd.f32 %v3310_v58, %v3280_v63  ;;  %v3319_v51 = vadd.f32 %v3318_v49, %v3287_v9  ;;  %v3422_v53 = vadd.f32 %v7686_v52, %v3391_v56  ;;  %v3399_v35 = vmul.f32 %v3367_v11, %v7812_v8  ;;  %v2369_v52 = vld [vmem:[#allocation7 + $0xf8] sm:$0xff]  ;;  %v2360_v8 = vld [vmem:[#allocation7 + $0xb0] sm:$0xff] }
 0x4b5   : > { %3200 = vadd.xlane.f32.xlu1 %v3199_v0  ;;  %v3208_v60 = vadd.f32 %v3207_v59, %v3176_v45  ;;  %v3394_v43 = vmul.f32 %v3362_v24, %v7832_v22  ;;  %v3400_v2 = vmul.f32 %v3368_v31, %v7816_v54  ;;  %v3401_v62 = vmul.f32 %v3369_v23, %v7836_v1  ;;  %v2472_v0 = vld [vmem:[#allocation7 + $0x1a8] sm:$0xff]  ;;  %v2473_v58 = vld [vmem:[#allocation7 + $0x1b0] sm:$0xff]  ;;  %v2592_v31 = vld [vmem:[#allocation7 + $0x2e0] sm:$0xff] }
 0x4b6   : > { %v3312_v41 = vadd.f32 %v3311_v13, %v3281_v3  ;;  %v3320_v47 = vadd.f32 %v3319_v51, %v3288_v44  ;;  %v3423_v55 = vadd.f32 %v3422_v53, %v3392_v37  ;;  %v3431_v38 = vadd.f32 %v7691_v15, %v3399_v35  ;;  %v2480_v15 = vld [vmem:[#allocation7 + $0x1e8] sm:$0xff]  ;;  %v8470_v3 = vld [vmem:[#allocation34_spill] sm:$0xff]  ;;  %v2594_v51 = vld [vmem:[#allocation7 + $0x2f0] sm:$0xff] }
 0x4b7   : > { %3209 = vadd.xlane.f32.xlu0 %v3208_v60  ;;  %v3402_v21 = vmul.f32 %v3370_v26, %v7841_v14  ;;  %v2398_v45 = vmul.f32 %v2366_v6, %v7854_v32  ;;  %v2399_v22 = vmul.f32 %v2367_v19, %v7856_v46  ;;  %v2400_v54 = vmul.f32 %v2368_v42, %v7870_v10  ;;  %v2482_v44 = vld [vmem:[#allocation7 + $0x1f8] sm:$0xff]  ;;  %v2593_v13 = vld [vmem:[#allocation7 + $0x2e8] sm:$0xff]  ;;  %v2584_v42 = vld [vmem:[#allocation7 + $0x2a0] sm:$0xff] }
 0x4b8   : > { %v3321_v1 = vadd.f32 %v3320_v47, %v3289_v18  ;;  %v3424_v33 = vadd.f32 %v3423_v55, %v3393_v20  ;;  %v3432_v63 = vadd.f32 %v3431_v38, %v3400_v2  ;;  %v2390_v40 = vmul.f32 %v2358_v30, %v7846_v29  ;;  %v8471_v18 = vld [vmem:[#allocation43_spill] sm:$0xff]  ;;  %v2474_v20 = vld [vmem:[#allocation7 + $0x1b8] sm:$0xff]  ;;  %v8472_v2 = vld [vmem:[#allocation36_spill] sm:$0xff] }
 0x4b9   : > { %3313 = vadd.xlane.f32.xlu1 %v3312_v41  ;;  %v2401_v39 = vmul.f32 %v2369_v52, %v7874_v34  ;;  %v2432_v14 = vadd.f32 %v7697_v12, %v2398_v45  ;;  %v2391_v5 = vmul.f32 %v2359_v28, %v7850_v48  ;;  %v2392_v17 = vmul.f32 %v2360_v8, %v7861_v27  ;;  %v2595_v30 = vld [vmem:[#allocation7 + $0x2f8] sm:$0xff]  ;;  %v2585_v47 = vld [vmem:[#allocation7 + $0x2a8] sm:$0xff]  ;;  %v2586_v55 = vld [vmem:[#allocation7 + $0x2b0] sm:$0xff] }
 0x4ba   : > { %v3425_v16 = vadd.f32 %v3424_v33, %v3394_v43  ;;  %v3433_v7 = vadd.f32 %v3432_v63, %v3401_v62  ;;  %v2423_v9 = vadd.f32 %v8470_v3, %v2390_v40  ;;  %v2511_v11 = vmul.f32 %v2479_v36, %v7854_v32  ;;  %v8473_v36 = vld [vmem:[#allocation37_spill] sm:$0xff]  ;;  %v2706_v63 = vld [vmem:[#allocation7 + $0x3e8] sm:$0xff] }
 0x4bb   : > { %3322 = vadd.xlane.f32.xlu0 %v3321_v1  ;;  %v2433_v49 = vadd.f32 %v2432_v14, %v2399_v22  ;;  %v2393_v24 = vmul.f32 %v2361_v57, %v7868_v50  ;;  %v2512_v12 = vmul.f32 %v2480_v15, %v7856_v46  ;;  %v2513_v56 = vmul.f32 %v2481_v61, %v7870_v10  ;;  %v2587_v33 = vld [vmem:[#allocation7 + $0x2b8] sm:$0xff]  ;;  %v2707_v57 = vld [vmem:[#allocation7 + $0x3f0] sm:$0xff]  ;;  %v2697_v14 = vld [vmem:[#allocation7 + $0x3a0] sm:$0xff] }
 0x4bc   : > { %v3434_v23 = vadd.f32 %v3433_v7, %v3402_v21  ;;  %v2424_v59 = vadd.f32 %v2423_v9, %v2391_v5  ;;  %v2545_v37 = vadd.f32 %v8471_v18, %v2511_v11  ;;  %v2503_v26 = vmul.f32 %v2471_v4, %v7846_v29  ;;  %v2705_v21 = vld [vmem:[#allocation7 + $0x3e0] sm:$0xff]  ;;  %v2698_v3 = vld [vmem:[#allocation7 + $0x3a8] sm:$0xff]  ;;  %v2699_v9 = vld [vmem:[#allocation7 + $0x3b0] sm:$0xff] }
 0x4bd   : > { %3426 = vadd.xlane.f32.xlu1 %v3425_v16  ;;  %v2434_v53 = vadd.f32 %v2433_v49, %v2400_v54  ;;  %v2514_v35 = vmul.f32 %v2482_v44, %v7874_v34  ;;  %v2504_v6 = vmul.f32 %v2472_v0, %v7850_v48  ;;  %v2505_v19 = vmul.f32 %v2473_v58, %v7861_v27  ;;  %v2708_v16 = vld [vmem:[#allocation7 + $0x3f8] sm:$0xff] }
 0x4be   : > { %v2425_v60 = vadd.f32 %v2424_v59, %v2392_v17  ;;  %v2546_v43 = vadd.f32 %v2545_v37, %v2512_v12  ;;  %v2536_v62 = vadd.f32 %v8472_v2, %v2503_v26  ;;  %v2624_v41 = vmul.f32 %v2592_v31, %v7854_v32  ;;  %v8474_v11 = vld [vmem:[#allocation38_spill] sm:$0xff]  ;;  %v8475_v31 = vld [vmem:[#allocation20_spill] sm:$0xff] }
 0x4bf   : > { %3435 = vadd.xlane.f32.xlu0 %v3434_v23  ;;  %v2435_v38 = vadd.f32 %v2434_v53, %v2401_v39  ;;  %v2506_v52 = vmul.f32 %v2474_v20, %v7868_v50  ;;  %v2625_v28 = vmul.f32 %v2593_v13, %v7856_v46  ;;  %v2626_v8 = vmul.f32 %v2594_v51, %v7870_v10  ;;  %v2700_v59 = vld [vmem:[#allocation7 + $0x3b8] sm:$0xff]  ;;  %v2819_v37 = vld [vmem:[#allocation7 + $0x4e8] sm:$0xff]  ;;  %v2820_v20 = vld [vmem:[#allocation7 + $0x4f0] sm:$0xff] }
 0x4c0   : > { %v2426_v45 = vadd.f32 %v2425_v60, %v2393_v24  ;;  %v2547_v22 = vadd.f32 %v2546_v43, %v2513_v56  ;;  %v2537_v54 = vadd.f32 %v2536_v62, %v2504_v6  ;;  %v2658_v1 = vadd.f32 %v8473_v36, %v2624_v41  ;;  %v2818_v24 = vld [vmem:[#allocation7 + $0x4e0] sm:$0xff]  ;;  %v2821_v43 = vld [vmem:[#allocation7 + $0x4f8] sm:$0xff]  ;;  %v2811_v62 = vld [vmem:[#allocation7 + $0x4a8] sm:$0xff] }
 0x4c1   : > { %2436 = vadd.xlane.f32.xlu1 %v2435_v38  ;;  %v2627_v40 = vmul.f32 %v2595_v30, %v7874_v34  ;;  %v2616_v15 = vmul.f32 %v2584_v42, %v7846_v29  ;;  %v2617_v61 = vmul.f32 %v2585_v47, %v7850_v48  ;;  %v2618_v39 = vmul.f32 %v2586_v55, %v7861_v27  ;;  %v8476_v42 = vld [vmem:[#allocation21_spill] sm:$0xff]  ;;  %v2932_v36 = vld [vmem:[#allocation7 + $0x5e8] sm:$0xff] }
 0x4c2   : > { %v2548_v5 = vadd.f32 %v2547_v22, %v2514_v35  ;;  %v2538_v17 = vadd.f32 %v2537_v54, %v2505_v19  ;;  %v2659_v4 = vadd.f32 %v2658_v1, %v2625_v28  ;;  %v2737_v7 = vmul.f32 %v2705_v21, %v7854_v32  ;;  %v2810_v35 = vld [vmem:[#allocation7 + $0x4a0] sm:$0xff]  ;;  %v2812_v30 = vld [vmem:[#allocation7 + $0x4b0] sm:$0xff] }
 0x4c3   : > { %2427 = vadd.xlane.f32.xlu0 %v2426_v45  ;;  %v2619_v44 = vmul.f32 %v2587_v33, %v7868_v50  ;;  %v2649_v0 = vadd.f32 %v8474_v11, %v2616_v15  ;;  %v2738_v58 = vmul.f32 %v2706_v63, %v7856_v46  ;;  %v2739_v49 = vmul.f32 %v2707_v57, %v7870_v10  ;;  %v8477_v21 = vld [vmem:[#allocation22_spill] sm:$0xff]  ;;  %v2933_v1 = vld [vmem:[#allocation7 + $0x5f0] sm:$0xff] }
 0x4c4   : > { %v2539_v12 = vadd.f32 %v2538_v17, %v2506_v52  ;;  %v2660_v56 = vadd.f32 %v2659_v4, %v2626_v8  ;;  %v2771_v23 = vadd.f32 %v8475_v31, %v2737_v7  ;;  %v2729_v18 = vmul.f32 %v2697_v14, %v7846_v29  ;;  %v2813_v52 = vld [vmem:[#allocation7 + $0x4b8] sm:$0xff]  ;;  %v2931_v54 = vld [vmem:[#allocation7 + $0x5e0] sm:$0xff]  ;;  %v2925_v7 = vld [vmem:[#allocation7 + $0x5b0] sm:$0xff] }
 0x4c5   : > { %2549 = vadd.xlane.f32.xlu1 %v2548_v5  ;;  %v2650_v26 = vadd.f32 %v2649_v0, %v2617_v61  ;;  %v2740_v13 = vmul.f32 %v2708_v16, %v7874_v34  ;;  %v2730_v51 = vmul.f32 %v2698_v3, %v7850_v48  ;;  %v2731_v53 = vmul.f32 %v2699_v9, %v7861_v27  ;;  %v2923_v15 = vld [vmem:[#allocation7 + $0x5a0] sm:$0xff]  ;;  %v8478_v5 = vld [vmem:[#allocation44_spill] sm:$0xff]  ;;  %v2934_v4 = vld [vmem:[#allocation7 + $0x5f8] sm:$0xff] }
 0x4c6   : > { %v2661_v6 = vadd.f32 %v2660_v56, %v2627_v40  ;;  %v2772_v19 = vadd.f32 %v2771_v23, %v2738_v58  ;;  %v2762_v60 = vadd.f32 %v8476_v42, %v2729_v18  ;;  %v2850_v2 = vmul.f32 %v2818_v24, %v7854_v32  ;;  %v2924_v16 = vld [vmem:[#allocation7 + $0x5a8] sm:$0xff]  ;;  %v3044_v0 = vld [vmem:[#allocation7 + $0x6e0] sm:$0xff]  ;;  %v3046_v23 = vld [vmem:[#allocation7 + $0x6f0] sm:$0xff] }
 0x4c7   : > { %2540 = vadd.xlane.f32.xlu0 %v2539_v12  ;;  %v2651_v41 = vadd.f32 %v2650_v26, %v2618_v39  ;;  %v2732_v47 = vmul.f32 %v2700_v59, %v7868_v50  ;;  %v2851_v55 = vmul.f32 %v2819_v37, %v7856_v46  ;;  %v2852_v38 = vmul.f32 %v2820_v20, %v7870_v10  ;;  %v2926_v12 = vld [vmem:[#allocation7 + $0x5b8] sm:$0xff]  ;;  %v3045_v31 = vld [vmem:[#allocation7 + $0x6e8] sm:$0xff] }
 0x4c8   : > { %v2773_v28 = vadd.f32 %v2772_v19, %v2739_v49  ;;  %v2763_v8 = vadd.f32 %v2762_v60, %v2730_v51  ;;  %v2884_v45 = vadd.f32 %v8477_v21, %v2850_v2  ;;  %v2842_v22 = vmul.f32 %v2810_v35, %v7846_v29  ;;  %v8479_v18 = vld [vmem:[#allocation23_spill] sm:$0xff]  ;;  %v8480_v35 = vld [vmem:[#allocation24_spill] sm:$0xff]  ;;  %v3047_v19 = vld [vmem:[#allocation7 + $0x6f8] sm:$0xff] }
 0x4c9   : > { %2662 = vadd.xlane.f32.xlu1 %v2661_v6  ;;  %v2652_v33 = vadd.f32 %v2651_v41, %v2619_v44  ;;  %v2853_v63 = vmul.f32 %v2821_v43, %v7874_v34  ;;  %v2843_v57 = vmul.f32 %v2811_v62, %v7850_v48  ;;  %v2844_v40 = vmul.f32 %v2812_v30, %v7861_v27  ;;  %v3037_v60 = vld [vmem:[#allocation7 + $0x6a8] sm:$0xff]  ;;  %v3038_v43 = vld [vmem:[#allocation7 + $0x6b0] sm:$0xff] }
 0x4ca   : > { %v2774_v61 = vadd.f32 %v2773_v28, %v2740_v13  ;;  %v2764_v39 = vadd.f32 %v2763_v8, %v2731_v53  ;;  %v2885_v14 = vadd.f32 %v2884_v45, %v2851_v55  ;;  %v2875_v17 = vadd.f32 %v8478_v5, %v2842_v22  ;;  %v3036_v13 = vld [vmem:[#allocation7 + $0x6a0] sm:$0xff]  ;;  %v3039_v28 = vld [vmem:[#allocation7 + $0x6b8] sm:$0xff]  ;;  %v3158_v21 = vld [vmem:[#allocation7 + $0x7e8] sm:$0xff] }
 0x4cb   : > { %2653 = vadd.xlane.f32.xlu0 %v2652_v33  ;;  %v2845_v3 = vmul.f32 %v2813_v52, %v7868_v50  ;;  %v2963_v9 = vmul.f32 %v2931_v54, %v7854_v32  ;;  %v2964_v44 = vmul.f32 %v2932_v36, %v7856_v46  ;;  %v2965_v11 = vmul.f32 %v2933_v1, %v7870_v10  ;;  %v3159_v45 = vld [vmem:[#allocation7 + $0x7f0] sm:$0xff]  ;;  %v3149_v33 = vld [vmem:[#allocation7 + $0x7a0] sm:$0xff] }
 0x4cc   : > { %v2765_v58 = vadd.f32 %v2764_v39, %v2732_v47  ;;  %v2886_v49 = vadd.f32 %v2885_v14, %v2852_v38  ;;  %v2876_v24 = vadd.f32 %v2875_v17, %v2843_v57  ;;  %v2955_v56 = vmul.f32 %v2923_v15, %v7846_v29  ;;  %v3157_v47 = vld [vmem:[#allocation7 + $0x7e0] sm:$0xff]  ;;  %v3150_v39 = vld [vmem:[#allocation7 + $0x7a8] sm:$0xff]  ;;  %v3151_v14 = vld [vmem:[#allocation7 + $0x7b0] sm:$0xff] }
 0x4cd   : > { %2775 = vadd.xlane.f32.xlu1 %v2774_v61  ;;  %v2966_v59 = vmul.f32 %v2934_v4, %v7874_v34  ;;  %v2997_v37 = vadd.f32 %v8479_v18, %v2963_v9  ;;  %v2956_v20 = vmul.f32 %v2924_v16, %v7850_v48  ;;  %v2957_v26 = vmul.f32 %v2925_v7, %v7861_v27  ;;  %v3160_v61 = vld [vmem:[#allocation7 + $0x7f8] sm:$0xff]  ;;  %v3270_v7 = vld [vmem:[#allocation7 + $0x8e0] sm:$0xff] }
 0x4ce   : > { %v2887_v51 = vadd.f32 %v2886_v49, %v2853_v63  ;;  %v2877_v53 = vadd.f32 %v2876_v24, %v2844_v40  ;;  %v2988_v6 = vadd.f32 %v8480_v35, %v2955_v56  ;;  %v3076_v42 = vmul.f32 %v3044_v0, %v7854_v32  ;;  %v8481_v40 = vld [vmem:[#allocation28_spill] sm:$0xff] }
 0x4cf   : > { %2766 = vadd.xlane.f32.xlu0 %v2765_v58  ;;  %v2998_v2 = vadd.f32 %v2997_v37, %v2964_v44  ;;  %v2958_v62 = vmul.f32 %v2926_v12, %v7868_v50  ;;  %v3077_v30 = vmul.f32 %v3045_v31, %v7856_v46  ;;  %v3078_v41 = vmul.f32 %v3046_v23, %v7870_v10  ;;  %v3152_v58 = vld [vmem:[#allocation7 + $0x7b8] sm:$0xff]  ;;  %v3271_v49 = vld [vmem:[#allocation7 + $0x8e8] sm:$0xff]  ;;  %v3272_v24 = vld [vmem:[#allocation7 + $0x8f0] sm:$0xff] }
 0x4d0   : > { %v2878_v55 = vadd.f32 %v2877_v53, %v2845_v3  ;;  %v2989_v38 = vadd.f32 %v2988_v6, %v2956_v20  ;;  %v3110_v52 = vadd.f32 %v7770_v25, %v3076_v42  ;;  %v3068_v8 = vmul.f32 %v3036_v13, %v7846_v29  ;;  %v3264_v53 = vld [vmem:[#allocation7 + $0x8b0] sm:$0xff]  ;;  %v8483_v6 = vld [vmem:[#allocation26_spill] sm:$0xff] }
 0x4d1   : > { %2888 = vadd.xlane.f32.xlu1 %v2887_v51  ;;  %v2999_v22 = vadd.f32 %v2998_v2, %v2965_v11  ;;  %v3079_v54 = vmul.f32 %v3047_v19, %v7874_v34  ;;  %v3069_v36 = vmul.f32 %v3037_v60, %v7850_v48  ;;  %v3070_v1 = vmul.f32 %v3038_v43, %v7861_v27  ;;  %v8482_v11 = vld [vmem:[#allocation25_spill] sm:$0xff]  ;;  %v3263_v51 = vld [vmem:[#allocation7 + $0x8a8] sm:$0xff]  ;;  %v3383_v43 = vld [vmem:[#allocation7 + $0x9e0] sm:$0xff] }
 0x4d2   : > { %v2990_v63 = vadd.f32 %v2989_v38, %v2957_v26  ;;  %v3111_v57 = vadd.f32 %v3110_v52, %v3077_v30  ;;  %v3101_v15 = vadd.f32 %v8481_v40, %v3068_v8  ;;  %v3189_v25 = vmul.f32 %v3157_v47, %v7854_v32  ;;  %v3273_v26 = vld [vmem:[#allocation7 + $0x8f8] sm:$0xff]  ;;  %v8484_v30 = vld [vmem:[#allocation27_spill] sm:$0xff]  ;;  %v3385_v52 = vld [vmem:[#allocation7 + $0x9f0] sm:$0xff] }
 0x4d3   : > { %2879 = vadd.xlane.f32.xlu0 %v2878_v55  ;;  %v3000_v5 = vadd.f32 %v2999_v22, %v2966_v59  ;;  %v3071_v17 = vmul.f32 %v3039_v28, %v7868_v50  ;;  %v3190_v4 = vmul.f32 %v3158_v21, %v7856_v46  ;;  %v3191_v16 = vmul.f32 %v3159_v45, %v7870_v10  ;;  %v3262_v59 = vld [vmem:[#allocation7 + $0x8a0] sm:$0xff]  ;;  %v3265_v47 = vld [vmem:[#allocation7 + $0x8b8] sm:$0xff]  ;;  %v3384_v38 = vld [vmem:[#allocation7 + $0x9e8] sm:$0xff] }
 0x4d4   : > { %v2991_v3 = vadd.f32 %v2990_v63, %v2958_v62  ;;  %v3112_v9 = vadd.f32 %v3111_v57, %v3078_v41  ;;  %v3102_v44 = vadd.f32 %v3101_v15, %v3069_v36  ;;  %v3223_v0 = vadd.f32 %v8482_v11, %v3189_v25  ;;  %v3375_v22 = vld [vmem:[#allocation7 + $0x9a0] sm:$0xff]  ;;  %v3386_v63 = vld [vmem:[#allocation7 + $0x9f8] sm:$0xff]  ;;  %v3376_v40 = vld [vmem:[#allocation7 + $0x9a8] sm:$0xff] }
 0x4d5   : > { %3001 = vadd.xlane.f32.xlu1 %v3000_v5  ;;  %v3192_v12 = vmul.f32 %v3160_v61, %v7874_v34  ;;  %v3181_v56 = vmul.f32 %v3149_v33, %v7846_v29  ;;  %v3182_v31 = vmul.f32 %v3150_v39, %v7850_v48  ;;  %v3183_v23 = vmul.f32 %v3151_v14, %v7861_v27  ;;  %v3377_v15 = vld [vmem:[#allocation7 + $0x9b0] sm:$0xff] }
 0x4d6   : > { %v3113_v18 = vadd.f32 %v3112_v9, %v3079_v54  ;;  %v3103_v37 = vadd.f32 %v3102_v44, %v3070_v1  ;;  %v3224_v20 = vadd.f32 %v3223_v0, %v3190_v4  ;;  %v3302_v13 = vmul.f32 %v3270_v7, %v7854_v32  ;;  %v8485_v1 = vld [vmem:[#allocation29_spill] sm:$0xff]  ;;  %v8486_v4 = vld [vmem:[#allocation39_spill] sm:$0xff] }
 0x4d7   : > { %2992 = vadd.xlane.f32.xlu0 %v2991_v3  ;;  %v3184_v35 = vmul.f32 %v3152_v58, %v7868_v50  ;;  %v3214_v19 = vadd.f32 %v8483_v6, %v3181_v56  ;;  %v3303_v42 = vmul.f32 %v3271_v49, %v7856_v46  ;;  %v3304_v60 = vmul.f32 %v3272_v24, %v7870_v10  ;;  %v3378_v9 = vld [vmem:[#allocation7 + $0x9b8] sm:$0xff] }
 0x4d8   : > { %v3104_v2 = vadd.f32 %v3103_v37, %v3071_v17  ;;  %v3225_v62 = vadd.f32 %v3224_v20, %v3191_v16  ;;  %v3336_v41 = vadd.f32 %v8484_v30, %v3302_v13  ;;  %v3294_v55 = vmul.f32 %v3262_v59, %v7846_v29  ;;  %v8487_v49 = vld [vmem:[#allocation30_spill] sm:$0xff] }
 0x4d9   : > { %3114 = vadd.xlane.f32.xlu1 %v3113_v18  ;;  %v3215_v28 = vadd.f32 %v3214_v19, %v3182_v31  ;;  %v3305_v8 = vmul.f32 %v3273_v26, %v7874_v34  ;;  %v3295_v21 = vmul.f32 %v3263_v51, %v7850_v48  ;;  %v3296_v45 = vmul.f32 %v3264_v53, %v7861_v27 }
 0x4da   : > { %v3226_v54 = vadd.f32 %v3225_v62, %v3192_v12  ;;  %v3337_v36 = vadd.f32 %v3336_v41, %v3303_v42  ;;  %v3327_v33 = vadd.f32 %v8485_v1, %v3294_v55  ;;  %v3415_v57 = vmul.f32 %v3383_v43, %v7854_v32 }
 0x4db   : > { %3105 = vadd.xlane.f32.xlu0 %v3104_v2  ;;  %v3216_v61 = vadd.f32 %v3215_v28, %v3183_v23  ;;  %v3297_v25 = vmul.f32 %v3265_v47, %v7868_v50  ;;  %v3416_v39 = vmul.f32 %v3384_v38, %v7856_v46  ;;  %v3417_v14 = vmul.f32 %v3385_v52, %v7870_v10 }
 0x4dc   : > { %v3338_v5 = vadd.f32 %v3337_v36, %v3304_v60  ;;  %v3328_v17 = vadd.f32 %v3327_v33, %v3295_v21  ;;  %v3449_v16 = vadd.f32 %v8486_v4, %v3415_v57  ;;  %v3407_v7 = vmul.f32 %v3375_v22, %v7846_v29 }
 0x4dd   : > { %3227 = vadd.xlane.f32.xlu1 %v3226_v54  ;;  %v3217_v3 = vadd.f32 %v3216_v61, %v3184_v35  ;;  %v3418_v32 = vmul.f32 %v3386_v63, %v7874_v34  ;;  %v3408_v44 = vmul.f32 %v3376_v40, %v7850_v48  ;;  %v3409_v11 = vmul.f32 %v3377_v15, %v7861_v27 }
 0x4de   : > { %v3339_v0 = vadd.f32 %v3338_v5, %v3305_v8  ;;  %v3329_v58 = vadd.f32 %v3328_v17, %v3296_v45  ;;  %v3450_v46 = vadd.f32 %v3449_v16, %v3416_v39  ;;  %v3440_v10 = vadd.f32 %v8487_v49, %v3407_v7 }
 0x4df   : > { %3218 = vadd.xlane.f32.xlu0 %v3217_v3  ;;  %v3410_v56 = vmul.f32 %v3378_v9, %v7868_v50 }
 0x4e0   : > { %v3330_v24 = vadd.f32 %v3329_v58, %v3297_v25  ;;  %v3451_v12 = vadd.f32 %v3450_v46, %v3417_v14  ;;  %v3441_v29 = vadd.f32 %v3440_v10, %v3408_v44 }
 0x4e1   : > { %3340 = vadd.xlane.f32.xlu1 %v3339_v0 }
 0x4e2   : > { %v3452_v31 = vadd.f32 %v3451_v12, %v3418_v32  ;;  %v3442_v23 = vadd.f32 %v3441_v29, %v3409_v11 }
 0x4e3   : > { %3331 = vadd.xlane.f32.xlu0 %v3330_v24 }
 0x4e4   : > { %v3443_v34 = vadd.f32 %v3442_v23, %v3410_v56 }
 0x4e5   : > { %3453 = vadd.xlane.f32.xlu1 %v3452_v31 }
 0x4e7   : > { %3444 = vadd.xlane.f32.xlu0 %v3443_v34 }
 0x522   : > { %v2410_v48 = vpop.xlane.xlu1 %2409 }
 0x525   : > { %v2419_v27 = vpop.xlane.xlu0 %2418 }
 0x526   : > { %v2438_v47 = vadd.f32 %v2419_v27, %v2410_v48 }
 0x527   : > { %v2523_v59 = vpop.xlane.xlu1 %2522 }
 0x52c   : > { %v2532_v18 = vpop.xlane.xlu0 %2531 }
 0x52d   : > { %v2636_v37 = vpop.xlane.xlu1 %2635  ;;  %v2551_v28 = vadd.f32 %v2532_v18, %v2523_v59 }
 0x530   : > { %v2645_v20 = vpop.xlane.xlu0 %2644 }
 0x531   : > { %v2749_v26 = vpop.xlane.xlu1 %2748  ;;  %v2664_v54 = vadd.f32 %v2645_v20, %v2636_v37 }
 0x534   : > { %v2758_v13 = vpop.xlane.xlu0 %2757 }
 0x535   : > { %v2862_v51 = vpop.xlane.xlu1 %2861  ;;  %v2777_v15 = vadd.f32 %v2758_v13, %v2749_v26 }
 0x538   : > { %v2871_v53 = vpop.xlane.xlu0 %2870 }
 0x539   : > { %v2890_v7 = vadd.f32 %v2871_v53, %v2862_v51 }
 0x53a   : > { %v2975_v35 = vpop.xlane.xlu1 %2974 }
 0x53c   : > { %v2984_v50 = vpop.xlane.xlu0 %2983 }
 0x53d   : > { %v3003_v46 = vadd.f32 %v2984_v50, %v2975_v35 }
 0x53e   : > { %v3088_v6 = vpop.xlane.xlu1 %3087 }
 0x540   : > { %v3097_v19 = vpop.xlane.xlu0 %3096 }
 0x541   : > { %v3116_v48 = vadd.f32 %v3097_v19, %v3088_v6 }
 0x542   : > { %v3201_v42 = vpop.xlane.xlu1 %3200 }
 0x544   : > { %v3210_v60 = vpop.xlane.xlu0 %3209 }
 0x546   : > { %v8055_v43 = vpop.xlane.xlu1 %3313 }
 0x548   : > { %v8057_v2 = vpop.xlane.xlu0 %3322 }
 0x54a   : > { %v8059_v62 = vpop.xlane.xlu1 %3426 }
 0x54c   : > { %v8061_v30 = vpop.xlane.xlu0 %3435 }
 0x54e   : > { %v2437_v41 = vpop.xlane.xlu1 %2436 }
 0x550   : > { %v2428_v55 = vpop.xlane.xlu0 %2427 }
 0x551   : > { %v2439_v38 = vadd.f32 %v2438_v47, %v2428_v55 }
 0x552   : > { %v2550_v52 = vpop.xlane.xlu1 %2549 }
 0x553   : > { %v2440_v8 = vadd.f32 %v2439_v38, %v2437_v41  ;;  %v3229_v41 = vadd.f32 %v3210_v60, %v3201_v42 }
 0x554   : > { %v2541_v21 = vpop.xlane.xlu0 %2540 }
 0x555   : > { %v2552_v45 = vadd.f32 %v2551_v28, %v2541_v21  ;;  %v2441_v1 = vrot.slane %v2440_v8, 4 }
 0x556   : > { %v2663_v22 = vpop.xlane.xlu1 %2662 }
 0x557   : > { %v2553_v36 = vadd.f32 %v2552_v45, %v2550_v52  ;;  %v2442_v25 = vadd.f32 %v2441_v1, %v2440_v8  ;;  %v8488_v52 = vld [vmem:[#allocation19_spill] sm:$0xff] }
 0x558   : > { %v2654_v33 = vpop.xlane.xlu0 %2653  ;;  %vm2447_vm11 = vcmp.eq.s32.totalorder %v8488_v52, 0  ;;  %vm2560_vm12 = vcmp.eq.s32.totalorder %v8488_v52, 1  ;;  %vm2673_vm13 = vcmp.eq.s32.totalorder %v8488_v52, 2  ;;  %vm2786_vm14 = vcmp.eq.s32.totalorder %v8488_v52, 3 }
 0x559   : > { %v2665_v63 = vadd.f32 %v2664_v54, %v2654_v33  ;;  %v2554_v57 = vrot.slane %v2553_v36, 4  ;;  %v2443_v3 = vrot.slane %v2442_v25, 2  ;;  %v3342_v54 = vadd.f32 %v8057_v2, %v8055_v43 }
 0x55a   : > { %v2776_v40 = vpop.xlane.xlu1 %2775  ;;  %v3455_v43 = vadd.f32 %v8061_v30, %v8059_v62  ;;  %vm2899_vm15 = vcmp.eq.s32.totalorder %v8488_v52, 4  ;;  %vm3012_vm0 = vcmp.eq.s32.totalorder %v8488_v52, 5  ;;  %vm3125_vm1 = vcmp.eq.s32.totalorder %v8488_v52, 6 }
 0x55b   : > { %v2666_v61 = vadd.f32 %v2665_v63, %v2663_v22  ;;  %v2555_v17 = vadd.f32 %v2554_v57, %v2553_v36  ;;  %v2444_v10 = vadd.f32 %v2443_v3, %v2442_v25  ;;  %vm3238_vm2 = vcmp.eq.s32.totalorder %v8488_v52, 7 }
 0x55c   : > { %v2767_v39 = vpop.xlane.xlu0 %2766  ;;  %vm3351_vm3 = vcmp.eq.s32.totalorder %v8488_v52, 8  ;;  %vm3464_vm4 = vcmp.eq.s32.totalorder %v8488_v52, 9 }
 0x55d   : > { %v2667_v14 = vrot.slane %v2666_v61, 4  ;;  %v2778_v5 = vadd.f32 %v2777_v15, %v2767_v39  ;;  %v2556_v11 = vrot.slane %v2555_v17, 2  ;;  %v2445_v18 = vrot.slane %v2444_v10, 1 }
 0x55e   : > { %v2889_v4 = vpop.xlane.xlu1 %2888 }
 0x55f   : > { %v2779_v16 = vadd.f32 %v2778_v5, %v2776_v40  ;;  %v2668_v32 = vadd.f32 %v2667_v14, %v2666_v61  ;;  %v2557_v31 = vadd.f32 %v2556_v11, %v2555_v17  ;;  %v2446_v28 = vadd.f32 %v2445_v18, %v2444_v10  ;;  %v2337_v61 = vld [vmem:[#allocation8] sm:$0x1] }
 0x560   : > { %v2880_v9 = vpop.xlane.xlu0 %2879 }
 0x561   : > { %v2780_v44 = vrot.slane %v2779_v16, 4  ;;  %v2891_v0 = vadd.f32 %v2890_v7, %v2880_v9  ;;  %v2669_v24 = vrot.slane %v2668_v32, 2  ;;  %v2558_v53 = vrot.slane %v2557_v31, 1 }
 0x562   : > { %v3002_v58 = vpop.xlane.xlu1 %3001  ;;  %v2448_v63 = vsel %vm2447_vm11, %v2446_v28, 0.0 }
 0x563   : > { %v2781_v49 = vadd.f32 %v2780_v44, %v2779_v16  ;;  %v2892_v12 = vadd.f32 %v2891_v0, %v2889_v4  ;;  %v2670_v37 = vadd.f32 %v2669_v24, %v2668_v32  ;;  %v2559_v36 = vadd.f32 %v2558_v53, %v2557_v31 }
 0x564   : > { %v2993_v56 = vpop.xlane.xlu0 %2992  ;;  %v2449_v3 = vadd.f32 %v2448_v63, %v2337_v61 }
 0x565   : > { %v3004_v29 = vadd.f32 %v3003_v46, %v2993_v56  ;;  %v2893_v23 = vrot.slane %v2892_v12, 4  ;;  %v2782_v27 = vrot.slane %v2781_v49, 2  ;;  %v2671_v8 = vrot.slane %v2670_v37, 1 }
 0x566   : > { %v3115_v34 = vpop.xlane.xlu1 %3114  ;;  %v2561_v2 = vsel %vm2560_vm12, %v2559_v36, 0.0 }
 0x567   : > { %v3005_v59 = vadd.f32 %v3004_v29, %v3002_v58  ;;  %v2894_v20 = vadd.f32 %v2893_v23, %v2892_v12  ;;  %v2783_v47 = vadd.f32 %v2782_v27, %v2781_v49  ;;  %v2672_v57 = vadd.f32 %v2671_v8, %v2670_v37 }
 0x568   : > { %v3106_v26 = vpop.xlane.xlu0 %3105  ;;  %v2562_v62 = vadd.f32 %v2561_v2, %v2449_v3 }
 0x569   : > { %v3006_v13 = vrot.slane %v3005_v59, 4  ;;  %v3117_v51 = vadd.f32 %v3116_v48, %v3106_v26  ;;  %v2895_v35 = vrot.slane %v2894_v20, 2  ;;  %v2784_v1 = vrot.slane %v2783_v47, 1 }
 0x56a   : > { %v3228_v50 = vpop.xlane.xlu1 %3227  ;;  %v2674_v32 = vsel %vm2673_vm13, %v2672_v57, 0.0 }
 0x56b   : > { %v3007_v55 = vadd.f32 %v3006_v13, %v3005_v59  ;;  %v3118_v38 = vadd.f32 %v3117_v51, %v3115_v34  ;;  %v2896_v19 = vadd.f32 %v2895_v35, %v2894_v20  ;;  %v2785_v17 = vadd.f32 %v2784_v1, %v2783_v47 }
 0x56c   : > { %v3219_v6 = vpop.xlane.xlu0 %3218  ;;  %v2675_v29 = vadd.f32 %v2674_v32, %v2562_v62 }
 0x56d   : > { %v3008_v21 = vrot.slane %v3007_v55, 2  ;;  %v3119_v45 = vrot.slane %v3118_v38, 4  ;;  %v3230_v22 = vadd.f32 %v3229_v41, %v3219_v6  ;;  %v2897_v25 = vrot.slane %v2896_v19, 1 }
 0x56e   : > { %v3341_v40 = vpop.xlane.xlu1 %3340  ;;  %v2787_v10 = vsel %vm2786_vm14, %v2785_v17, 0.0  ;;  %v8489_v6 = vlaneseq }
 0x56f   : > { %v3009_v42 = vadd.f32 %v3008_v21, %v3007_v55  ;;  %v3120_v60 = vadd.f32 %v3119_v45, %v3118_v38  ;;  %v3231_v33 = vadd.f32 %v3230_v22, %v3228_v50  ;;  %v2898_v11 = vadd.f32 %v2897_v25, %v2896_v19 }
 0x570   : > { %v3332_v15 = vpop.xlane.xlu0 %3331  ;;  %v2788_v59 = vadd.f32 %v2787_v10, %v2675_v29  ;;  %v337_v19 = vshrl.u32 %v8489_v6, 7 }
 0x571   : > { %v3121_v39 = vrot.slane %v3120_v60, 2  ;;  %v3232_v14 = vrot.slane %v3231_v33, 4  ;;  %v3343_v5 = vadd.f32 %v3342_v54, %v3332_v15  ;;  %v3010_v4 = vrot.slane %v3009_v42, 1 }
 0x572   : > { %v3454_v49 = vpop.xlane.xlu1 %3453  ;;  %v2900_v23 = vsel %vm2899_vm15, %v2898_v11, 0.0  ;;  %vm3467_vm5 = vcmp.eq.s32.totalorder %v337_v19, 0 }
 0x573   : > { %v3122_v16 = vadd.f32 %v3121_v39, %v3120_v60  ;;  %v3233_v7 = vadd.f32 %v3232_v14, %v3231_v33  ;;  %v3344_v9 = vadd.f32 %v3343_v5, %v3341_v40  ;;  %v3011_v24 = vadd.f32 %v3010_v4, %v3009_v42 }
 0x574   : > { %v3445_v44 = vpop.xlane.xlu0 %3444  ;;  %v2901_v13 = vadd.f32 %v2900_v23, %v2788_v59 }
 0x575   : > { %v3123_v0 = vrot.slane %v3122_v16, 1  ;;  %v3234_v58 = vrot.slane %v3233_v7, 2  ;;  %v3456_v46 = vadd.f32 %v3455_v43, %v3445_v44  ;;  %v3345_v30 = vrot.slane %v3344_v9, 4 }
 0x576   : > { %v3013_v37 = vsel %vm3012_vm0, %v3011_v24, 0.0 }
 0x577   : > { %v3235_v12 = vadd.f32 %v3234_v58, %v3233_v7  ;;  %v3457_v56 = vadd.f32 %v3456_v46, %v3454_v49  ;;  %v3346_v31 = vadd.f32 %v3345_v30, %v3344_v9  ;;  %v3124_v34 = vadd.f32 %v3123_v0, %v3122_v16 }
 0x578   : > { %v3014_v50 = vadd.f32 %v3013_v37, %v2901_v13 }
 0x579   : > { %v3236_v48 = vrot.slane %v3235_v12, 1  ;;  %v3458_v27 = vrot.slane %v3457_v56, 4  ;;  %v3347_v18 = vrot.slane %v3346_v31, 2  ;;  %v3126_v53 = vsel %vm3125_vm1, %v3124_v34, 0.0 }
 0x57a   : > { %v3127_v38 = vadd.f32 %v3126_v53, %v3014_v50 }
 0x57b   : > { %v3237_v20 = vadd.f32 %v3236_v48, %v3235_v12  ;;  %v3459_v26 = vadd.f32 %v3458_v27, %v3457_v56  ;;  %v3348_v51 = vadd.f32 %v3347_v18, %v3346_v31 }
 0x57d   : > { %v3460_v35 = vrot.slane %v3459_v26, 2  ;;  %v3349_v41 = vrot.slane %v3348_v51, 1  ;;  %v3239_v47 = vsel %vm3238_vm2, %v3237_v20, 0.0 }
 0x57e   : > { %v3240_v21 = vadd.f32 %v3239_v47, %v3127_v38 }
 0x57f   : > { %v3461_v55 = vadd.f32 %v3460_v35, %v3459_v26  ;;  %v3350_v28 = vadd.f32 %v3349_v41, %v3348_v51 }
 0x581   : > { %v3462_v8 = vrot.slane %v3461_v55, 1  ;;  %v3352_v45 = vsel %vm3351_vm3, %v3350_v28, 0.0 }
 0x582   : > { %v3353_v54 = vadd.f32 %v3352_v45, %v3240_v21 }
 0x583   : > { %v3463_v22 = vadd.f32 %v3462_v8, %v3461_v55 }
 0x585   : > { %v3465_v36 = vsel %vm3464_vm4, %v3463_v22, 0.0 }
 0x586   : > { %v3466_v1 = vadd.f32 %v3465_v36, %v3353_v54 }
 0x588   : > { %v3468_v52 = vsel %vm3467_vm5, %v3466_v1, 0.0 }
 0x589   : > { %3471 = vst.msk [vmem:[%s327_s22] sm:$0x1] %vm3470_vm6, %v3468_v52 }
 0x58a   : > { %4726 = shalt.err (!%p4723_p5)
}
 0x58b   : > { %s4727_s29 = scalar_lea.hbm %s8087_s10, 16  ;;  %s4731_s3 = scalar_lea.hbm %s8136_s7, 32 }
 0x58c   : > { %p4728_p0 = scmp.ne.s32.totalorder %s8087_s10, %s4727_s29  ;;  %p4732_p10 = scmp.lt.u32.totalorder %s8087_s10, %s8136_s7 }
 0x58d   : > { %p4733_p12 = scmp.lt.u32.totalorder %s4731_s3, %s4727_s29  ;;  %p4735_p2 = scmp.lt.u32.totalorder %s4727_s29, %s8087_s10 }
 0x58e   : > { %p4729_p6 = pnand %p4728_p0, %p8490_p3 }
 0x58f   : > { %p4734_p1 = por %p4733_p12, %p4732_p10 }
 0x590   : > { %p4730_p9 = pneg %p4729_p6 }
 0x591   : > { %p4736_p4 = por %p4735_p2, %p4734_p1 }
 0x593   : > { %p4737_p7 = pnand %p4736_p4, %p4730_p9 }
 0x595   : > { %4740 = shalt.err (!%p4737_p7)
}
 0x596   : > { %3707 = dma.vmem_to_hbm [thread:$0]  (%p8490_p3), %s8089_s8, 16, %s8087_s10, %s3473_s21  }
 0x597 PF: > { %s8491_s30 = sld [smem:[#allocation18_spill]]  ;;  %p3734_p8 = scmp.ge.s32.totalorder %s4787_s27, 2 }
 0x598   : > { %s3497_s12 = sand.u32 1, %s4775_s24  }
 0x599   : > { %s3498_s19 = scalar_lea.sflag [#allocation4], %s3497_s12 }
 0x59d   : > { %p8492_p11 = scmp.ne.s32.totalorder %s8491_s30, 0 }
 0x59f   : > { %p3723_p13 = pnand %p3734_p8, %p8492_p11 }
 0x5a1   : > { %4770 = dma.done.wait (!%p3723_p13), %s3498_s19, 16  }
 0x5a2   : > { %4772 = vsyncadd (!%p3723_p13), %s3498_s19, 4294967280  ;;  %s8493_s27 = sld [smem:[#allocation16_spill]]  ;;  %s8494_s20 = sld [smem:[#allocation15_spill]] }
 0x5a3   : > { %s8495_s26 = sld [smem:[#allocation17_spill]]  ;;  %s8496_s24 = smov %s4779_s25 }
 0x5a8   : > { %p20_p5 = scmp.ge.s32.totalorder %s8493_s27, 4   ;;  %s8497_s25 = smov %s8494_s20 }
 0x5aa   :  { %22 = sbr.rel (!%p20_p5) target bundleno = 8 (0x8), region = 109 }
 0x5b1   :  { %3502 = vsyncpa [#allocation3], 1 }
 0x5b2   :  { %3504 = vsyncpa [#allocation3 + $0x1], 1 }
 0x5b3   :  { %3505 = vsyncpa [#allocation6], 1 }
 0x5b4   :  { %3506 = vsyncpa [#allocation9], 1 }
 0x5b5   :  { %3507 = vsyncpa [#allocation4], 1 }
 0x5b6   :  { %3509 = vsyncpa [#allocation4 + $0x1], 1 }

</bundles_post_ra>
